<compile_context>
chip_gen: v5e
topology: v5e:2x2
jax: 0.10.0
libtpu: 0.0.40
codegen_flags: <defaults>
</compile_context>

<pallas_src>
import functools

import jax
import jax.numpy as jnp
from jax.experimental import pallas as pl
from jax.experimental.pallas import tpu as pltpu

_LANE = 128


def _round_up(x, m):
    return ((x + m - 1) // m) * m


def _vmem_defaults():
    """(budget_bytes, limit_bytes, small_vmem) — generation aware, safe fallback."""
    cap = None
    try:
        info = pltpu.get_tpu_info()
        for name in ("vmem_capacity_bytes", "vmem_bytes"):
            v = getattr(info, name, None)
            if v:
                cap = int(v)
                break
    except Exception:
        cap = None
    if cap is None:
        cap = 64 * 1024 * 1024                       # assume smallest (v7x-class) part
    if cap >= 100 * 1024 * 1024:                     # 128 MiB parts: v5e / v6e
        return 64 * 1024 * 1024, 96 * 1024 * 1024, False
    return 24 * 1024 * 1024, 40 * 1024 * 1024, True  # 64 MiB parts: v7x


def _fp_kernel(num_layers, nbits, use_approx_recip,
               xyz1_ref, xyz2_ref, p1_ref, p2w_ref, *rest):
    """One (batch, N-tile) step: 3-NN inverse-distance interpolation + MLP.

    Ref shapes (leading batch dim squeezed away by the BlockSpecs):
      xyz1_ref: [tN, 3]   query points, channels-last
      xyz2_ref: [3, S]    sampled points, channels-first (lane-dense coords)
      p1_ref:   [tN, D1]  skip features (compute dtype)
      p2w_ref:  [S, H0p]  points2 pre-multiplied by W0[D1:, :] (compute dtype)
      rest:     W0a [D1,H0p], b0 [1,H0p], W1 [H0p,H1p], b1, ..., out [tN, Cp]
    """
    out_ref = rest[-1]
    wb = rest[:-1]

    x1 = xyz1_ref[...].astype(jnp.float32)   # [tN, 3]
    x2 = xyz2_ref[...].astype(jnp.float32)   # [3, S]
    tn = x1.shape[0]
    s = x2.shape[1]

    # Squared distances: |x1|^2 + |x2|^2 - 2*x1.x2.  The cross term runs on
    # the (otherwise idle) MXU; the norms are three cheap channel slices.
    x1sq = (x1[:, 0:1] * x1[:, 0:1] + x1[:, 1:2] * x1[:, 1:2]
            + x1[:, 2:3] * x1[:, 2:3])                          # [tN, 1]
    x2sq = (x2[0:1, :] * x2[0:1, :] + x2[1:2, :] * x2[1:2, :]
            + x2[2:3, :] * x2[2:3, :])                          # [1, S]
    cross = jnp.dot(x1, x2, preferred_element_type=jnp.float32)  # [tN, S]
    # Clamp: guards cancellation-induced negatives and keeps keys normal floats.
    d = jnp.maximum(x1sq + x2sq - 2.0 * cross, 1e-30)

    # Packed key: distance with its low `nbits` mantissa bits replaced by the
    # column index.  For non-negative f32 the bit pattern is order-preserving,
    # so ONE float min fuses min+argmin (lowest index wins ties, like sort).
    col = jax.lax.broadcasted_iota(jnp.int32, (tn, s), 1)
    himask = ~((1 << nbits) - 1)                                 # Python int, fits i32
    key = pltpu.bitcast((pltpu.bitcast(d, jnp.int32) & himask) | col, jnp.float32)

    a_un = jnp.zeros((tn, s), jnp.float32)   # un-normalized interpolation matrix
    wsum = jnp.zeros((tn, 1), jnp.float32)
    for _ in range(3):
        kmin = jnp.min(key, axis=-1, keepdims=True)              # [tN,1] single reduce
        hit = key == kmin                                        # [tN,S] exact one-hot
        dmin = pltpu.bitcast(pltpu.bitcast(kmin, jnp.int32) & himask, jnp.float32)
        wk = 1.0 / jnp.maximum(dmin, 1e-10)                      # dists<1e-10 clamp
        a_un = a_un + jnp.where(hit, wk, 0.0)
        wsum = wsum + wk
        key = jnp.where(hit, jnp.inf, key)                       # exclude chosen col

    w0a = wb[0][...]                                     # [D1, H0p] compute dtype
    b0 = wb[1][...]                                      # [1, H0p]  f32
    p1 = p1_ref[...]                                     # [tN, D1]  compute dtype
    p2w = p2w_ref[...]                                   # [S, H0p]  compute dtype
    cdt = p2w.dtype

    # First MLP layer with the interpolation fused in; normalization applied
    # AFTER the matmul on the (usually narrower) [tN, H0p] activation:
    #   h = relu(p1 @ W0[:D1] + (a_un @ (p2 @ W0[D1:])) / wsum + b0)
    h_int = jnp.dot(a_un.astype(cdt), p2w, preferred_element_type=jnp.float32)
    if use_approx_recip:
        inv = pl.reciprocal(wsum, approx=True)           # EUP slot is idle
    else:
        inv = 1.0 / wsum                                 # exact on the f32 path
    h = h_int * inv + jnp.dot(p1, w0a, preferred_element_type=jnp.float32)
    h = jnp.maximum(h + b0, 0.0)

    for layer in range(1, num_layers):
        w = wb[2 * layer][...]
        b = wb[2 * layer + 1][...]
        h = jnp.dot(h.astype(w.dtype), w, preferred_element_type=jnp.float32) + b
        h = jnp.maximum(h, 0.0)

    out_ref[...] = h.astype(out_ref.dtype)


def pointnet_fp(xyz1, xyz2, points1, points2, ws, bs, *, tile_n=512,
                compute_dtype=jnp.float32,
                vmem_budget_bytes=None, vmem_limit_bytes=None):
    """xyz1:[B,3,N] xyz2:[B,3,S] points1:[B,D1,N] points2:[B,D2,S] -> [B, mlp[-1], N]."""
    B, _, N = xyz1.shape
    S = xyz2.shape[2]
    D1 = points1.shape[1]
    D2 = points2.shape[1]
    # TODO(synk): the S == 1 branch of the PyTorch forward (pure repeat of
    # points2) and the points1=None branch are not specialized; S >= 3 + skip
    # features only.
    assert 3 <= S < (1 << 20)

    num_layers = len(ws)
    assert num_layers >= 1
    c_out = ws[-1].shape[1]
    dsize = jnp.dtype(compute_dtype).itemsize
    nbits = max(1, int(S - 1).bit_length())      # index bits packed into the key

    budget, limit, small_vmem = _vmem_defaults()
    if vmem_budget_bytes is None:
        vmem_budget_bytes = budget
    if vmem_limit_bytes is None:
        vmem_limit_bytes = limit

    # Fold & pad MLP weights: every layer's output width -> multiple of 128
    # lanes (unmasked vst, dense MXU N dim).  Zero padding is exact: padded
    # channels stay 0 through ReLU and feed zero weight rows.
    widths = [w.shape[1] for w in ws]
    pwidths = [_round_up(h, _LANE) for h in widths]
    ws_p, bs_p = [], []
    for l, (w, b) in enumerate(zip(ws, bs)):
        in_w = (D1 + D2) if l == 0 else pwidths[l - 1]
        wp = jnp.zeros((in_w, pwidths[l]), jnp.float32)
        wp = wp.at[: w.shape[0], : w.shape[1]].set(w)
        bp = jnp.zeros((1, pwidths[l]), jnp.float32)
        bp = bp.at[:, : w.shape[1]].set(jnp.reshape(b, (1, -1)))
        ws_p.append(wp)
        bs_p.append(bp)
    h0p, c_out_p = pwidths[0], pwidths[-1]

    # Fuse interpolation into layer 0: p2w = points2^T @ W0[D1:, :]  -> [B,S,H0p]
    w0a = ws_p[0][:D1, :].astype(compute_dtype)          # [D1, H0p]
    w0b = ws_p[0][D1:, :].astype(compute_dtype)          # [D2, H0p]
    p2_t = jnp.transpose(points2, (0, 2, 1)).astype(compute_dtype)
    p2w = jnp.einsum('bsd,dh->bsh', p2_t, w0b,
                     preferred_element_type=jnp.float32).astype(compute_dtype)

    xyz1_t = jnp.transpose(xyz1, (0, 2, 1)).astype(jnp.float32)       # [B, N, 3]
    p1_t = jnp.transpose(points1, (0, 2, 1)).astype(compute_dtype)    # [B, N, D1]
    xyz2_f = xyz2.astype(jnp.float32)                                 # [B, 3, S]

    # Pick the N tile: as large as the (generation-aware) VMEM budget allows,
    # always a multiple of 8.  Estimates use lane/sublane-padded block sizes.
    def vmem_est(t):
        io = 2 * (t * _LANE * 4                       # xyz1 [t,3] lane-padded
                  + 8 * S * 4                         # xyz2 [3,S] sublane-padded
                  + t * _round_up(D1, _LANE) * dsize
                  + S * h0p * dsize
                  + t * c_out_p * 4)
        wgt = 2 * (D1 * h0p * dsize
                   + sum(pwidths[l - 1] * pwidths[l] * dsize
                         for l in range(1, num_layers))
                   + sum(p * 4 for p in pwidths))
        # d / key / a_un / hit / where temps + bf16 cast + layer activations.
        tmp = 10 * t * S * 4 + t * S * dsize + 3 * t * h0p * 4
        return io + wgt + tmp

    tn = max(8, min(_round_up(tile_n, 8), _round_up(N, 8)))
    while tn > 8 and vmem_est(tn) > vmem_budget_bytes:
        tn = max(8, _round_up(tn // 2, 8))
    if small_vmem:
        # Small-VMEM parts (v7x) have 2 TensorCores: keep >= 2 parallel grid
        # steps when possible.  Skipped on single-TC v5e/v6e.
        while tn > 8 and B * ((N + tn - 1) // tn) < 2:
            tn = max(8, _round_up(tn // 2, 8))

    n_pad = _round_up(N, tn)
    if n_pad != N:
        pad = ((0, 0), (0, n_pad - N), (0, 0))
        xyz1_t = jnp.pad(xyz1_t, pad)
        p1_t = jnp.pad(p1_t, pad)

    grid = (B, n_pad // tn)
    kern_ws = [w0a] + [w.astype(compute_dtype) for w in ws_p[1:]]
    args = [xyz1_t, xyz2_f, p1_t, p2w]
    for w, b in zip(kern_ws, bs_p):
        args.append(w)
        args.append(b)

    use_approx = jnp.dtype(compute_dtype) != jnp.dtype(jnp.float32)
    kernel_fn = functools.partial(_fp_kernel, num_layers, nbits, bool(use_approx))

    def build(single_buffer):
        def inv_kw():
            # Grid-invariant (or slow-axis-only) blocks: single-buffer to save VMEM.
            return dict(pipeline_mode=pl.Buffered(1)) if single_buffer else {}

        in_specs = [
            pl.BlockSpec((None, tn, 3), lambda b, i: (b, i, 0)),
            pl.BlockSpec((None, 3, S), lambda b, i: (b, 0, 0), **inv_kw()),
            pl.BlockSpec((None, tn, D1), lambda b, i: (b, i, 0)),
            pl.BlockSpec((None, S, h0p), lambda b, i: (b, 0, 0), **inv_kw()),
        ]
        for w, b in zip(kern_ws, bs_p):
            in_specs.append(pl.BlockSpec(w.shape, lambda bb, ii: (0, 0), **inv_kw()))
            in_specs.append(pl.BlockSpec(b.shape, lambda bb, ii: (0, 0), **inv_kw()))

        return pl.pallas_call(
            kernel_fn,
            out_shape=jax.ShapeDtypeStruct((B, n_pad, c_out_p), jnp.float32),
            grid_spec=pltpu.PrefetchScalarGridSpec(
                num_scalar_prefetch=0,
                grid=grid,
                in_specs=in_specs,
                out_specs=pl.BlockSpec((None, tn, c_out_p), lambda b, i: (b, i, 0)),
            ),
            compiler_params=pltpu.CompilerParams(
                dimension_semantics=("parallel", "parallel"),
                vmem_limit_bytes=vmem_limit_bytes),
        )

    try:
        out = build(True)(*args)
    except Exception:
        # pipeline_mode / Buffered(1) not supported by this runtime: fall back
        # to default double-buffering (correctness identical).
        out = build(False)(*args)

    out = out[:, :N, :c_out]
    # TODO(synk): emit [B, C, N] directly from the kernel (in-kernel transpose)
    # to remove this XLA transpose of the output.
    return jnp.transpose(out, (0, 2, 1))                 # [B, C_out, N] (PyTorch layout)


def make_params(key, in_channel, mlp, eps=1e-5):
    """Deterministic Conv1d(k=1)+BatchNorm1d params, folded into (W:[in,out], b:[1,out])."""
    ws, bs = [], []
    last = in_channel
    for out in mlp:
        key, k1, k2, k3, k4, k5, k6 = jax.random.split(key, 7)
        w_conv = 0.1 * jax.random.normal(k1, (out, last), jnp.float32)   # Conv1d weight [out,in,1]
        b_conv = 0.1 * jax.random.normal(k2, (out,), jnp.float32)
        gamma = 1.0 + 0.1 * jax.random.normal(k3, (out,), jnp.float32)
        beta = 0.1 * jax.random.normal(k4, (out,), jnp.float32)
        r_mean = 0.1 * jax.random.normal(k5, (out,), jnp.float32)
        r_var = 0.5 + 0.5 * jnp.abs(jax.random.normal(k6, (out,), jnp.float32))
        scale = gamma / jnp.sqrt(r_var + eps)
        w_eff = (w_conv * scale[:, None]).T                              # [in, out]
        b_eff = (b_conv - r_mean) * scale + beta                         # [out]
        ws.append(w_eff)
        bs.append(b_eff[None, :])
        last = out
    return ws, bs


def reference(xyz1, xyz2, points1, points2, ws, bs):
    """Pure-JAX mirror of the PyTorch forward (folded BN), for a sanity check."""
    x1 = jnp.transpose(xyz1, (0, 2, 1))
    x2 = jnp.transpose(xyz2, (0, 2, 1))
    p1 = jnp.transpose(points1, (0, 2, 1))
    p2 = jnp.transpose(points2, (0, 2, 1))
    d = -2.0 * jnp.einsum('bnc,bmc->bnm', x1, x2)
    d = d + jnp.sum(x1 ** 2, -1)[:, :, None] + jnp.sum(x2 ** 2, -1)[:, None, :]
    neg_top, idx = jax.lax.top_k(-d, 3)                      # 3 smallest distances
    dists = jnp.maximum(-neg_top, 1e-10)
    w = 1.0 / dists
    w = w / jnp.sum(w, -1, keepdims=True)
    gathered = jax.vmap(lambda p, i: p[i])(p2, idx)          # [B, N, 3, D2]
    interp = jnp.sum(gathered * w[..., None], axis=2)        # [B, N, D2]
    feat = jnp.concatenate([p1, interp], axis=-1)            # [B, N, D1+D2]
    for wl, bl in zip(ws, bs):
        feat = jnp.maximum(jnp.einsum('bnc,co->bno', feat, wl) + bl, 0.0)
    return jnp.transpose(feat, (0, 2, 1))                    # [B, C_out, N]


if __name__ == "__main__":
    key = jax.random.PRNGKey(0)
    B, N, S, D1, D2 = 2, 64, 16, 8, 8
    mlp = [32, 16]
    in_channel = D1 + D2

    k1, k2, k3, k4, kp = jax.random.split(key, 5)
    xyz1 = jax.random.normal(k1, (B, 3, N), jnp.float32)
    xyz2 = jax.random.normal(k2, (B, 3, S), jnp.float32)
    points1 = jax.random.normal(k3, (B, D1, N), jnp.float32)
    points2 = jax.random.normal(k4, (B, D2, S), jnp.float32)

    ws, bs = make_params(kp, in_channel, mlp)
    ref = reference(xyz1, xyz2, points1, points2, ws, bs)

    # f32 path: tight check against the pure-JAX mirror of the PyTorch forward.
    out = pointnet_fp(xyz1, xyz2, points1, points2, ws, bs)
    out = jax.block_until_ready(out)
    assert out.shape == (B, mlp[-1], N), out.shape
    max_err = float(jnp.max(jnp.abs(out - ref)))
    assert jnp.allclose(out, ref, rtol=1e-4, atol=1e-4), max_err

    # bf16 weight/activation path (v6e/v7x MXU); accumulation stays f32.
    out_bf16 = pointnet_fp(xyz1, xyz2, points1, points2, ws, bs,
                           compute_dtype=jnp.bfloat16)
    out_bf16 = jax.block_until_ready(out_bf16)
    max_err_bf16 = float(jnp.max(jnp.abs(out_bf16 - ref)))
    assert jnp.allclose(out_bf16, ref, rtol=1e-1, atol=1e-1), max_err_bf16

    print("KERNEL_OK")
</pallas_src>

<mosaic_0001>
module attributes {stable_mosaic.version = 11 : i64} {
  func.func @_fp_kernel(%arg0: i32, %arg1: i32, %arg2: memref<1x64x3xf32, #tpu.memory_space<vmem>>, %arg3: memref<1x3x16xf32, #tpu.memory_space<vmem>>, %arg4: memref<1x64x8xf32, #tpu.memory_space<vmem>>, %arg5: memref<1x16x128xf32, #tpu.memory_space<vmem>>, %arg6: memref<8x128xf32, #tpu.memory_space<vmem>>, %arg7: memref<1x128xf32, #tpu.memory_space<vmem>>, %arg8: memref<128x128xf32, #tpu.memory_space<vmem>>, %arg9: memref<1x128xf32, #tpu.memory_space<vmem>>, %arg10: memref<1x64x128xf32, #tpu.memory_space<vmem>>) attributes {dimension_semantics = [#tpu.dimension_semantics<parallel>, #tpu.dimension_semantics<parallel>], iteration_bounds = array<i64: 2, 1>, scalar_prefetch = 0 : i64, scratch_operands = 0 : i64, tpu.core_type = #tpu.core_type<tc>, window_params = [{transform_indices = @transform_0, window_bounds = array<i64: 1, 64, 3>}, {pipeline_mode = #tpu.pipeline_mode<synchronous>, transform_indices = @transform_1, window_bounds = array<i64: 1, 3, 16>}, {transform_indices = @transform_2, window_bounds = array<i64: 1, 64, 8>}, {pipeline_mode = #tpu.pipeline_mode<synchronous>, transform_indices = @transform_3, window_bounds = array<i64: 1, 16, 128>}, {pipeline_mode = #tpu.pipeline_mode<synchronous>, transform_indices = @transform_4, window_bounds = array<i64: 8, 128>}, {pipeline_mode = #tpu.pipeline_mode<synchronous>, transform_indices = @transform_5, window_bounds = array<i64: 1, 128>}, {pipeline_mode = #tpu.pipeline_mode<synchronous>, transform_indices = @transform_6, window_bounds = array<i64: 128, 128>}, {pipeline_mode = #tpu.pipeline_mode<synchronous>, transform_indices = @transform_7, window_bounds = array<i64: 1, 128>}, {transform_indices = @transform_8, window_bounds = array<i64: 1, 64, 128>}]} {
    %c0 = arith.constant 0 : index
    %c0_0 = arith.constant 0 : index
    %c0_1 = arith.constant 0 : index
    %0 = vector.load %arg2[%c0, %c0_0, %c0_1] : memref<1x64x3xf32, #tpu.memory_space<vmem>>, vector<1x64x3xf32>
    %1 = vector.shape_cast %0 : vector<1x64x3xf32> to vector<64x3xf32>
    %c0_2 = arith.constant 0 : index
    %c0_3 = arith.constant 0 : index
    %c0_4 = arith.constant 0 : index
    %2 = vector.load %arg3[%c0_2, %c0_3, %c0_4] : memref<1x3x16xf32, #tpu.memory_space<vmem>>, vector<1x3x16xf32>
    %3 = vector.shape_cast %2 : vector<1x3x16xf32> to vector<3x16xf32>
    %4 = vector.extract_strided_slice %1 {offsets = [0, 0], sizes = [64, 1], strides = [1, 1]} : vector<64x3xf32> to vector<64x1xf32>
    %5 = vector.extract_strided_slice %1 {offsets = [0, 0], sizes = [64, 1], strides = [1, 1]} : vector<64x3xf32> to vector<64x1xf32>
    %6 = arith.mulf %4, %5 : vector<64x1xf32>
    %7 = vector.extract_strided_slice %1 {offsets = [0, 1], sizes = [64, 1], strides = [1, 1]} : vector<64x3xf32> to vector<64x1xf32>
    %8 = vector.extract_strided_slice %1 {offsets = [0, 1], sizes = [64, 1], strides = [1, 1]} : vector<64x3xf32> to vector<64x1xf32>
    %9 = arith.mulf %7, %8 : vector<64x1xf32>
    %10 = arith.addf %6, %9 : vector<64x1xf32>
    %11 = vector.extract_strided_slice %1 {offsets = [0, 2], sizes = [64, 1], strides = [1, 1]} : vector<64x3xf32> to vector<64x1xf32>
    %12 = vector.extract_strided_slice %1 {offsets = [0, 2], sizes = [64, 1], strides = [1, 1]} : vector<64x3xf32> to vector<64x1xf32>
    %13 = arith.mulf %11, %12 : vector<64x1xf32>
    %14 = arith.addf %10, %13 : vector<64x1xf32>
    %15 = vector.extract_strided_slice %3 {offsets = [0, 0], sizes = [1, 16], strides = [1, 1]} : vector<3x16xf32> to vector<1x16xf32>
    %16 = vector.extract_strided_slice %3 {offsets = [0, 0], sizes = [1, 16], strides = [1, 1]} : vector<3x16xf32> to vector<1x16xf32>
    %17 = arith.mulf %15, %16 : vector<1x16xf32>
    %18 = vector.extract_strided_slice %3 {offsets = [1, 0], sizes = [1, 16], strides = [1, 1]} : vector<3x16xf32> to vector<1x16xf32>
    %19 = vector.extract_strided_slice %3 {offsets = [1, 0], sizes = [1, 16], strides = [1, 1]} : vector<3x16xf32> to vector<1x16xf32>
    %20 = arith.mulf %18, %19 : vector<1x16xf32>
    %21 = arith.addf %17, %20 : vector<1x16xf32>
    %22 = vector.extract_strided_slice %3 {offsets = [2, 0], sizes = [1, 16], strides = [1, 1]} : vector<3x16xf32> to vector<1x16xf32>
    %23 = vector.extract_strided_slice %3 {offsets = [2, 0], sizes = [1, 16], strides = [1, 1]} : vector<3x16xf32> to vector<1x16xf32>
    %24 = arith.mulf %22, %23 : vector<1x16xf32>
    %25 = arith.addf %21, %24 : vector<1x16xf32>
    %cst = arith.constant dense<0.000000e+00> : vector<64x16xf32>
    %26 = tpu.matmul %1, %3, %cst {dimension_numbers = #tpu.dot_dimension_numbers<[1], [0], [0], [1], [0, 0, 1, 1], [], []>} : vector<64x3xf32>, vector<3x16xf32>, vector<64x16xf32> -> vector<64x16xf32>
    %27 = vector.broadcast %14 : vector<64x1xf32> to vector<64x16xf32>
    %28 = vector.broadcast %25 : vector<1x16xf32> to vector<64x16xf32>
    %29 = arith.addf %27, %28 : vector<64x16xf32>
    %cst_5 = arith.constant 2.000000e+00 : f32
    %30 = vector.broadcast %cst_5 : f32 to vector<64x16xf32>
    %31 = arith.mulf %30, %26 : vector<64x16xf32>
    %32 = arith.subf %29, %31 : vector<64x16xf32>
    %cst_6 = arith.constant 1.000000e-30 : f32
    %33 = vector.broadcast %cst_6 : f32 to vector<64x16xf32>
    %34 = arith.maximumf %32, %33 : vector<64x16xf32>
    %35 = tpu.iota {dimensions = array<i32: 1>} : vector<64x16xi32>
    %36 = tpu.bitcast %34 : vector<64x16xf32> -> vector<64x16xi32>
    %c-16_i32 = arith.constant -16 : i32
    %37 = vector.broadcast %c-16_i32 : i32 to vector<64x16xi32>
    %38 = arith.andi %36, %37 : vector<64x16xi32>
    %39 = arith.ori %38, %35 : vector<64x16xi32>
    %40 = tpu.bitcast %39 : vector<64x16xi32> -> vector<64x16xf32>
    %cst_7 = arith.constant 0.000000e+00 : f32
    %41 = vector.broadcast %cst_7 : f32 to vector<64x16xf32>
    %cst_8 = arith.constant 0.000000e+00 : f32
    %42 = vector.broadcast %cst_8 : f32 to vector<64x1xf32>
    %cst_9 = arith.constant dense<0x7F800000> : vector<64xf32>
    %43 = vector.multi_reduction <minimumf>, %40, %cst_9 [1] : vector<64x16xf32> to vector<64xf32>
    %44 = vector.shape_cast %43 : vector<64xf32> to vector<64x1xf32>
    %45 = vector.broadcast %44 : vector<64x1xf32> to vector<64x16xf32>
    %46 = arith.cmpf oeq, %40, %45 : vector<64x16xf32>
    %47 = tpu.bitcast %44 : vector<64x1xf32> -> vector<64x1xi32>
    %c-16_i32_10 = arith.constant -16 : i32
    %48 = vector.broadcast %c-16_i32_10 : i32 to vector<64x1xi32>
    %49 = arith.andi %47, %48 : vector<64x1xi32>
    %50 = tpu.bitcast %49 : vector<64x1xi32> -> vector<64x1xf32>
    %cst_11 = arith.constant 1.000000e-10 : f32
    %51 = vector.broadcast %cst_11 : f32 to vector<64x1xf32>
    %52 = arith.maximumf %50, %51 : vector<64x1xf32>
    %cst_12 = arith.constant 1.000000e+00 : f32
    %53 = vector.broadcast %cst_12 : f32 to vector<64x1xf32>
    %54 = arith.divf %53, %52 : vector<64x1xf32>
    %cst_13 = arith.constant 0.000000e+00 : f32
    %55 = vector.shape_cast %54 : vector<64x1xf32> to vector<64x1xf32>
    %56 = vector.broadcast %55 : vector<64x1xf32> to vector<64x16xf32>
    %57 = vector.broadcast %cst_13 : f32 to vector<64x16xf32>
    %58 = arith.select %46, %56, %57 : vector<64x16xi1>, vector<64x16xf32>
    %59 = arith.addf %41, %58 : vector<64x16xf32>
    %60 = arith.addf %42, %54 : vector<64x1xf32>
    %cst_14 = arith.constant 0x7F800000 : f32
    %61 = vector.broadcast %cst_14 : f32 to vector<64x16xf32>
    %62 = arith.select %46, %61, %40 : vector<64x16xi1>, vector<64x16xf32>
    %cst_15 = arith.constant dense<0x7F800000> : vector<64xf32>
    %63 = vector.multi_reduction <minimumf>, %62, %cst_15 [1] : vector<64x16xf32> to vector<64xf32>
    %64 = vector.shape_cast %63 : vector<64xf32> to vector<64x1xf32>
    %65 = vector.broadcast %64 : vector<64x1xf32> to vector<64x16xf32>
    %66 = arith.cmpf oeq, %62, %65 : vector<64x16xf32>
    %67 = tpu.bitcast %64 : vector<64x1xf32> -> vector<64x1xi32>
    %c-16_i32_16 = arith.constant -16 : i32
    %68 = vector.broadcast %c-16_i32_16 : i32 to vector<64x1xi32>
    %69 = arith.andi %67, %68 : vector<64x1xi32>
    %70 = tpu.bitcast %69 : vector<64x1xi32> -> vector<64x1xf32>
    %cst_17 = arith.constant 1.000000e-10 : f32
    %71 = vector.broadcast %cst_17 : f32 to vector<64x1xf32>
    %72 = arith.maximumf %70, %71 : vector<64x1xf32>
    %cst_18 = arith.constant 1.000000e+00 : f32
    %73 = vector.broadcast %cst_18 : f32 to vector<64x1xf32>
    %74 = arith.divf %73, %72 : vector<64x1xf32>
    %cst_19 = arith.constant 0.000000e+00 : f32
    %75 = vector.shape_cast %74 : vector<64x1xf32> to vector<64x1xf32>
    %76 = vector.broadcast %75 : vector<64x1xf32> to vector<64x16xf32>
    %77 = vector.broadcast %cst_19 : f32 to vector<64x16xf32>
    %78 = arith.select %66, %76, %77 : vector<64x16xi1>, vector<64x16xf32>
    %79 = arith.addf %59, %78 : vector<64x16xf32>
    %80 = arith.addf %60, %74 : vector<64x1xf32>
    %cst_20 = arith.constant 0x7F800000 : f32
    %81 = vector.broadcast %cst_20 : f32 to vector<64x16xf32>
    %82 = arith.select %66, %81, %62 : vector<64x16xi1>, vector<64x16xf32>
    %cst_21 = arith.constant dense<0x7F800000> : vector<64xf32>
    %83 = vector.multi_reduction <minimumf>, %82, %cst_21 [1] : vector<64x16xf32> to vector<64xf32>
    %84 = vector.shape_cast %83 : vector<64xf32> to vector<64x1xf32>
    %85 = vector.broadcast %84 : vector<64x1xf32> to vector<64x16xf32>
    %86 = arith.cmpf oeq, %82, %85 : vector<64x16xf32>
    %87 = tpu.bitcast %84 : vector<64x1xf32> -> vector<64x1xi32>
    %c-16_i32_22 = arith.constant -16 : i32
    %88 = vector.broadcast %c-16_i32_22 : i32 to vector<64x1xi32>
    %89 = arith.andi %87, %88 : vector<64x1xi32>
    %90 = tpu.bitcast %89 : vector<64x1xi32> -> vector<64x1xf32>
    %cst_23 = arith.constant 1.000000e-10 : f32
    %91 = vector.broadcast %cst_23 : f32 to vector<64x1xf32>
    %92 = arith.maximumf %90, %91 : vector<64x1xf32>
    %cst_24 = arith.constant 1.000000e+00 : f32
    %93 = vector.broadcast %cst_24 : f32 to vector<64x1xf32>
    %94 = arith.divf %93, %92 : vector<64x1xf32>
    %cst_25 = arith.constant 0.000000e+00 : f32
    %95 = vector.shape_cast %94 : vector<64x1xf32> to vector<64x1xf32>
    %96 = vector.broadcast %95 : vector<64x1xf32> to vector<64x16xf32>
    %97 = vector.broadcast %cst_25 : f32 to vector<64x16xf32>
    %98 = arith.select %86, %96, %97 : vector<64x16xi1>, vector<64x16xf32>
    %99 = arith.addf %79, %98 : vector<64x16xf32>
    %100 = arith.addf %80, %94 : vector<64x1xf32>
    %c0_26 = arith.constant 0 : index
    %c0_27 = arith.constant 0 : index
    %101 = vector.load %arg6[%c0_26, %c0_27] : memref<8x128xf32, #tpu.memory_space<vmem>>, vector<8x128xf32>
    %c0_28 = arith.constant 0 : index
    %c0_29 = arith.constant 0 : index
    %102 = vector.load %arg7[%c0_28, %c0_29] : memref<1x128xf32, #tpu.memory_space<vmem>>, vector<1x128xf32>
    %c0_30 = arith.constant 0 : index
    %c0_31 = arith.constant 0 : index
    %c0_32 = arith.constant 0 : index
    %103 = vector.load %arg4[%c0_30, %c0_31, %c0_32] : memref<1x64x8xf32, #tpu.memory_space<vmem>>, vector<1x64x8xf32>
    %104 = vector.shape_cast %103 : vector<1x64x8xf32> to vector<64x8xf32>
    %c0_33 = arith.constant 0 : index
    %c0_34 = arith.constant 0 : index
    %c0_35 = arith.constant 0 : index
    %105 = vector.load %arg5[%c0_33, %c0_34, %c0_35] : memref<1x16x128xf32, #tpu.memory_space<vmem>>, vector<1x16x128xf32>
    %106 = vector.shape_cast %105 : vector<1x16x128xf32> to vector<16x128xf32>
    %cst_36 = arith.constant dense<0.000000e+00> : vector<64x128xf32>
    %107 = tpu.matmul %99, %106, %cst_36 {dimension_numbers = #tpu.dot_dimension_numbers<[1], [0], [0], [1], [0, 0, 1, 1], [], []>} : vector<64x16xf32>, vector<16x128xf32>, vector<64x128xf32> -> vector<64x128xf32>
    %cst_37 = arith.constant 1.000000e+00 : f32
    %108 = vector.broadcast %cst_37 : f32 to vector<64x1xf32>
    %109 = arith.divf %108, %100 : vector<64x1xf32>
    %110 = vector.broadcast %109 : vector<64x1xf32> to vector<64x128xf32>
    %111 = arith.mulf %107, %110 : vector<64x128xf32>
    %cst_38 = arith.constant dense<0.000000e+00> : vector<64x128xf32>
    %112 = tpu.matmul %104, %101, %cst_38 {dimension_numbers = #tpu.dot_dimension_numbers<[1], [0], [0], [1], [0, 0, 1, 1], [], []>} : vector<64x8xf32>, vector<8x128xf32>, vector<64x128xf32> -> vector<64x128xf32>
    %113 = arith.addf %111, %112 : vector<64x128xf32>
    %114 = vector.broadcast %102 : vector<1x128xf32> to vector<64x128xf32>
    %115 = arith.addf %113, %114 : vector<64x128xf32>
    %cst_39 = arith.constant 0.000000e+00 : f32
    %116 = vector.broadcast %cst_39 : f32 to vector<64x128xf32>
    %117 = arith.maximumf %115, %116 : vector<64x128xf32>
    %c0_40 = arith.constant 0 : index
    %c0_41 = arith.constant 0 : index
    %118 = vector.load %arg8[%c0_40, %c0_41] : memref<128x128xf32, #tpu.memory_space<vmem>>, vector<128x128xf32>
    %c0_42 = arith.constant 0 : index
    %c0_43 = arith.constant 0 : index
    %119 = vector.load %arg9[%c0_42, %c0_43] : memref<1x128xf32, #tpu.memory_space<vmem>>, vector<1x128xf32>
    %cst_44 = arith.constant dense<0.000000e+00> : vector<64x128xf32>
    %120 = tpu.matmul %117, %118, %cst_44 {dimension_numbers = #tpu.dot_dimension_numbers<[1], [0], [0], [1], [0, 0, 1, 1], [], []>} : vector<64x128xf32>, vector<128x128xf32>, vector<64x128xf32> -> vector<64x128xf32>
    %121 = vector.broadcast %119 : vector<1x128xf32> to vector<64x128xf32>
    %122 = arith.addf %120, %121 : vector<64x128xf32>
    %cst_45 = arith.constant 0.000000e+00 : f32
    %123 = vector.broadcast %cst_45 : f32 to vector<64x128xf32>
    %124 = arith.maximumf %122, %123 : vector<64x128xf32>
    %c0_46 = arith.constant 0 : index
    %c0_47 = arith.constant 0 : index
    %c0_48 = arith.constant 0 : index
    %125 = vector.load %arg10[%c0_46, %c0_47, %c0_48] : memref<1x64x128xf32, #tpu.memory_space<vmem>>, vector<1x64x128xf32>
    %126 = vector.shape_cast %125 : vector<1x64x128xf32> to vector<64x128xf32>
    %127 = vector.shape_cast %124 : vector<64x128xf32> to vector<1x64x128xf32>
    tpu.vector_store %arg10[%c0_46, %c0_47, %c0_48], %127 {strides = array<i32>} : memref<1x64x128xf32, #tpu.memory_space<vmem>>, vector<1x64x128xf32>,
    return
  }
  func.func @transform_0(%arg0: i32, %arg1: i32) -> (i32, i32, i32) {
    %c0_i32 = arith.constant 0 : i32
    %c0_i32_0 = arith.constant 0 : i32
    return %arg0, %arg1, %c0_i32 : i32, i32, i32
  }
  func.func @transform_1(%arg0: i32, %arg1: i32) -> (i32, i32, i32) {
    %c0_i32 = arith.constant 0 : i32
    %c0_i32_0 = arith.constant 0 : i32
    %c0_i32_1 = arith.constant 0 : i32
    return %arg0, %c0_i32, %c0_i32_0 : i32, i32, i32
  }
  func.func @transform_2(%arg0: i32, %arg1: i32) -> (i32, i32, i32) {
    %c0_i32 = arith.constant 0 : i32
    %c0_i32_0 = arith.constant 0 : i32
    return %arg0, %arg1, %c0_i32 : i32, i32, i32
  }
  func.func @transform_3(%arg0: i32, %arg1: i32) -> (i32, i32, i32) {
    %c0_i32 = arith.constant 0 : i32
    %c0_i32_0 = arith.constant 0 : i32
    %c0_i32_1 = arith.constant 0 : i32
    return %arg0, %c0_i32, %c0_i32_0 : i32, i32, i32
  }
  func.func @transform_4(%arg0: i32, %arg1: i32) -> (i32, i32) {
    %c0_i32 = arith.constant 0 : i32
    %c0_i32_0 = arith.constant 0 : i32
    %c0_i32_1 = arith.constant 0 : i32
    return %c0_i32, %c0_i32_0 : i32, i32
  }
  func.func @transform_5(%arg0: i32, %arg1: i32) -> (i32, i32) {
    %c0_i32 = arith.constant 0 : i32
    %c0_i32_0 = arith.constant 0 : i32
    %c0_i32_1 = arith.constant 0 : i32
    return %c0_i32, %c0_i32_0 : i32, i32
  }
  func.func @transform_6(%arg0: i32, %arg1: i32) -> (i32, i32) {
    %c0_i32 = arith.constant 0 : i32
    %c0_i32_0 = arith.constant 0 : i32
    %c0_i32_1 = arith.constant 0 : i32
    return %c0_i32, %c0_i32_0 : i32, i32
  }
  func.func @transform_7(%arg0: i32, %arg1: i32) -> (i32, i32) {
    %c0_i32 = arith.constant 0 : i32
    %c0_i32_0 = arith.constant 0 : i32
    %c0_i32_1 = arith.constant 0 : i32
    return %c0_i32, %c0_i32_0 : i32, i32
  }
  func.func @transform_8(%arg0: i32, %arg1: i32) -> (i32, i32, i32) {
    %c0_i32 = arith.constant 0 : i32
    %c0_i32_0 = arith.constant 0 : i32
    return %arg0, %arg1, %c0_i32 : i32, i32, i32
  }
}

module attributes {stable_mosaic.version = 11 : i64} {
  func.func @_fp_kernel(%arg0: i32, %arg1: i32, %arg2: memref<1x64x3xf32, #tpu.memory_space<vmem>>, %arg3: memref<1x3x16xf32, #tpu.memory_space<vmem>>, %arg4: memref<1x64x8xf32, #tpu.memory_space<vmem>>, %arg5: memref<1x16x128xf32, #tpu.memory_space<vmem>>, %arg6: memref<8x128xf32, #tpu.memory_space<vmem>>, %arg7: memref<1x128xf32, #tpu.memory_space<vmem>>, %arg8: memref<128x128xf32, #tpu.memory_space<vmem>>, %arg9: memref<1x128xf32, #tpu.memory_space<vmem>>, %arg10: memref<1x64x128xf32, #tpu.memory_space<vmem>>) attributes {dimension_semantics = [#tpu.dimension_semantics<parallel>, #tpu.dimension_semantics<parallel>], iteration_bounds = array<i64: 2, 1>, scalar_prefetch = 0 : i64, scratch_operands = 0 : i64, tpu.core_type = #tpu.core_type<tc>, window_params = [{transform_indices = @transform_0, window_bounds = array<i64: 1, 64, 3>}, {transform_indices = @transform_1, window_bounds = array<i64: 1, 3, 16>}, {transform_indices = @transform_2, window_bounds = array<i64: 1, 64, 8>}, {transform_indices = @transform_3, window_bounds = array<i64: 1, 16, 128>}, {pipeline_mode = #tpu.pipeline_mode<synchronous>, transform_indices = @transform_4, window_bounds = array<i64: 8, 128>}, {pipeline_mode = #tpu.pipeline_mode<synchronous>, transform_indices = @transform_5, window_bounds = array<i64: 1, 128>}, {pipeline_mode = #tpu.pipeline_mode<synchronous>, transform_indices = @transform_6, window_bounds = array<i64: 128, 128>}, {pipeline_mode = #tpu.pipeline_mode<synchronous>, transform_indices = @transform_7, window_bounds = array<i64: 1, 128>}, {transform_indices = @transform_8, window_bounds = array<i64: 1, 64, 128>}]} {
    %c0 = arith.constant 0 : index
    %c0_0 = arith.constant 0 : index
    %c0_1 = arith.constant 0 : index
    %0 = vector.load %arg2[%c0, %c0_0, %c0_1] : memref<1x64x3xf32, #tpu.memory_space<vmem>>, vector<1x64x3xf32>
    %1 = vector.shape_cast %0 : vector<1x64x3xf32> to vector<64x3xf32>
    %c0_2 = arith.constant 0 : index
    %c0_3 = arith.constant 0 : index
    %c0_4 = arith.constant 0 : index
    %2 = vector.load %arg3[%c0_2, %c0_3, %c0_4] : memref<1x3x16xf32, #tpu.memory_space<vmem>>, vector<1x3x16xf32>
    %3 = vector.shape_cast %2 : vector<1x3x16xf32> to vector<3x16xf32>
    %4 = vector.extract_strided_slice %1 {offsets = [0, 0], sizes = [64, 1], strides = [1, 1]} : vector<64x3xf32> to vector<64x1xf32>
    %5 = vector.extract_strided_slice %1 {offsets = [0, 0], sizes = [64, 1], strides = [1, 1]} : vector<64x3xf32> to vector<64x1xf32>
    %6 = arith.mulf %4, %5 : vector<64x1xf32>
    %7 = vector.extract_strided_slice %1 {offsets = [0, 1], sizes = [64, 1], strides = [1, 1]} : vector<64x3xf32> to vector<64x1xf32>
    %8 = vector.extract_strided_slice %1 {offsets = [0, 1], sizes = [64, 1], strides = [1, 1]} : vector<64x3xf32> to vector<64x1xf32>
    %9 = arith.mulf %7, %8 : vector<64x1xf32>
    %10 = arith.addf %6, %9 : vector<64x1xf32>
    %11 = vector.extract_strided_slice %1 {offsets = [0, 2], sizes = [64, 1], strides = [1, 1]} : vector<64x3xf32> to vector<64x1xf32>
    %12 = vector.extract_strided_slice %1 {offsets = [0, 2], sizes = [64, 1], strides = [1, 1]} : vector<64x3xf32> to vector<64x1xf32>
    %13 = arith.mulf %11, %12 : vector<64x1xf32>
    %14 = arith.addf %10, %13 : vector<64x1xf32>
    %15 = vector.extract_strided_slice %3 {offsets = [0, 0], sizes = [1, 16], strides = [1, 1]} : vector<3x16xf32> to vector<1x16xf32>
    %16 = vector.extract_strided_slice %3 {offsets = [0, 0], sizes = [1, 16], strides = [1, 1]} : vector<3x16xf32> to vector<1x16xf32>
    %17 = arith.mulf %15, %16 : vector<1x16xf32>
    %18 = vector.extract_strided_slice %3 {offsets = [1, 0], sizes = [1, 16], strides = [1, 1]} : vector<3x16xf32> to vector<1x16xf32>
    %19 = vector.extract_strided_slice %3 {offsets = [1, 0], sizes = [1, 16], strides = [1, 1]} : vector<3x16xf32> to vector<1x16xf32>
    %20 = arith.mulf %18, %19 : vector<1x16xf32>
    %21 = arith.addf %17, %20 : vector<1x16xf32>
    %22 = vector.extract_strided_slice %3 {offsets = [2, 0], sizes = [1, 16], strides = [1, 1]} : vector<3x16xf32> to vector<1x16xf32>
    %23 = vector.extract_strided_slice %3 {offsets = [2, 0], sizes = [1, 16], strides = [1, 1]} : vector<3x16xf32> to vector<1x16xf32>
    %24 = arith.mulf %22, %23 : vector<1x16xf32>
    %25 = arith.addf %21, %24 : vector<1x16xf32>
    %cst = arith.constant dense<0.000000e+00> : vector<64x16xf32>
    %26 = tpu.matmul %1, %3, %cst {dimension_numbers = #tpu.dot_dimension_numbers<[1], [0], [0], [1], [0, 0, 1, 1], [], []>} : vector<64x3xf32>, vector<3x16xf32>, vector<64x16xf32> -> vector<64x16xf32>
    %27 = vector.broadcast %14 : vector<64x1xf32> to vector<64x16xf32>
    %28 = vector.broadcast %25 : vector<1x16xf32> to vector<64x16xf32>
    %29 = arith.addf %27, %28 : vector<64x16xf32>
    %cst_5 = arith.constant 2.000000e+00 : f32
    %30 = vector.broadcast %cst_5 : f32 to vector<64x16xf32>
    %31 = arith.mulf %30, %26 : vector<64x16xf32>
    %32 = arith.subf %29, %31 : vector<64x16xf32>
    %cst_6 = arith.constant 1.000000e-30 : f32
    %33 = vector.broadcast %cst_6 : f32 to vector<64x16xf32>
    %34 = arith.maximumf %32, %33 : vector<64x16xf32>
    %35 = tpu.iota {dimensions = array<i32: 1>} : vector<64x16xi32>
    %36 = tpu.bitcast %34 : vector<64x16xf32> -> vector<64x16xi32>
    %c-16_i32 = arith.constant -16 : i32
    %37 = vector.broadcast %c-16_i32 : i32 to vector<64x16xi32>
    %38 = arith.andi %36, %37 : vector<64x16xi32>
    %39 = arith.ori %38, %35 : vector<64x16xi32>
    %40 = tpu.bitcast %39 : vector<64x16xi32> -> vector<64x16xf32>
    %cst_7 = arith.constant 0.000000e+00 : f32
    %41 = vector.broadcast %cst_7 : f32 to vector<64x16xf32>
    %cst_8 = arith.constant 0.000000e+00 : f32
    %42 = vector.broadcast %cst_8 : f32 to vector<64x1xf32>
    %cst_9 = arith.constant dense<0x7F800000> : vector<64xf32>
    %43 = vector.multi_reduction <minimumf>, %40, %cst_9 [1] : vector<64x16xf32> to vector<64xf32>
    %44 = vector.shape_cast %43 : vector<64xf32> to vector<64x1xf32>
    %45 = vector.broadcast %44 : vector<64x1xf32> to vector<64x16xf32>
    %46 = arith.cmpf oeq, %40, %45 : vector<64x16xf32>
    %47 = tpu.bitcast %44 : vector<64x1xf32> -> vector<64x1xi32>
    %c-16_i32_10 = arith.constant -16 : i32
    %48 = vector.broadcast %c-16_i32_10 : i32 to vector<64x1xi32>
    %49 = arith.andi %47, %48 : vector<64x1xi32>
    %50 = tpu.bitcast %49 : vector<64x1xi32> -> vector<64x1xf32>
    %cst_11 = arith.constant 1.000000e-10 : f32
    %51 = vector.broadcast %cst_11 : f32 to vector<64x1xf32>
    %52 = arith.maximumf %50, %51 : vector<64x1xf32>
    %cst_12 = arith.constant 1.000000e+00 : f32
    %53 = vector.broadcast %cst_12 : f32 to vector<64x1xf32>
    %54 = arith.divf %53, %52 : vector<64x1xf32>
    %cst_13 = arith.constant 0.000000e+00 : f32
    %55 = vector.shape_cast %54 : vector<64x1xf32> to vector<64x1xf32>
    %56 = vector.broadcast %55 : vector<64x1xf32> to vector<64x16xf32>
    %57 = vector.broadcast %cst_13 : f32 to vector<64x16xf32>
    %58 = arith.select %46, %56, %57 : vector<64x16xi1>, vector<64x16xf32>
    %59 = arith.addf %41, %58 : vector<64x16xf32>
    %60 = arith.addf %42, %54 : vector<64x1xf32>
    %cst_14 = arith.constant 0x7F800000 : f32
    %61 = vector.broadcast %cst_14 : f32 to vector<64x16xf32>
    %62 = arith.select %46, %61, %40 : vector<64x16xi1>, vector<64x16xf32>
    %cst_15 = arith.constant dense<0x7F800000> : vector<64xf32>
    %63 = vector.multi_reduction <minimumf>, %62, %cst_15 [1] : vector<64x16xf32> to vector<64xf32>
    %64 = vector.shape_cast %63 : vector<64xf32> to vector<64x1xf32>
    %65 = vector.broadcast %64 : vector<64x1xf32> to vector<64x16xf32>
    %66 = arith.cmpf oeq, %62, %65 : vector<64x16xf32>
    %67 = tpu.bitcast %64 : vector<64x1xf32> -> vector<64x1xi32>
    %c-16_i32_16 = arith.constant -16 : i32
    %68 = vector.broadcast %c-16_i32_16 : i32 to vector<64x1xi32>
    %69 = arith.andi %67, %68 : vector<64x1xi32>
    %70 = tpu.bitcast %69 : vector<64x1xi32> -> vector<64x1xf32>
    %cst_17 = arith.constant 1.000000e-10 : f32
    %71 = vector.broadcast %cst_17 : f32 to vector<64x1xf32>
    %72 = arith.maximumf %70, %71 : vector<64x1xf32>
    %cst_18 = arith.constant 1.000000e+00 : f32
    %73 = vector.broadcast %cst_18 : f32 to vector<64x1xf32>
    %74 = arith.divf %73, %72 : vector<64x1xf32>
    %cst_19 = arith.constant 0.000000e+00 : f32
    %75 = vector.shape_cast %74 : vector<64x1xf32> to vector<64x1xf32>
    %76 = vector.broadcast %75 : vector<64x1xf32> to vector<64x16xf32>
    %77 = vector.broadcast %cst_19 : f32 to vector<64x16xf32>
    %78 = arith.select %66, %76, %77 : vector<64x16xi1>, vector<64x16xf32>
    %79 = arith.addf %59, %78 : vector<64x16xf32>
    %80 = arith.addf %60, %74 : vector<64x1xf32>
    %cst_20 = arith.constant 0x7F800000 : f32
    %81 = vector.broadcast %cst_20 : f32 to vector<64x16xf32>
    %82 = arith.select %66, %81, %62 : vector<64x16xi1>, vector<64x16xf32>
    %cst_21 = arith.constant dense<0x7F800000> : vector<64xf32>
    %83 = vector.multi_reduction <minimumf>, %82, %cst_21 [1] : vector<64x16xf32> to vector<64xf32>
    %84 = vector.shape_cast %83 : vector<64xf32> to vector<64x1xf32>
    %85 = vector.broadcast %84 : vector<64x1xf32> to vector<64x16xf32>
    %86 = arith.cmpf oeq, %82, %85 : vector<64x16xf32>
    %87 = tpu.bitcast %84 : vector<64x1xf32> -> vector<64x1xi32>
    %c-16_i32_22 = arith.constant -16 : i32
    %88 = vector.broadcast %c-16_i32_22 : i32 to vector<64x1xi32>
    %89 = arith.andi %87, %88 : vector<64x1xi32>
    %90 = tpu.bitcast %89 : vector<64x1xi32> -> vector<64x1xf32>
    %cst_23 = arith.constant 1.000000e-10 : f32
    %91 = vector.broadcast %cst_23 : f32 to vector<64x1xf32>
    %92 = arith.maximumf %90, %91 : vector<64x1xf32>
    %cst_24 = arith.constant 1.000000e+00 : f32
    %93 = vector.broadcast %cst_24 : f32 to vector<64x1xf32>
    %94 = arith.divf %93, %92 : vector<64x1xf32>
    %cst_25 = arith.constant 0.000000e+00 : f32
    %95 = vector.shape_cast %94 : vector<64x1xf32> to vector<64x1xf32>
    %96 = vector.broadcast %95 : vector<64x1xf32> to vector<64x16xf32>
    %97 = vector.broadcast %cst_25 : f32 to vector<64x16xf32>
    %98 = arith.select %86, %96, %97 : vector<64x16xi1>, vector<64x16xf32>
    %99 = arith.addf %79, %98 : vector<64x16xf32>
    %100 = arith.addf %80, %94 : vector<64x1xf32>
    %c0_26 = arith.constant 0 : index
    %c0_27 = arith.constant 0 : index
    %101 = vector.load %arg6[%c0_26, %c0_27] : memref<8x128xf32, #tpu.memory_space<vmem>>, vector<8x128xf32>
    %c0_28 = arith.constant 0 : index
    %c0_29 = arith.constant 0 : index
    %102 = vector.load %arg7[%c0_28, %c0_29] : memref<1x128xf32, #tpu.memory_space<vmem>>, vector<1x128xf32>
    %c0_30 = arith.constant 0 : index
    %c0_31 = arith.constant 0 : index
    %c0_32 = arith.constant 0 : index
    %103 = vector.load %arg4[%c0_30, %c0_31, %c0_32] : memref<1x64x8xf32, #tpu.memory_space<vmem>>, vector<1x64x8xf32>
    %104 = vector.shape_cast %103 : vector<1x64x8xf32> to vector<64x8xf32>
    %c0_33 = arith.constant 0 : index
    %c0_34 = arith.constant 0 : index
    %c0_35 = arith.constant 0 : index
    %105 = vector.load %arg5[%c0_33, %c0_34, %c0_35] : memref<1x16x128xf32, #tpu.memory_space<vmem>>, vector<1x16x128xf32>
    %106 = vector.shape_cast %105 : vector<1x16x128xf32> to vector<16x128xf32>
    %cst_36 = arith.constant dense<0.000000e+00> : vector<64x128xf32>
    %107 = tpu.matmul %99, %106, %cst_36 {dimension_numbers = #tpu.dot_dimension_numbers<[1], [0], [0], [1], [0, 0, 1, 1], [], []>} : vector<64x16xf32>, vector<16x128xf32>, vector<64x128xf32> -> vector<64x128xf32>
    %cst_37 = arith.constant 1.000000e+00 : f32
    %108 = vector.broadcast %cst_37 : f32 to vector<64x1xf32>
    %109 = arith.divf %108, %100 : vector<64x1xf32>
    %110 = vector.broadcast %109 : vector<64x1xf32> to vector<64x128xf32>
    %111 = arith.mulf %107, %110 : vector<64x128xf32>
    %cst_38 = arith.constant dense<0.000000e+00> : vector<64x128xf32>
    %112 = tpu.matmul %104, %101, %cst_38 {dimension_numbers = #tpu.dot_dimension_numbers<[1], [0], [0], [1], [0, 0, 1, 1], [], []>} : vector<64x8xf32>, vector<8x128xf32>, vector<64x128xf32> -> vector<64x128xf32>
    %113 = arith.addf %111, %112 : vector<64x128xf32>
    %114 = vector.broadcast %102 : vector<1x128xf32> to vector<64x128xf32>
    %115 = arith.addf %113, %114 : vector<64x128xf32>
    %cst_39 = arith.constant 0.000000e+00 : f32
    %116 = vector.broadcast %cst_39 : f32 to vector<64x128xf32>
    %117 = arith.maximumf %115, %116 : vector<64x128xf32>
    %c0_40 = arith.constant 0 : index
    %c0_41 = arith.constant 0 : index
    %118 = vector.load %arg8[%c0_40, %c0_41] : memref<128x128xf32, #tpu.memory_space<vmem>>, vector<128x128xf32>
    %c0_42 = arith.constant 0 : index
    %c0_43 = arith.constant 0 : index
    %119 = vector.load %arg9[%c0_42, %c0_43] : memref<1x128xf32, #tpu.memory_space<vmem>>, vector<1x128xf32>
    %cst_44 = arith.constant dense<0.000000e+00> : vector<64x128xf32>
    %120 = tpu.matmul %117, %118, %cst_44 {dimension_numbers = #tpu.dot_dimension_numbers<[1], [0], [0], [1], [0, 0, 1, 1], [], []>} : vector<64x128xf32>, vector<128x128xf32>, vector<64x128xf32> -> vector<64x128xf32>
    %121 = vector.broadcast %119 : vector<1x128xf32> to vector<64x128xf32>
    %122 = arith.addf %120, %121 : vector<64x128xf32>
    %cst_45 = arith.constant 0.000000e+00 : f32
    %123 = vector.broadcast %cst_45 : f32 to vector<64x128xf32>
    %124 = arith.maximumf %122, %123 : vector<64x128xf32>
    %c0_46 = arith.constant 0 : index
    %c0_47 = arith.constant 0 : index
    %c0_48 = arith.constant 0 : index
    %125 = vector.load %arg10[%c0_46, %c0_47, %c0_48] : memref<1x64x128xf32, #tpu.memory_space<vmem>>, vector<1x64x128xf32>
    %126 = vector.shape_cast %125 : vector<1x64x128xf32> to vector<64x128xf32>
    %127 = vector.shape_cast %124 : vector<64x128xf32> to vector<1x64x128xf32>
    tpu.vector_store %arg10[%c0_46, %c0_47, %c0_48], %127 {strides = array<i32>} : memref<1x64x128xf32, #tpu.memory_space<vmem>>, vector<1x64x128xf32>,
    return
  }
  func.func @transform_0(%arg0: i32, %arg1: i32) -> (i32, i32, i32) {
    %c0_i32 = arith.constant 0 : i32
    %c0_i32_0 = arith.constant 0 : i32
    return %arg0, %arg1, %c0_i32 : i32, i32, i32
  }
  func.func @transform_1(%arg0: i32, %arg1: i32) -> (i32, i32, i32) {
    %c0_i32 = arith.constant 0 : i32
    %c0_i32_0 = arith.constant 0 : i32
    %c0_i32_1 = arith.constant 0 : i32
    return %arg0, %c0_i32, %c0_i32_0 : i32, i32, i32
  }
  func.func @transform_2(%arg0: i32, %arg1: i32) -> (i32, i32, i32) {
    %c0_i32 = arith.constant 0 : i32
    %c0_i32_0 = arith.constant 0 : i32
    return %arg0, %arg1, %c0_i32 : i32, i32, i32
  }
  func.func @transform_3(%arg0: i32, %arg1: i32) -> (i32, i32, i32) {
    %c0_i32 = arith.constant 0 : i32
    %c0_i32_0 = arith.constant 0 : i32
    %c0_i32_1 = arith.constant 0 : i32
    return %arg0, %c0_i32, %c0_i32_0 : i32, i32, i32
  }
  func.func @transform_4(%arg0: i32, %arg1: i32) -> (i32, i32) {
    %c0_i32 = arith.constant 0 : i32
    %c0_i32_0 = arith.constant 0 : i32
    %c0_i32_1 = arith.constant 0 : i32
    return %c0_i32, %c0_i32_0 : i32, i32
  }
  func.func @transform_5(%arg0: i32, %arg1: i32) -> (i32, i32) {
    %c0_i32 = arith.constant 0 : i32
    %c0_i32_0 = arith.constant 0 : i32
    %c0_i32_1 = arith.constant 0 : i32
    return %c0_i32, %c0_i32_0 : i32, i32
  }
  func.func @transform_6(%arg0: i32, %arg1: i32) -> (i32, i32) {
    %c0_i32 = arith.constant 0 : i32
    %c0_i32_0 = arith.constant 0 : i32
    %c0_i32_1 = arith.constant 0 : i32
    return %c0_i32, %c0_i32_0 : i32, i32
  }
  func.func @transform_7(%arg0: i32, %arg1: i32) -> (i32, i32) {
    %c0_i32 = arith.constant 0 : i32
    %c0_i32_0 = arith.constant 0 : i32
    %c0_i32_1 = arith.constant 0 : i32
    return %c0_i32, %c0_i32_0 : i32, i32
  }
  func.func @transform_8(%arg0: i32, %arg1: i32) -> (i32, i32, i32) {
    %c0_i32 = arith.constant 0 : i32
    %c0_i32_0 = arith.constant 0 : i32
    return %arg0, %arg1, %c0_i32 : i32, i32, i32
  }
}

</mosaic_0001>

<bundles_post_ra>
// kernel: tpu_custom_call.1
= control target key start
LH: loop header
LB: loop body
LE: loop exit
PB: predicated region body
PF: predicated region fallthrough
CT: control target
= control target key end

     0   :  { %13 = vsyncpa [#allocation3], 0  ;;  %s3177_s0 = inlined_call_operand.vmem [shape: f32[2,64,3], index: 0, kind: input, shape index: {}]   ;;  %s3178_s1 = inlined_call_operand.vmem [shape: f32[2,3,16], index: 1, kind: input, shape index: {}]   ;;  %s3179_s2 = inlined_call_operand.vmem [shape: f32[2,64,8], index: 2, kind: input, shape index: {}]   ;;  %s3180_s3 = inlined_call_operand.vmem [shape: f32[2,16,128], index: 3, kind: input, shape index: {}]   ;;  %s3181_s4 = inlined_call_operand.vmem [shape: f32[8,128], index: 4, kind: input, shape index: {}]   ;;  %s3182_s5 = inlined_call_operand.vmem [shape: f32[1,128], index: 5, kind: input, shape index: {}]   ;;  %s3183_s6 = inlined_call_operand.vmem [shape: f32[128,128], index: 6, kind: input, shape index: {}]   ;;  %s3184_s7 = inlined_call_operand.vmem [shape: f32[1,128], index: 7, kind: input, shape index: {}]   ;;  %s3185_s8 = inlined_call_operand.hbm [shape: f32[2,64,128], index: 8, kind: output, shape index: {}]  }
   0x1   :  { %15 = vsyncpa [#allocation3 + $0x1], 0  ;;  %s2166_s27 = smov 0   ;;  %s2168_s28 = smov 0  }
   0x2   :  { %s2170_s29 = smov 0   ;;  %s2172_s30 = smov 0  }
   0x3   :  { %s2174_s9 = smov 0   ;;  %s2176_s10 = smov 0  }
   0x4 LB: > { %s1843_s11 = sadd.s32 4294967295, %s2114_s10   ;;  %s1844_s12 = sadd.s32 4294967294, %s2114_s10   ;;  %s2114_s10 = sphi %s2176_s10, %s21_s10   ;;  %s2110_s9 = sphi %s2174_s9, %s3228_s9   ;;  %s2106_s30 = sphi %s2172_s30, %s3227_s30   ;;  %s2102_s29 = sphi %s2170_s29, %s3226_s29   ;;  %s2098_s28 = sphi %s2168_s28, %s3225_s28   ;;  %s2094_s27 = sphi %s2166_s27, %s3224_s27  }
   0x5   : > { %s33_s13 = sadd.s32 1, %s2110_s9  ;;  %s234_s14 = sadd.s32 1, %s2102_s29 }
   0x6   : > { %p35_p0 = scmp.ge.s32.totalorder %s33_s13, 2  ;;  %p244_p1 = scmp.ne.s32.totalorder %s2102_s29, %s2098_s28 }
   0x7   : > { %p245_p2 = scmp.eq.s32.totalorder %s1843_s11, 1  ;;  %p250_p3 = scmp.ne.s32.totalorder %s2098_s28, %s2094_s27 }
   0x8   : > { %s3230_s13 = smov (%p35_p0, %s33_s13), 0  ;;  %p251_p5 = scmp.eq.s32.totalorder %s1844_s12, 1 }
   0x9   : > { %p2206_p4 = por %p245_p2, %p244_p1  ;;  %s229_s16 = ssub.s32 %s2110_s9, %s3230_s13 }
   0xa   : > { %p1847_p6 = scmp.ge.s32.totalorder %s2114_s10, 1  ;;  %p232_p7 = scmp.eq.s32.totalorder %s229_s16, 0 }
   0xb   : > { %p2213_p8 = por %p251_p5, %p250_p3  ;;  %p322_p9 = scmp.lt.s32.totalorder %s2114_s10, 3 }
   0xc   : > { %s2219_s18 = scalar_select %p232_p7, %s2102_s29, %s234_s14  }
   0xd   : > { %p323_p10 = pnand %p1847_p6, %p322_p9 }
   0xe   : > { %p379_p11 = scmp.lt.s32.totalorder (!%p323_p10), %s2106_s30, 1  ;;  %s2116_s12 = smov (!%p323_p10), 127  }
   0xf   : > { %326 = sbr.rel (%p323_p10) target bundleno = 1057 (0x421), region = 52  ;;  %s2117_s14 = smov (!%p323_p10), 126  }
  0x14   : > { %s2223_s19 = scalar_select %p379_p11, %s2106_s30, 1  ;;  %vm530_vm0 = vcmask 1042432   ;;  %vm505_vm1 = vcmask 23552   ;;  %v2118_v15 = vmov 0   ;;  %vm682_vm2 = vcmask 130048  }
  0x15   : > { %1968 = vset.pattern.permute.xlu1 %v2118_v15  ;;  %1967 = vset.pattern.permute.xlu0 %v2118_v15 }
  0x16   : > { %s1886_s20 = sshll.u32 %s2223_s19, 6  ;;  %s1851_s21 = sshll.u32 %s2223_s19, 2  ;;  %1969 = vset.pattern.permute.xlu2 %v2118_v15 }
  0x17   : > { %s2232_s24 = scalar_lea.vmem %s3177_s0, %s1886_s20  ;;  %s391_s11 = scalar_lea.vmem %s3178_s1, %s1851_s21 }
  0x18   : > { %v409_v0 = vld [vmem:[%s2232_s24 + $0x8] sm:$0xff]  ;;  %v408_v1 = vld [vmem:[%s2232_s24] sm:$0xff]  ;;  %v410_v4 = vld [vmem:[%s2232_s24 + $0x10] sm:$0xff]  ;;  %s1888_s16 = sshll.u32 %s2223_s19, 4  ;;  %s2845_s23 = scalar_lea.vmem %s3179_s2, %s1886_s20 }
  0x19   : > { %v418_v2 = vmul.f32 %v409_v0, %v409_v0  ;;  %v417_v3 = vmul.f32 %v408_v1, %v408_v1  ;;  %v419_v5 = vmul.f32 %v410_v4, %v410_v4  ;;  %v2242_v6 = vld [vmem:[%s391_s11] sm:$0x7]  ;;  %v411_v7 = vld [vmem:[%s2232_s24 + $0x18] sm:$0xff]  ;;  %v413_v11 = vld [vmem:[%s2232_s24 + $0x28] sm:$0xff]  ;;  %s406_s26 = scalar_lea.vmem %s3180_s3, %s1888_s16  ;;  %s375_s19 = sand.u32 1, %s2098_s28  }
  0x1a   : > { %1856 = vmatpush.msk.msra.mxu0 %vm530_vm0, %v2242_v6  ;;  %1890 = vmatpush.msk.msra.mxu2 %vm530_vm0, %v2242_v6  ;;  %v420_v8 = vmul.f32 %v411_v7, %v411_v7  ;;  %v412_v9 = vld [vmem:[%s2232_s24 + $0x20] sm:$0xff]  ;;  %v422_v12 = vmul.f32 %v413_v11, %v413_v11  ;;  %v414_v13 = vld [vmem:[%s2232_s24 + $0x30] sm:$0xff]  ;;  %v415_v16 = vld [vmem:[%s2232_s24 + $0x38] sm:$0xff]  ;;  %v497_v48 = vmul.f32 %v2242_v6, %v2242_v6  ;;  %s1889_s21 = sshll.u32 %s2106_s30, 6 }
  0x1b   : > { %435 = vrot.lane.b32.xlu1 %v418_v2, %s2116_s12  ;;  %433 = vrot.lane.b32.xlu0 %v417_v3, %s2116_s12  ;;  %v421_v10 = vmul.f32 %v412_v9, %v412_v9  ;;  %v423_v14 = vmul.f32 %v414_v13, %v414_v13  ;;  %v2270_v17 = vmul.f32 %v415_v16, %v415_v16  ;;  %s1712_s25 = scalar_lea.hbm %s3185_s8, %s1889_s21  ;;  %s2056_s21 = scalar_lea.hbm %s3185_s8, 128 }
  0x1c   : > { %437 = vrot.lane.b32.xlu2 %v419_v5, %s2116_s12  ;;  %1857 = vmatmul.msk.f32.vlgmr.msra.gmra.mxu0 %vm505_vm1, %v408_v1  ;;  %v499_v49 = vrot.slane %v497_v48, 1  ;;  %v502_v53 = vrot.slane %v497_v48, 2  ;;  %s1715_s11 = sshll.u32 %s1712_s25, 4  ;;  %s1716_s11 = int_to_ptr.hbm [resolvable:$true] %s1715_s11 }
  0x1d   : > { %1864 = vmatmul.msk.f32.vlgmr.msra.gmra.mxu2 %vm505_vm1, %v415_v16  ;;  %s2050_s20 = sshra.s32 %s1716_s11, 4  ;;  %s2051_s20 = int_to_ptr.hbm [resolvable:$true] %s2050_s20 }
  0x1e   : > { %v501_v52 = vadd.f32 %v499_v49, %v497_v48  ;;  %p2057_p1 = scmp.lt.s32.totalorder %s2051_s20, %s3185_s8 }
  0x20   : > { %v504_v54 = vadd.f32 %v502_v53, %v501_v52 }
  0x22   : > { %v2279_v57 = vperm.slane %v504_v54, 0 }
  0x23   : > { %467 = vrot.lane.b32.xlu1 %v418_v2, %s2117_s14  ;;  %465 = vrot.lane.b32.xlu0 %v417_v3, %s2117_s14 }
  0x24   : > { %469 = vrot.lane.b32.xlu2 %v419_v5, %s2117_s14  ;;  %1858 = vmatmul.msk.f32.gmra.mxu0 %vm505_vm1, %v409_v0  ;;  %v648_v0 = vlaneseq }
  0x2b   : > { %471 = vrot.lane.b32.xlu1 %v420_v8, %s2117_s14  ;;  %439 = vrot.lane.b32.xlu0 %v420_v8, %s2116_s12 }
  0x2c   : > { %441 = vrot.lane.b32.xlu2 %v421_v10, %s2116_s12  ;;  %1859 = vmatmul.msk.f32.gmra.mxu0 %vm505_vm1, %v410_v4 }
  0x33   : > { %443 = vrot.lane.b32.xlu1 %v422_v12, %s2116_s12  ;;  %473 = vrot.lane.b32.xlu0 %v421_v10, %s2117_s14 }
  0x34   : > { %475 = vrot.lane.b32.xlu2 %v422_v12, %s2117_s14  ;;  %1860 = vmatmul.msk.f32.gmra.mxu0 %vm505_vm1, %v411_v7  ;;  %v2284_v7 = vand.u32 127, %v648_v0 }
  0x3b   : > { %445 = vrot.lane.b32.xlu1 %v423_v14, %s2116_s12 }
  0x3c   : > { %477 = vrot.lane.b32.xlu2 %v423_v14, %s2117_s14  ;;  %1861 = vmatmul.msk.f32.gmra.mxu0 %vm505_vm1, %v412_v9 }
  0x44   : > { %1862 = vmatmul.msk.f32.gmra.mxu0 %vm505_vm1, %v413_v11  ;;  %447 = vrot.lane.b32.xlu2 %v2270_v17, %s2116_s12  ;;  %s1699_s12 = scalar_lea.sflag [#allocation3], %s375_s19 }
  0x4c   : > { %1863 = vmatmul.msk.f32.gmra.mxu0 %vm505_vm1, %v414_v13 }
  0x76   : > { %v438_v18 = vpop.permute.xlu2 %437 }
  0x77   : > { %v459_v28 = vadd.f32 %v438_v18, %v419_v5 }
  0x7e   : > { %v470_v21 = vpop.permute.xlu2 %469 }
  0x7f   : > { %v491_v30 = vadd.f32 %v470_v21, %v459_v28 }
  0x86   : > { %v442_v29 = vpop.permute.xlu2 %441 }
  0x87   : > { %v461_v35 = vadd.f32 %v442_v29, %v421_v10 }
  0x8d   : > { %v436_v19 = vpop.permute.xlu1 %435  ;;  %v434_v20 = vpop.permute.xlu0 %433 }
  0x8e   : > { %v458_v22 = vadd.f32 %v436_v19, %v418_v2  ;;  %v457_v23 = vadd.f32 %v434_v20, %v417_v3  ;;  %v476_v36 = vpop.permute.xlu2 %475 }
  0x95   : > { %v468_v24 = vpop.permute.xlu1 %467  ;;  %v466_v25 = vpop.permute.xlu0 %465 }
  0x96   : > { %v490_v26 = vadd.f32 %v468_v24, %v458_v22  ;;  %v489_v27 = vadd.f32 %v466_v25, %v457_v23  ;;  %v478_v43 = vpop.permute.xlu2 %477 }
  0x98   : > { %582 = vperm.xlu1 %1968, %v490_v26   ;;  %577 = vperm.xlu0 %1967, %v489_v27  }
  0x99   : > { %v551_v46 = vpop.f32.mrf.mxu0 }
  0x9a   : > { %v624_v60 = vmul.f32 2.0, %v551_v46 }
  0x9d   : > { %v472_v31 = vpop.permute.xlu1 %471  ;;  %v440_v32 = vpop.permute.xlu0 %439 }
  0x9e   : > { %v460_v33 = vadd.f32 %v440_v32, %v420_v8  ;;  %v448_v51 = vpop.permute.xlu2 %447 }
  0x9f   : > { %v464_v8 = vadd.f32 %v448_v51, %v2270_v17 }
  0xa0   : > { %v492_v34 = vadd.f32 %v472_v31, %v460_v33  ;;  %479 = vrot.lane.b32.xlu0 %v2270_v17, %s2117_s14  ;;  %587 = vperm.xlu1 %1968, %v491_v30   ;;  %s1848_s14 = sshll.u32 %s375_s19, 6 }
  0xa1   : > { %v554_v47 = vpop.f32.mrf.mxu0  ;;  %s3128_s16 = scalar_lea.vmem [#allocation2], %s1848_s14 }
  0xa2   : > { %592 = vperm.xlu2 %1969, %v492_v34   ;;  %v625_v61 = vmul.f32 2.0, %v554_v47 }
  0xa5   : > { %v444_v37 = vpop.permute.xlu1 %443  ;;  %v474_v38 = vpop.permute.xlu0 %473 }
  0xa6   : > { %v462_v39 = vadd.f32 %v444_v37, %v422_v12  ;;  %v493_v40 = vadd.f32 %v474_v38, %v461_v35 }
  0xa8   : > { %v494_v41 = vadd.f32 %v476_v36, %v462_v39  ;;  %597 = vperm.xlu0 %1967, %v493_v40  }
  0xa9   : > { %v557_v50 = vpop.f32.mrf.mxu0 }
  0xaa   : > { %602 = vperm.xlu1 %1968, %v494_v41   ;;  %v626_v41 = vmul.f32 2.0, %v557_v50 }
  0xad   : > { %v446_v42 = vpop.permute.xlu1 %445 }
  0xae   : > { %v463_v44 = vadd.f32 %v446_v42, %v423_v14 }
  0xb0   : > { %v495_v45 = vadd.f32 %v478_v43, %v463_v44 }
  0xb1   : > { %v560_v55 = vpop.f32.mrf.mxu0 }
  0xb2   : > { %607 = vperm.xlu2 %1969, %v495_v45   ;;  %v627_v58 = vmul.f32 2.0, %v560_v55 }
  0xb9   : > { %v563_v6 = vpop.f32.mrf.mxu0 }
  0xba   : > { %v628_v24 = vmul.f32 2.0, %v563_v6 }
  0xc1   : > { %v566_v23 = vpop.f32.mrf.mxu0 }
  0xc2   : > { %v629_v27 = vmul.f32 2.0, %v566_v23 }
  0xc9   : > { %v569_v44 = vpop.f32.mrf.mxu0 }
  0xca   : > { %v630_v47 = vmul.f32 2.0, %v569_v44 }
  0xfc   : > { %v593_v56 = vpop.permute.xlu2 %592 }
  0xfd   : > { %v619_v59 = vadd.f32 %v2279_v57, %v593_v56 }
  0xff   : > { %v635_v3 = vsub.f32 %v619_v59, %v627_v58  ;;  %v572_v58 = vpop.f32.mrf.mxu2 }
 0x100   : > { %v631_v59 = vmul.f32 2.0, %v572_v58 }
 0x101   : > { %v643_v11 = vmax.f32 %v635_v3, 1e-30 }
 0x103   : > { %v661_v16 = vand.u32 4294967280, %v643_v11 }
 0x105   : > { %v2298_v22 = vor.u32 %v661_v16, %v2284_v7 }
 0x107   : > { %v692_v28 = vsel %vm682_vm2, %v2298_v22, inf }
 0x10a   : > { %v583_v62 = vpop.permute.xlu1 %582  ;;  %v578_v63 = vpop.permute.xlu0 %577 }
 0x10b   : > { %v617_v1 = vadd.f32 %v2279_v57, %v583_v62  ;;  %v616_v2 = vadd.f32 %v2279_v57, %v578_v63 }
 0x10c   : > { %v608_v45 = vpop.permute.xlu2 %607 }
 0x10d   : > { %v633_v4 = vsub.f32 %v617_v1, %v625_v61  ;;  %v632_v5 = vsub.f32 %v616_v2, %v624_v60  ;;  %v622_v48 = vadd.f32 %v2279_v57, %v608_v45 }
 0x10f   : > { %v641_v9 = vmax.f32 %v633_v4, 1e-30  ;;  %v640_v10 = vmax.f32 %v632_v5, 1e-30  ;;  %v638_v51 = vsub.f32 %v622_v48, %v630_v47 }
 0x111   : > { %v659_v12 = vand.u32 4294967280, %v641_v9  ;;  %v658_v13 = vand.u32 4294967280, %v640_v10  ;;  %v646_v52 = vmax.f32 %v638_v51, 1e-30 }
 0x112   : > { %v480_v14 = vpop.permute.xlu0 %479  ;;  %v588_v15 = vpop.permute.xlu1 %587 }
 0x113   : > { %v496_v18 = vadd.f32 %v480_v14, %v464_v8  ;;  %v2288_v19 = vor.u32 %v659_v12, %v2284_v7  ;;  %v2291_v20 = vor.u32 %v658_v13, %v2284_v7  ;;  %v618_v42 = vadd.f32 %v2279_v57, %v588_v15 }
 0x114   : > { %v664_v54 = vand.u32 4294967280, %v646_v52 }
 0x115   : > { %612 = vperm.xlu1 %1968, %v496_v18   ;;  %v686_v17 = vsel %vm682_vm2, %v2288_v19, inf  ;;  %v683_v21 = vsel %vm682_vm2, %v2291_v20, inf  ;;  %v634_v43 = vsub.f32 %v618_v42, %v626_v41 }
 0x116   : > { %687 = vmin.xlane.f32.xlu2 %v686_v17  ;;  %684 = vmin.xlane.f32.xlu0 %v683_v21  ;;  %v2322_v55 = vor.u32 %v664_v54, %v2284_v7 }
 0x117   : > { %v642_v46 = vmax.f32 %v634_v43, 1e-30 }
 0x118   : > { %v701_v56 = vsel %vm682_vm2, %v2322_v55, inf }
 0x119   : > { %v660_v49 = vand.u32 4294967280, %v642_v46 }
 0x11a   : > { %v598_v25 = vpop.permute.xlu0 %597 }
 0x11b   : > { %v620_v26 = vadd.f32 %v2279_v57, %v598_v25  ;;  %v2317_v53 = vor.u32 %v660_v49, %v2284_v7 }
 0x11c   : > { %v603_v29 = vpop.permute.xlu1 %602 }
 0x11d   : > { %v636_v30 = vsub.f32 %v620_v26, %v628_v24  ;;  %v621_v31 = vadd.f32 %v2279_v57, %v603_v29  ;;  %v689_v50 = vsel %vm682_vm2, %v2317_v53, inf }
 0x11e   : > { %693 = vmin.xlane.f32.xlu2 %v692_v28 }
 0x11f   : > { %v644_v32 = vmax.f32 %v636_v30, 1e-30  ;;  %v637_v33 = vsub.f32 %v621_v31, %v629_v27 }
 0x121   : > { %v662_v34 = vand.u32 4294967280, %v644_v32  ;;  %v645_v35 = vmax.f32 %v637_v33, 1e-30 }
 0x123   : > { %v663_v36 = vand.u32 4294967280, %v645_v35  ;;  %v2305_v37 = vor.u32 %v662_v34, %v2284_v7 }
 0x125   : > { %v695_v38 = vsel %vm682_vm2, %v2305_v37, inf  ;;  %v2310_v39 = vor.u32 %v663_v36, %v2284_v7 }
 0x126   : > { %696 = vmin.xlane.f32.xlu0 %v695_v38 }
 0x127   : > { %v698_v40 = vsel %vm682_vm2, %v2310_v39, inf }
 0x128   : > { %699 = vmin.xlane.f32.xlu2 %v698_v40 }
 0x13f   : > { %690 = vmin.xlane.f32.xlu1 %v689_v50 }
 0x147   : > { %702 = vmin.xlane.f32.xlu1 %v701_v56 }
 0x187   : > { %v613_v60 = vpop.permute.xlu1 %612 }
 0x188   : > { %v623_v61 = vadd.f32 %v2279_v57, %v613_v60 }
 0x189   : > { %v2327_v62 = vpop.xlane.xlu2 %687  ;;  %v2329_v63 = vpop.xlane.xlu0 %684 }
 0x18a   : > { %v639_v0 = vsub.f32 %v623_v61, %v631_v59  ;;  %vm708_vm3 = vcmp.eq.f32.partialorder %v2288_v19, %v2327_v62  ;;  %vm707_vm4 = vcmp.eq.f32.partialorder %v2291_v20, %v2329_v63  ;;  %v724_v26 = vand.u32 4294967280, %v2327_v62 }
 0x18b   : > { %v2339_v1 = vsel %vm708_vm3, inf, %v2288_v19  ;;  %v2345_v57 = vsel %vm707_vm4, inf, %v2291_v20  ;;  %v723_v27 = vand.u32 4294967280, %v2329_v63 }
 0x18c   : > { %v647_v2 = vmax.f32 %v639_v0, 1e-30  ;;  %v902_v3 = vsel %vm682_vm2, %v2339_v1, inf  ;;  %v899_v4 = vsel %vm682_vm2, %v2345_v57, inf  ;;  %v740_v28 = vmax.f32 %v724_v26, 1e-10 }
 0x18d   : > { %903 = vmin.xlane.f32.xlu2 %v902_v3  ;;  %900 = vmin.xlane.f32.xlu0 %v899_v4  ;;  %v739_v29 = vmax.f32 %v723_v27, 1e-10 }
 0x18e   : > { %v665_v5 = vand.u32 4294967280, %v647_v2  ;;  %1972 = vrcp.f32 %v740_v28  ;;  %vm767_vm10 = vweird.f32 %v740_v28  ;;  %v771_v42 = vand.u32 2147483647, %v740_v28 }
 0x18f   : > { %1974 = vrcp.f32 %v739_v29  ;;  %v773_v43 = vand.u32 2147483648, %v740_v28  ;;  %v756_v54 = vand.u32 2147483647, %v739_v29  ;;  %v758_v2 = vand.u32 2147483648, %v739_v29 }
 0x190   : > { %v2352_v6 = vor.u32 %v665_v5, %v2284_v7  ;;  %vm2479_vm0 = vcmp.eq.f32.partialorder %v771_v42, 8.507059e+37  ;;  %vm752_vm1 = vweird.f32 %v739_v29 }
 0x191   : > { %v2354_v8 = vpop.xlane.xlu2 %693 }
 0x192   : > { %vm710_vm5 = vcmp.eq.f32.partialorder %v2298_v22, %v2354_v8  ;;  %v704_v11 = vsel %vm682_vm2, %v2352_v6, inf  ;;  %v726_v30 = vand.u32 4294967280, %v2354_v8 }
 0x193   : > { %v2362_v9 = vsel %vm710_vm5, inf, %v2298_v22 }
 0x194   : > { %v908_v10 = vsel %vm682_vm2, %v2362_v9, inf  ;;  %v2419_v31 = vmax.f32 %v726_v30, 1e-10  ;;  %v2421_v32 = vpop.eup %1972 }
 0x195   : > { %909 = vmin.xlane.f32.xlu2 %v908_v10  ;;  %705 = vmin.xlane.f32.xlu0 %v704_v11  ;;  %v2423_v33 = vpop.eup %1974  ;;  %v763_v34 = vmul.f32 %v2421_v32, %v740_v28  ;;  %vm768_vm13 = vweird.f32 %v2421_v32  ;;  %v774_v11 = vor.u32 1.1754944e-38, %v773_v43 }
 0x196   : > { %1976 = vrcp.f32 %v2419_v31  ;;  %v748_v35 = vmul.f32 %v2423_v33, %v739_v29  ;;  %vm2471_vm14 = vmor %vm767_vm10, %vm768_vm13  ;;  %vm753_vm15 = vweird.f32 %v2423_v33  ;;  %vm797_vm13 = vweird.f32 %v2419_v31 }
 0x197   : > { %v764_v36 = vsub.f32 1.0, %v763_v34  ;;  %vm2490_vm10 = vmor %vm752_vm1, %vm753_vm15  ;;  %v803_v34 = vand.u32 2147483648, %v2419_v31 }
 0x198   : > { %v749_v38 = vsub.f32 1.0, %v748_v35 }
 0x199   : > { %v2368_v7 = vpop.xlane.xlu0 %696  ;;  %v765_v44 = vmul.f32 %v2421_v32, %v764_v36 }
 0x19a   : > { %vm711_vm6 = vcmp.eq.f32.partialorder %v2305_v37, %v2368_v7  ;;  %v727_v40 = vand.u32 4294967280, %v2368_v7  ;;  %v750_v45 = vmul.f32 %v2423_v33, %v749_v38 }
 0x19b   : > { %v2376_v12 = vsel %vm711_vm6, inf, %v2305_v37  ;;  %v2384_v15 = vpop.xlane.xlu2 %699  ;;  %v766_v0 = vadd.f32 %v2421_v32, %v765_v44 }
 0x19c   : > { %v911_v13 = vsel %vm682_vm2, %v2376_v12, inf  ;;  %vm3188_vm8 = vcmp.eq.f32.partialorder %v2310_v39, %v2384_v15  ;;  %v2429_v41 = vpop.eup %1976  ;;  %v2435_v47 = vmax.f32 %v727_v40, 1e-10  ;;  %v751_v5 = vadd.f32 %v2423_v33, %v750_v45 }
 0x19d   : > { %912 = vmin.xlane.f32.xlu0 %v911_v13  ;;  %v2402_v21 = vsel %vm3188_vm8, inf, %v2310_v39  ;;  %v793_v46 = vmul.f32 %v2429_v41, %v2419_v31  ;;  %vm798_vm1 = vweird.f32 %v2429_v41 }
 0x19e   : > { %v914_v24 = vsel %vm682_vm2, %v2402_v21, inf  ;;  %1978 = vrcp.f32 %v2435_v47  ;;  %v755_v29 = vsel %vm2490_vm10, %v2423_v33, %v751_v5  ;;  %v816_v8 = vand.u32 2147483647, %v2435_v47 }
 0x19f   : > { %v794_v3 = vsub.f32 1.0, %v793_v46 }
 0x1a1   : > { %v795_v26 = vmul.f32 %v2429_v41, %v794_v3 }
 0x1a3   : > { %v2539_v46 = vadd.f32 %v2429_v41, %v795_v26 }
 0x1b2   : > { %v2380_v14 = vpop.xlane.xlu1 %690 }
 0x1b3   : > { %vm3189_vm7 = vcmp.eq.f32.partialorder %v2317_v53, %v2380_v14 }
 0x1b4   : > { %v2390_v16 = vsel %vm3189_vm7, inf, %v2317_v53 }
 0x1b5   : > { %v905_v18 = vsel %vm682_vm2, %v2390_v16, inf }
 0x1b6   : > { %906 = vmin.xlane.f32.xlu1 %v905_v18  ;;  %v770_v18 = vsel %vm2471_vm14, %v2421_v32, %v766_v0  ;;  %v2508_v32 = vpop.eup %1978 }
 0x1b7   : > { %v2526_v38 = vsel %vm2479_vm0, %v774_v11, %v770_v18  ;;  %vm2547_vm0 = vmor %vm797_vm13, %vm798_vm1 }
 0x1b8   : > { %v868_v0 = vsel %vm708_vm3, %v2526_v38, 0.0  ;;  %v800_v11 = vsel %vm2547_vm0, %v2429_v41, %v2539_v46 }
 0x1ba   : > { %v2396_v17 = vpop.xlane.xlu1 %702 }
 0x1bb   : > { %vm3186_vm9 = vcmp.eq.f32.partialorder %v2322_v55, %v2396_v17  ;;  %v729_v22 = vand.u32 4294967280, %v2396_v17 }
 0x1bc   : > { %v2410_v23 = vsel %vm3186_vm9, inf, %v2322_v55  ;;  %vm2483_vm9 = vcmp.eq.f32.partialorder %v756_v54, 8.507059e+37 }
 0x1bd   : > { %v917_v25 = vsel %vm682_vm2, %v2410_v23, inf }
 0x1be   : > { %915 = vmin.xlane.f32.xlu1 %v914_v24  ;;  %918 = vmin.xlane.f32.xlu0 %v917_v25  ;;  %v759_v25 = vor.u32 1.1754944e-38, %v758_v2  ;;  %v804_v2 = vor.u32 1.1754944e-38, %v803_v34 }
 0x1c0   : > { %v2536_v45 = vsel %vm2483_vm9, %v759_v25, %v755_v29 }
 0x200   : > { %v2437_v48 = vpop.xlane.xlu2 %903  ;;  %v2439_v49 = vpop.xlane.xlu0 %900 }
 0x201   : > { %vm924_vm11 = vcmp.eq.f32.partialorder %v2339_v1, %v2437_v48  ;;  %v940_v51 = vand.u32 4294967280, %v2437_v48  ;;  %vm923_vm12 = vcmp.eq.f32.partialorder %v2345_v57, %v2439_v49  ;;  %v939_v52 = vand.u32 4294967280, %v2439_v49 }
 0x202   : > { %v2452_v50 = vsel %vm924_vm11, inf, %v2339_v1  ;;  %v2458_v56 = vsel %vm923_vm12, inf, %v2345_v57 }
 0x203   : > { %v2460_v58 = vmax.f32 %v940_v51, 1e-10  ;;  %v2462_v59 = vmax.f32 %v939_v52, 1e-10  ;;  %v1118_v60 = vsel %vm682_vm2, %v2452_v50, inf  ;;  %v1115_v61 = vsel %vm682_vm2, %v2458_v56, inf }
 0x204   : > { %1119 = vmin.xlane.f32.xlu1 %v1118_v60  ;;  %1116 = vmin.xlane.f32.xlu2 %v1115_v61  ;;  %v801_v51 = vand.u32 2147483647, %v2419_v31  ;;  %v808_v60 = vmul.f32 %v2508_v32, %v2435_v47  ;;  %v867_v31 = vsel %vm707_vm4, %v2536_v45, 0.0 }
 0x205   : > { %1980 = vrcp.f32 %v2460_v58  ;;  %v987_v4 = vand.u32 2147483647, %v2460_v58  ;;  %v989_v5 = vand.u32 2147483648, %v2460_v58  ;;  %v974_v13 = vand.u32 2147483648, %v2462_v59 }
 0x206   : > { %1982 = vrcp.f32 %v2462_v59  ;;  %vm2569_vm9 = vcmp.eq.f32.partialorder %v801_v51, 8.507059e+37  ;;  %v809_v20 = vsub.f32 1.0, %v808_v60  ;;  %v972_v18 = vand.u32 2147483647, %v2462_v59 }
 0x207   : > { %vm983_vm10 = vweird.f32 %v2460_v58  ;;  %vm968_vm13 = vweird.f32 %v2462_v59  ;;  %vm988_vm0 = vcmp.eq.f32.partialorder %v987_v4, 8.507059e+37  ;;  %v990_v29 = vor.u32 1.1754944e-38, %v989_v5 }
 0x208   : > { %v2496_v27 = vpop.xlane.xlu2 %909  ;;  %v2498_v28 = vpop.xlane.xlu0 %705  ;;  %vm973_vm7 = vcmp.eq.f32.partialorder %v972_v18, 8.507059e+37  ;;  %v2614_v57 = vsel %vm2569_vm9, %v804_v2, %v800_v11  ;;  %v810_v49 = vmul.f32 %v2508_v32, %v809_v20  ;;  %vm813_vm9 = vweird.f32 %v2508_v32 }
 0x209   : > { %vm926_vm14 = vcmp.eq.f32.partialorder %v2362_v9, %v2496_v27  ;;  %v942_v30 = vand.u32 4294967280, %v2496_v27  ;;  %vm3187_vm15 = vcmp.eq.f32.partialorder %v2352_v6, %v2498_v28 }
 0x20a   : > { %v2516_v35 = vsel %vm926_vm14, inf, %v2362_v9  ;;  %v2522_v33 = vsel %vm3187_vm15, inf, %v2352_v6  ;;  %v811_v11 = vadd.f32 %v2508_v32, %v810_v49 }
 0x20b   : > { %v1981_v36 = vpop.eup %1980  ;;  %v2528_v40 = vmax.f32 %v942_v30, 1e-10  ;;  %v1124_v42 = vsel %vm682_vm2, %v2516_v35, inf  ;;  %v920_v43 = vsel %vm682_vm2, %v2522_v33, inf }
 0x20c   : > { %v1983_v44 = vpop.eup %1982  ;;  %v979_v52 = vmul.f32 %v1981_v36, %v2460_v58  ;;  %1125 = vmin.xlane.f32.xlu1 %v1124_v42  ;;  %921 = vmin.xlane.f32.xlu2 %v920_v43  ;;  %vm984_vm3 = vweird.f32 %v1981_v36  ;;  %v975_v42 = vor.u32 1.1754944e-38, %v974_v13  ;;  %v725_v58 = vand.u32 4294967280, %v2380_v14 }
 0x20d   : > { %v964_v61 = vmul.f32 %v1983_v44, %v2462_v59  ;;  %1984 = vrcp.f32 %v2528_v40  ;;  %vm969_vm4 = vweird.f32 %v1983_v44  ;;  %vm985_vm1 = vmor %vm983_vm10, %vm984_vm3  ;;  %v1019_v1 = vand.u32 2147483648, %v2528_v40 }
 0x20e   : > { %v980_v3 = vsub.f32 1.0, %v979_v52  ;;  %vm970_vm8 = vmor %vm968_vm13, %vm969_vm4  ;;  %vm817_vm4 = vcmp.eq.f32.partialorder %v816_v8, 8.507059e+37 }
 0x20f   : > { %v965_v10 = vsub.f32 1.0, %v964_v61 }
 0x210   : > { %v981_v62 = vmul.f32 %v1981_v36, %v980_v3  ;;  %v2575_v24 = vpop.xlane.xlu0 %912  ;;  %v1017_v3 = vand.u32 2147483647, %v2528_v40 }
 0x211   : > { %v966_v63 = vmul.f32 %v1983_v44, %v965_v10  ;;  %v943_v41 = vand.u32 4294967280, %v2575_v24  ;;  %vm927_vm15 = vcmp.eq.f32.partialorder %v2376_v12, %v2575_v24 }
 0x212   : > { %v982_v25 = vadd.f32 %v1981_v36, %v981_v62  ;;  %v2617_v62 = vmax.f32 %v725_v58, 1e-10 }
 0x213   : > { %v1985_v26 = vpop.eup %1984  ;;  %v967_v30 = vadd.f32 %v1983_v44, %v966_v63  ;;  %v959_v46 = vmax.f32 %v943_v41, 1e-10  ;;  %v818_v41 = vand.u32 2147483648, %v2435_v47 }
 0x214   : > { %v986_v34 = vsel %vm985_vm1, %v1981_v36, %v982_v25  ;;  %v1009_v43 = vmul.f32 %v1985_v26, %v2528_v40  ;;  %v2596_v36 = vsel %vm927_vm15, inf, %v2376_v12 }
 0x215   : > { %v2584_v51 = vsel %vm988_vm0, %v990_v29, %v986_v34  ;;  %v971_v59 = vsel %vm970_vm8, %v1983_v44, %v967_v30  ;;  %1986 = vrcp.f32 %v959_v46  ;;  %v1127_v5 = vsel %vm682_vm2, %v2596_v36, inf }
 0x216   : > { %v1084_v52 = vsel %vm924_vm11, %v2584_v51, 0.0  ;;  %v2590_v54 = vsel %vm973_vm7, %v975_v42, %v971_v59  ;;  %v1010_v60 = vsub.f32 1.0, %v1009_v43  ;;  %vm1014_vm7 = vweird.f32 %v1985_v26  ;;  %1128 = vmin.xlane.f32.xlu2 %v1127_v5 }
 0x217   : > { %v2598_v61 = vadd.f32 %v1084_v52, %v868_v0  ;;  %v1083_v44 = vsel %vm923_vm12, %v2590_v54, 0.0  ;;  %v728_v0 = vand.u32 4294967280, %v2384_v15  ;;  %vm1013_vm8 = vweird.f32 %v2528_v40 }
 0x218   : > { %v2606_v48 = vadd.f32 %v1083_v44, %v867_v31  ;;  %v1011_v4 = vmul.f32 %v1985_v26, %v1010_v60  ;;  %vm1015_vm11 = vmor %vm1013_vm8, %vm1014_vm7  ;;  %v1020_v31 = vor.u32 1.1754944e-38, %v1019_v1  ;;  %vm1018_vm12 = vcmp.eq.f32.partialorder %v1017_v3, 8.507059e+37 }
 0x219   : > { %v870_v40 = vsel %vm710_vm5, %v2614_v57, 0.0  ;;  %v2625_v25 = vmax.f32 %v728_v0, 1e-10  ;;  %1988 = vrcp.f32 %v2617_v62  ;;  %vm812_vm5 = vweird.f32 %v2435_v47 }
 0x21a   : > { %v1012_v10 = vadd.f32 %v1985_v26, %v1011_v4  ;;  %vm814_vm3 = vmor %vm812_vm5, %vm813_vm9  ;;  %v1034_v9 = vand.u32 2147483648, %v959_v46  ;;  %v1032_v30 = vand.u32 2147483647, %v959_v46  ;;  %v819_v34 = vor.u32 1.1754944e-38, %v818_v41 }
 0x21b   : > { %v1987_v18 = vpop.eup %1986  ;;  %1990 = vrcp.f32 %v2625_v25  ;;  %v815_v27 = vsel %vm814_vm3, %v2508_v32, %v811_v11  ;;  %v2642_v42 = vmax.f32 %v729_v22, 1e-10  ;;  %vm1028_vm10 = vweird.f32 %v959_v46 }
 0x21c   : > { %v1016_v13 = vsel %vm1015_vm11, %v1985_v26, %v1012_v10  ;;  %v1024_v20 = vmul.f32 %v1987_v18, %v959_v46  ;;  %v2646_v59 = vsel %vm817_vm4, %v819_v34, %v815_v27  ;;  %v1035_v47 = vor.u32 1.1754944e-38, %v1034_v9 }
 0x21d   : > { %v2619_v63 = vsel %vm1018_vm12, %v1020_v31, %v1016_v13  ;;  %vm1033_vm1 = vcmp.eq.f32.partialorder %v1032_v30, 8.507059e+37  ;;  %1992 = vrcp.f32 %v2642_v42  ;;  %v871_v44 = vsel %vm711_vm6, %v2646_v59, 0.0 }
 0x21e   : > { %v1086_v2 = vsel %vm926_vm14, %v2619_v63, 0.0  ;;  %v1025_v26 = vsub.f32 1.0, %v1024_v20  ;;  %vm1029_vm14 = vweird.f32 %v1987_v18  ;;  %vm782_vm6 = vweird.f32 %v2617_v62 }
 0x21f   : > { %v2633_v19 = vadd.f32 %v1086_v2, %v870_v40  ;;  %v2644_v58 = vpop.eup %1988  ;;  %vm1030_vm13 = vmor %vm1028_vm10, %vm1029_vm14  ;;  %v786_v13 = vand.u32 2147483647, %v2617_v62  ;;  %v788_v41 = vand.u32 2147483648, %v2617_v62  ;;  %vm827_vm12 = vweird.f32 %v2625_v25 }
 0x220   : > { %v1026_v29 = vmul.f32 %v1987_v18, %v1025_v26  ;;  %v778_v46 = vmul.f32 %v2644_v58, %v2617_v62  ;;  %vm783_vm8 = vweird.f32 %v2644_v58  ;;  %vm842_vm10 = vweird.f32 %v2642_v42 }
 0x221   : > { %v2648_v60 = vpop.eup %1990  ;;  %vm2730_vm11 = vmor %vm782_vm6, %vm783_vm8  ;;  %vm2739_vm5 = vcmp.eq.f32.partialorder %v786_v13, 8.507059e+37  ;;  %v789_v62 = vor.u32 1.1754944e-38, %v788_v41 }
 0x222   : > { %v1027_v43 = vadd.f32 %v1987_v18, %v1026_v29  ;;  %v823_v7 = vmul.f32 %v2648_v60, %v2625_v25  ;;  %v779_v0 = vsub.f32 1.0, %v778_v46  ;;  %vm828_vm9 = vweird.f32 %v2648_v60 }
 0x223   : > { %v2682_v10 = vpop.eup %1992  ;;  %vm2756_vm4 = vmor %vm827_vm12, %vm828_vm9 }
 0x224   : > { %v1031_v52 = vsel %vm1030_vm13, %v1987_v18, %v1027_v43  ;;  %v824_v49 = vsub.f32 1.0, %v823_v7  ;;  %v780_v31 = vmul.f32 %v2644_v58, %v779_v0  ;;  %v838_v18 = vmul.f32 %v2682_v10, %v2642_v42 }
 0x225   : > { %v2651_v32 = vsel %vm1033_vm1, %v1035_v47, %v1031_v52  ;;  %v831_v52 = vand.u32 2147483647, %v2625_v25  ;;  %vm843_vm1 = vweird.f32 %v2682_v10 }
 0x226   : > { %v1087_v3 = vsel %vm927_vm15, %v2651_v32, 0.0  ;;  %v781_v34 = vadd.f32 %v2644_v58, %v780_v31  ;;  %v825_v47 = vmul.f32 %v2648_v60, %v824_v49  ;;  %v839_v46 = vsub.f32 1.0, %v838_v18  ;;  %vm2783_vm12 = vmor %vm842_vm10, %vm843_vm1 }
 0x227   : > { %v2665_v4 = vadd.f32 %v1087_v3, %v871_v44  ;;  %v833_v3 = vand.u32 2147483648, %v2625_v25  ;;  %vm2749_vm14 = vcmp.eq.f32.partialorder %v831_v52, 8.507059e+37  ;;  %v848_v25 = vand.u32 2147483648, %v2642_v42 }
 0x228   : > { %v785_v0 = vsel %vm2730_vm11, %v2644_v58, %v781_v34  ;;  %v826_v18 = vadd.f32 %v2648_v60, %v825_v47  ;;  %v840_v13 = vmul.f32 %v2682_v10, %v839_v46  ;;  %v846_v58 = vand.u32 2147483647, %v2642_v42 }
 0x229   : > { %v2663_v1 = vpop.xlane.xlu1 %906  ;;  %v834_v47 = vor.u32 1.1754944e-38, %v833_v3  ;;  %vm3212_vm11 = vcmp.eq.f32.partialorder %v2317_v53, %v2380_v14 }
 0x22a   : > { %vm925_vm0 = vcmp.eq.f32.partialorder %v2390_v16, %v2663_v1  ;;  %v941_v5 = vand.u32 4294967280, %v2663_v1  ;;  %v841_v46 = vadd.f32 %v2682_v10, %v840_v13  ;;  %vm2787_vm9 = vcmp.eq.f32.partialorder %v846_v58, 8.507059e+37 }
 0x22b   : > { %v2674_v37 = vsel %vm925_vm0, inf, %v2390_v16 }
 0x22c   : > { %v2678_v12 = vmax.f32 %v941_v5, 1e-10  ;;  %v1121_v24 = vsel %vm682_vm2, %v2674_v37, inf  ;;  %v845_v13 = vsel %vm2783_vm12, %v2682_v10, %v841_v46 }
 0x22d   : > { %1122 = vmin.xlane.f32.xlu0 %v1121_v24 }
 0x22e   : > { %1994 = vrcp.f32 %v2678_v12  ;;  %v1004_v24 = vand.u32 2147483648, %v2678_v12  ;;  %v1002_v31 = vand.u32 2147483647, %v2678_v12  ;;  %vm998_vm13 = vweird.f32 %v2678_v12 }
 0x230   : > { %v1005_v34 = vor.u32 1.1754944e-38, %v1004_v24  ;;  %vm1003_vm8 = vcmp.eq.f32.partialorder %v1002_v31, 8.507059e+37 }
 0x231   : > { %v2690_v40 = vpop.xlane.xlu1 %915  ;;  %v2692_v2 = vpop.xlane.xlu0 %918 }
 0x232   : > { %vm928_vm15 = vcmp.eq.f32.partialorder %v2402_v21, %v2690_v40  ;;  %v944_v11 = vand.u32 4294967280, %v2690_v40  ;;  %vm929_vm7 = vcmp.eq.f32.partialorder %v2410_v23, %v2692_v2  ;;  %v945_v20 = vand.u32 4294967280, %v2692_v2  ;;  %v1334_v40 = vld [vmem:[%s406_s26 + $0x8] sm:$0xff] }
 0x233   : > { %v2706_v22 = vsel %vm928_vm15, inf, %v2402_v21  ;;  %v2712_v8 = vsel %vm929_vm7, inf, %v2410_v23  ;;  %1373 = vmatpush.msra.mxu1 %v1334_v40 }
 0x234   : > { %v1995_v26 = vpop.eup %1994  ;;  %v2714_v9 = vmax.f32 %v944_v11, 1e-10  ;;  %v2716_v27 = vmax.f32 %v945_v20, 1e-10  ;;  %v1130_v29 = vsel %vm682_vm2, %v2706_v22, inf  ;;  %v1133_v30 = vsel %vm682_vm2, %v2712_v8, inf }
 0x235   : > { %v994_v43 = vmul.f32 %v1995_v26, %v2678_v12  ;;  %1131 = vmin.xlane.f32.xlu0 %v1130_v29  ;;  %1134 = vmin.xlane.f32.xlu1 %v1133_v30  ;;  %vm999_vm3 = vweird.f32 %v1995_v26  ;;  %v2765_v30 = vsel %vm2739_vm5, %v789_v62, %v785_v0  ;;  %v830_v12 = vsel %vm2756_vm4, %v2648_v60, %v826_v18 }
 0x236   : > { %1996 = vrcp.f32 %v2714_v9  ;;  %vm1000_vm6 = vmor %vm998_vm13, %vm999_vm3  ;;  %v869_v62 = vsel %vm3212_vm11, %v2765_v30, 0.0  ;;  %v849_v0 = vor.u32 1.1754944e-38, %v848_v25  ;;  %v1049_v53 = vand.u32 2147483648, %v2714_v9 }
 0x237   : > { %v995_v5 = vsub.f32 1.0, %v994_v43  ;;  %1998 = vrcp.f32 %v2716_v27  ;;  %v1047_v31 = vand.u32 2147483647, %v2714_v9  ;;  %v1064_v18 = vand.u32 2147483648, %v2716_v27 }
 0x238   : > { %v1062_v16 = vand.u32 2147483647, %v2716_v27  ;;  %v2807_v58 = vsel %vm2749_vm14, %v834_v47, %v830_v12  ;;  %vm1058_vm10 = vweird.f32 %v2716_v27 }
 0x239   : > { %v996_v49 = vmul.f32 %v1995_v26, %v995_v5  ;;  %vm1048_vm13 = vcmp.eq.f32.partialorder %v1047_v31, 8.507059e+37 }
 0x23a   : > { %vm1063_vm14 = vcmp.eq.f32.partialorder %v1062_v16, 8.507059e+37 }
 0x23b   : > { %v997_v41 = vadd.f32 %v1995_v26, %v996_v49 }
 0x23c   : > { %v1997_v29 = vpop.eup %1996 }
 0x23d   : > { %v1999_v43 = vpop.eup %1998  ;;  %v1001_v52 = vsel %vm1000_vm6, %v1995_v26, %v997_v41  ;;  %v1039_v44 = vmul.f32 %v1997_v29, %v2714_v9  ;;  %vm1044_vm5 = vweird.f32 %v1997_v29  ;;  %v1050_v41 = vor.u32 1.1754944e-38, %v1049_v53  ;;  %v1333_v26 = vld [vmem:[%s406_s26] sm:$0xff]  ;;  %v1326_v53 = vld [vmem:[%s2845_s23 + $0x8] sm:$0xff]  ;;  %s1713_s26 = sshll.u32 %s3128_s16, 4  ;;  %s1714_s26 = int_to_ptr.vmem [resolvable:$true] %s1713_s26 }
 0x23e   : > { %v2774_v5 = vsel %vm1003_vm8, %v1005_v34, %v1001_v52  ;;  %v1054_v7 = vmul.f32 %v1999_v43, %v2716_v27  ;;  %vm1059_vm3 = vweird.f32 %v1999_v43  ;;  %v2812_v34 = vsel %vm2787_vm9, %v849_v0, %v845_v13  ;;  %1374 = vmatpush.msra.mxu1 %v1333_v26 }
 0x23f   : > { %v1085_v60 = vsel %vm925_vm0, %v2774_v5, 0.0  ;;  %v1040_v24 = vsub.f32 1.0, %v1039_v44  ;;  %vm1043_vm0 = vweird.f32 %v2714_v9  ;;  %vm1060_vm1 = vmor %vm1058_vm10, %vm1059_vm3  ;;  %v1065_v52 = vor.u32 1.1754944e-38, %v1064_v18 }
 0x240   : > { %v2795_v49 = vadd.f32 %v1085_v60, %v869_v62  ;;  %v1055_v14 = vsub.f32 1.0, %v1054_v7  ;;  %vm1045_vm4 = vmor %vm1043_vm0, %vm1044_vm5  ;;  %vm3217_vm6 = vcmp.eq.f32.partialorder %v2310_v39, %v2384_v15  ;;  %vm3218_vm8 = vcmp.eq.f32.partialorder %v2322_v55, %v2396_v17  ;;  %v1323_v55 = vld [vmem:[%s3181_s4] sm:$0xff] }
 0x241   : > { %v1041_v42 = vmul.f32 %v1997_v29, %v1040_v24  ;;  %v872_v47 = vsel %vm3217_vm6, %v2807_v58, 0.0  ;;  %v873_v44 = vsel %vm3218_vm8, %v2812_v34, 0.0  ;;  %1568 = vmatpush.msrb.mxu2 %v1323_v55  ;;  %v1325_v17 = vld [vmem:[%s2845_s23] sm:$0xff] }
 0x242   : > { %v1056_v20 = vmul.f32 %v1999_v43, %v1055_v14 }
 0x243   : > { %v1042_v1 = vadd.f32 %v1997_v29, %v1041_v42 }
 0x244   : > { %v1057_v25 = vadd.f32 %v1999_v43, %v1056_v20 }
 0x245   : > { %v1046_v10 = vsel %vm1045_vm4, %v1997_v29, %v1042_v1 }
 0x246   : > { %v2814_v9 = vsel %vm1048_vm13, %v1050_v41, %v1046_v10  ;;  %v1061_v11 = vsel %vm1060_vm1, %v1999_v43, %v1057_v25  ;;  %v730_v43 = vand.u32 4294967280, %v2498_v28 }
 0x247   : > { %v1088_v27 = vsel %vm928_vm15, %v2814_v9, 0.0  ;;  %v2824_v29 = vsel %vm1063_vm14, %v1065_v52, %v1061_v11  ;;  %vm1528_vm15 = vcmask 64512  }
 0x248   : > { %v2830_v12 = vadd.f32 %v1088_v27, %v872_v47  ;;  %v1089_v39 = vsel %vm929_vm7, %v2824_v29, 0.0  ;;  %v746_v21 = vmax.f32 %v730_v43, 1e-10  ;;  %1873 = vmatmul.msk.f32.vlgmr.msrb.gmra.mxu2 %vm1528_vm15, %v1325_v17 }
 0x249   : > { %v2836_v15 = vadd.f32 %v1089_v39, %v873_v44 }
 0x24a   : > { %2000 = vrcp.f32 %v746_v21  ;;  %v863_v1 = vand.u32 2147483648, %v746_v21  ;;  %vm857_vm11 = vweird.f32 %v746_v21  ;;  %v861_v47 = vand.u32 2147483647, %v746_v21 }
 0x24c   : > { %v864_v43 = vor.u32 1.1754944e-38, %v863_v1  ;;  %vm2900_vm3 = vcmp.eq.f32.partialorder %v861_v47, 8.507059e+37 }
 0x250   : > { %v2854_v23 = vpop.eup %2000  ;;  %1874 = vmatmul.msk.f32.gmra.mxu2 %vm1528_vm15, %v1326_v53  ;;  %v1102_v53 = vadd.f32 %v2619_v63, %v2614_v57 }
 0x251   : > { %v853_v3 = vmul.f32 %v2854_v23, %v746_v21  ;;  %vm858_vm12 = vweird.f32 %v2854_v23 }
 0x252   : > { %vm2896_vm5 = vmor %vm857_vm11, %vm858_vm12 }
 0x253   : > { %v854_v0 = vsub.f32 1.0, %v853_v3  ;;  %v1100_v3 = vadd.f32 %v2584_v51, %v2526_v38 }
 0x255   : > { %v855_v13 = vmul.f32 %v2854_v23, %v854_v0  ;;  %v1099_v0 = vadd.f32 %v2590_v54, %v2536_v45 }
 0x257   : > { %v856_v44 = vadd.f32 %v2854_v23, %v855_v13 }
 0x259   : > { %v860_v13 = vsel %vm2896_vm5, %v2854_v23, %v856_v44 }
 0x277   : > { %v2857_v2 = vpop.xlane.xlu1 %1119  ;;  %v2859_v46 = vpop.xlane.xlu2 %1116 }
 0x278   : > { %v1156_v7 = vand.u32 4294967280, %v2857_v2  ;;  %v1155_v62 = vand.u32 4294967280, %v2859_v46  ;;  %vm1139_vm10 = vcmp.eq.f32.partialorder %v2458_v56, %v2859_v46  ;;  %v2930_v56 = vsel %vm2900_vm3, %v864_v43, %v860_v13 }
 0x279   : > { %vm3223_vm3 = vcmp.eq.f32.partialorder %v2352_v6, %v2498_v28 }
 0x27a   : > { %v1172_v60 = vmax.f32 %v1156_v7, 1e-10  ;;  %v1171_v24 = vmax.f32 %v1155_v62, 1e-10 }
 0x27c   : > { %2002 = vrcp.f32 %v1172_v60  ;;  %v1203_v55 = vand.u32 2147483647, %v1172_v60  ;;  %v1205_v17 = vand.u32 2147483648, %v1172_v60  ;;  %v1188_v62 = vand.u32 2147483647, %v1171_v24 }
 0x27d   : > { %2004 = vrcp.f32 %v1171_v24  ;;  %v1190_v26 = vand.u32 2147483648, %v1171_v24  ;;  %vm1199_vm4 = vweird.f32 %v1172_v60  ;;  %vm1184_vm14 = vweird.f32 %v1171_v24 }
 0x27e   : > { %vm1204_vm1 = vcmp.eq.f32.partialorder %v1203_v55, 8.507059e+37  ;;  %v1206_v45 = vor.u32 1.1754944e-38, %v1205_v17  ;;  %vm1189_vm8 = vcmp.eq.f32.partialorder %v1188_v62, 8.507059e+37 }
 0x27f   : > { %v2866_v14 = vpop.xlane.xlu1 %1125  ;;  %v2868_v42 = vpop.xlane.xlu2 %921 }
 0x280   : > { %v1158_v31 = vand.u32 4294967280, %v2866_v14  ;;  %vm930_vm7 = vcmp.eq.f32.partialorder %v2522_v33, %v2868_v42  ;;  %v946_v18 = vand.u32 4294967280, %v2868_v42 }
 0x281   : > { %v2879_v20 = vsel %vm930_vm7, inf, %v2522_v33 }
 0x282   : > { %v2003_v16 = vpop.eup %2002  ;;  %v2881_v41 = vmax.f32 %v1158_v31, 1e-10  ;;  %v2883_v25 = vmax.f32 %v946_v18, 1e-10  ;;  %v1136_v10 = vsel %vm682_vm2, %v2879_v20, inf }
 0x283   : > { %v2005_v52 = vpop.eup %2004  ;;  %v1195_v11 = vmul.f32 %v2003_v16, %v1172_v60  ;;  %1137 = vmin.xlane.f32.xlu2 %v1136_v10  ;;  %vm1200_vm9 = vweird.f32 %v2003_v16  ;;  %v1191_v10 = vor.u32 1.1754944e-38, %v1190_v26 }
 0x284   : > { %v1180_v27 = vmul.f32 %v2005_v52, %v1171_v24  ;;  %2006 = vrcp.f32 %v2881_v41  ;;  %vm1185_vm0 = vweird.f32 %v2005_v52  ;;  %vm1201_vm13 = vmor %vm1199_vm4, %vm1200_vm9  ;;  %v1233_v60 = vand.u32 2147483647, %v2881_v41 }
 0x285   : > { %v1196_v39 = vsub.f32 1.0, %v1195_v11  ;;  %2008 = vrcp.f32 %v2883_v25  ;;  %vm1186_vm6 = vmor %vm1184_vm14, %vm1185_vm0  ;;  %v1235_v17 = vand.u32 2147483648, %v2881_v41  ;;  %vm1140_vm9 = vcmp.eq.f32.partialorder %v2452_v50, %v2857_v2 }
 0x286   : > { %v1181_v40 = vsub.f32 1.0, %v1180_v27  ;;  %vm1229_vm5 = vweird.f32 %v2881_v41  ;;  %vm1073_vm4 = vweird.f32 %v2883_v25 }
 0x287   : > { %v1197_v7 = vmul.f32 %v2003_v16, %v1196_v39 }
 0x288   : > { %v1182_v18 = vmul.f32 %v2005_v52, %v1181_v40 }
 0x289   : > { %v1198_v1 = vadd.f32 %v2003_v16, %v1197_v7  ;;  %v2915_v24 = vpop.xlane.xlu2 %1128 }
 0x28a   : > { %v2007_v38 = vpop.eup %2006  ;;  %v1183_v51 = vadd.f32 %v2005_v52, %v1182_v18 }
 0x28b   : > { %v2009_v54 = vpop.eup %2008  ;;  %v1202_v21 = vsel %vm1201_vm13, %v2003_v16, %v1198_v1  ;;  %v1225_v11 = vmul.f32 %v2007_v38, %v2881_v41  ;;  %vm1230_vm11 = vweird.f32 %v2007_v38  ;;  %v1159_v1 = vand.u32 4294967280, %v2915_v24 }
 0x28c   : > { %v1207_v47 = vsel %vm1204_vm1, %v1206_v45, %v1202_v21  ;;  %v1187_v23 = vsel %vm1186_vm6, %v2005_v52, %v1183_v51  ;;  %v1069_v27 = vmul.f32 %v2009_v54, %v2883_v25  ;;  %v1077_v52 = vand.u32 2147483647, %v2883_v25  ;;  %vm1231_vm0 = vmor %vm1229_vm5, %vm1230_vm11 }
 0x28d   : > { %v2912_v44 = vadd.f32 %v1207_v47, %v1100_v3  ;;  %v1192_v39 = vsel %vm1189_vm8, %v1191_v10, %v1187_v23  ;;  %v1226_v55 = vsub.f32 1.0, %v1225_v11  ;;  %v1079_v3 = vand.u32 2147483648, %v2883_v25 }
 0x28e   : > { %v1299_v16 = vsel %vm1139_vm10, %v1192_v39, 0.0  ;;  %v2920_v40 = vadd.f32 %v1192_v39, %v1099_v0  ;;  %v1070_v7 = vsub.f32 1.0, %v1069_v27  ;;  %vm1074_vm12 = vweird.f32 %v2009_v54 }
 0x28f   : > { %v1307_v62 = vadd.f32 %v1299_v16, %v2606_v48  ;;  %v1227_v26 = vmul.f32 %v2007_v38, %v1226_v55  ;;  %v1236_v48 = vor.u32 1.1754944e-38, %v1235_v17  ;;  %v1175_v57 = vmax.f32 %v1159_v1, 1e-10  ;;  %vm1075_vm13 = vmor %vm1073_vm4, %vm1074_vm12  ;;  %v1328_v17 = vld [vmem:[%s2845_s23 + $0x18] sm:$0xff] }
 0x290   : > { %v1071_v18 = vmul.f32 %v2009_v54, %v1070_v7  ;;  %vm1234_vm10 = vcmp.eq.f32.partialorder %v1233_v60, 8.507059e+37  ;;  %vm1078_vm1 = vcmp.eq.f32.partialorder %v1077_v52, 8.507059e+37  ;;  %v1080_v43 = vor.u32 1.1754944e-38, %v1079_v3 }
 0x291   : > { %v1228_v46 = vadd.f32 %v2007_v38, %v1227_v26  ;;  %1865 = vmatmul.msk.f32.vlgmr.msra.gmra.mxu1 %vm682_vm2, %v1307_v62  ;;  %v1300_v31 = vsel %vm1140_vm9, %v1207_v47, 0.0  ;;  %2010 = vrcp.f32 %v1175_v57  ;;  %v874_v25 = vsel %vm3223_vm3, %v2930_v56, 0.0  ;;  %v1327_v47 = vld [vmem:[%s2845_s23 + $0x10] sm:$0xff] }
 0x292   : > { %v1072_v0 = vadd.f32 %v2009_v54, %v1071_v18  ;;  %v1308_v45 = vadd.f32 %v1300_v31, %v2598_v61  ;;  %v1250_v11 = vand.u32 2147483648, %v1175_v57  ;;  %v1248_v6 = vand.u32 2147483647, %v1175_v57  ;;  %1875 = vmatmul.msk.f32.gmra.mxu2 %vm1528_vm15, %v1327_v47  ;;  %v1329_v18 = vld [vmem:[%s2845_s23 + $0x20] sm:$0xff] }
 0x293   : > { %v1232_v63 = vsel %vm1231_vm0, %v2007_v38, %v1228_v46  ;;  %v1103_v60 = vadd.f32 %v2651_v32, %v2646_v59 }
 0x294   : > { %v2937_v13 = vsel %vm1234_vm10, %v1236_v48, %v1232_v63  ;;  %v1076_v50 = vsel %vm1075_vm13, %v2009_v54, %v1072_v0  ;;  %v1251_v61 = vor.u32 1.1754944e-38, %v1250_v11  ;;  %vm1249_vm8 = vcmp.eq.f32.partialorder %v1248_v6, 8.507059e+37 }
 0x295   : > { %v2940_v2 = vadd.f32 %v2937_v13, %v1102_v53  ;;  %v2942_v41 = vsel %vm1078_vm1, %v1080_v43, %v1076_v50  ;;  %v1101_v50 = vadd.f32 %v2774_v5, %v2765_v30  ;;  %vm1142_vm1 = vcmp.eq.f32.partialorder %v2516_v35, %v2866_v14 }
 0x296   : > { %v1090_v38 = vsel %vm930_vm7, %v2942_v41, 0.0  ;;  %vm1244_vm7 = vweird.f32 %v1175_v57 }
 0x297   : > { %v2953_v51 = vadd.f32 %v1090_v38, %v874_v25  ;;  %v2011_v54 = vpop.eup %2010 }
 0x298   : > { %v1240_v21 = vmul.f32 %v2011_v54, %v1175_v57  ;;  %vm1245_vm14 = vweird.f32 %v2011_v54 }
 0x299   : > { %1866 = vmatmul.msk.f32.gmra.mxu1 %vm682_vm2, %v1308_v45  ;;  %vm1246_vm6 = vmor %vm1244_vm7, %vm1245_vm14  ;;  %v1330_v45 = vld [vmem:[%s2845_s23 + $0x28] sm:$0xff] }
 0x29a   : > { %v1241_v10 = vsub.f32 1.0, %v1240_v21  ;;  %1876 = vmatmul.msk.f32.gmra.mxu2 %vm1528_vm15, %v1328_v17 }
 0x29c   : > { %v1242_v23 = vmul.f32 %v2011_v54, %v1241_v10 }
 0x29e   : > { %v1243_v33 = vadd.f32 %v2011_v54, %v1242_v23 }
 0x2a0   : > { %v1123_v28 = vpop.xlane.xlu0 %1122  ;;  %v1247_v27 = vsel %vm1246_vm6, %v2011_v54, %v1243_v33 }
 0x2a1   : > { %v1157_v42 = vand.u32 4294967280, %v1123_v28  ;;  %v2960_v55 = vsel %vm1249_vm8, %v1251_v61, %v1247_v27  ;;  %vm1141_vm0 = vcmp.eq.f32.partialorder %v2674_v37, %v1123_v28  ;;  %v1105_v28 = vadd.f32 %v2824_v29, %v2812_v34 }
 0x2a2   : > { %v2964_v16 = vadd.f32 %v2960_v55, %v1103_v60  ;;  %1877 = vmatmul.msk.f32.gmra.mxu2 %vm1528_vm15, %v1329_v18  ;;  %v1332_v18 = vld [vmem:[%s2845_s23 + $0x38] sm:$0xff] }
 0x2a3   : > { %v1173_v39 = vmax.f32 %v1157_v42, 1e-10 }
 0x2a5   : > { %2012 = vrcp.f32 %v1173_v39  ;;  %v1220_v46 = vand.u32 2147483648, %v1173_v39  ;;  %v1218_v0 = vand.u32 2147483647, %v1173_v39  ;;  %vm1214_vm12 = vweird.f32 %v1173_v39 }
 0x2a7   : > { %v1221_v43 = vor.u32 1.1754944e-38, %v1220_v46  ;;  %vm1219_vm5 = vcmp.eq.f32.partialorder %v1218_v0, 8.507059e+37  ;;  %v1626_v46 = vld [vmem:[%s3183_s6 + $0x28] sm:$0xff] }
 0x2a8   : > { %v2967_v7 = vpop.xlane.xlu1 %1134  ;;  %v2969_v52 = vpop.xlane.xlu0 %1131 }
 0x2a9   : > { %v1161_v62 = vand.u32 4294967280, %v2967_v7  ;;  %v1160_v59 = vand.u32 4294967280, %v2969_v52 }
 0x2aa   : > { %1878 = vmatmul.msk.f32.gmra.mxu2 %vm1528_vm15, %v1330_v45  ;;  %v1621_v45 = vld [vmem:[%s3183_s6] sm:$0xff] }
 0x2ab   : > { %v2013_v32 = vpop.eup %2012  ;;  %v1177_v26 = vmax.f32 %v1161_v62, 1e-10  ;;  %v1176_v3 = vmax.f32 %v1160_v59, 1e-10  ;;  %v1331_v59 = vld [vmem:[%s2845_s23 + $0x30] sm:$0xff]  ;;  %s2052_s23 = scalar_lea.hbm %s2051_s20, 64 }
 0x2ac   : > { %v1210_v53 = vmul.f32 %v2013_v32, %v1173_v39  ;;  %vm1215_vm11 = vweird.f32 %v2013_v32  ;;  %v1302_v39 = vsel %vm1142_vm1, %v2937_v13, 0.0  ;;  %p2053_p12 = scmp.ne.s32.totalorder %s2051_s20, %s2052_s23  ;;  %p2058_p2 = scmp.lt.s32.totalorder %s2056_s21, %s2052_s23 }
 0x2ad   : > { %2014 = vrcp.f32 %v1177_v26  ;;  %vm1216_vm9 = vmor %vm1214_vm12, %vm1215_vm11  ;;  %v1280_v6 = vand.u32 2147483648, %v1177_v26  ;;  %v1278_v30 = vand.u32 2147483647, %v1177_v26  ;;  %v1265_v5 = vand.u32 2147483648, %v1176_v3 }
 0x2ae   : > { %v1211_v1 = vsub.f32 1.0, %v1210_v53  ;;  %2016 = vrcp.f32 %v1176_v3  ;;  %v1263_v37 = vand.u32 2147483647, %v1176_v3  ;;  %vm1274_vm13 = vweird.f32 %v1177_v26  ;;  %p2054_p13 = pnand %p2053_p12, %p2206_p4  ;;  %p2059_p3 = por %p2058_p2, %p2057_p1 }
 0x2af   : > { %vm1259_vm14 = vweird.f32 %v1176_v3  ;;  %vm1279_vm7 = vcmp.eq.f32.partialorder %v1278_v30, 8.507059e+37  ;;  %v1266_v62 = vor.u32 1.1754944e-38, %v1265_v5  ;;  %v1310_v14 = vadd.f32 %v1302_v39, %v2633_v19 }
 0x2b0   : > { %v1212_v48 = vmul.f32 %v2013_v32, %v1211_v1  ;;  %vm1264_vm8 = vcmp.eq.f32.partialorder %v1263_v37, 8.507059e+37  ;;  %vm1143_vm11 = vcmp.eq.f32.partialorder %v2596_v36, %v2915_v24  ;;  %vm1144_vm12 = vcmp.eq.f32.partialorder %v2706_v22, %v2969_v52  ;;  %v1635_v22 = vld [vmem:[%s3183_s6 + $0x70] sm:$0xff]  ;;  %v1628_v52 = vld [vmem:[%s3183_s6 + $0x38] sm:$0xff]  ;;  %p2055_p0 = pneg %p2054_p13 }
 0x2b1   : > { %v1303_v13 = vsel %vm1143_vm11, %v2960_v55, 0.0  ;;  %v1631_v24 = vld [vmem:[%s3183_s6 + $0x50] sm:$0xff]  ;;  %v1630_v55 = vld [vmem:[%s3183_s6 + $0x48] sm:$0xff]  ;;  %2018 = vrcp.f32 %v2920_v40  ;;  %v1106_v39 = vadd.f32 %v2942_v41, %v2930_v56  ;;  %v1426_v41 = vand.u32 2147483648, %v2912_v44 }
 0x2b2   : > { %v1213_v57 = vadd.f32 %v2013_v32, %v1212_v48  ;;  %1879 = vmatmul.msk.f32.gmra.mxu2 %vm1528_vm15, %v1331_v59  ;;  %v1627_v1 = vld [vmem:[%s3183_s6 + $0x30] sm:$0xff]  ;;  %v1625_v48 = vld [vmem:[%s3183_s6 + $0x20] sm:$0xff]  ;;  %2020 = vrcp.f32 %v2912_v44  ;;  %p2060_p5 = pnand %p2059_p3, %p2055_p0 }
 0x2b3   : > { %v2015_v63 = vpop.eup %2014 }
 0x2b4   : > { %v2017_v31 = vpop.eup %2016  ;;  %v1217_v25 = vsel %vm1216_vm9, %v2013_v32, %v1213_v57  ;;  %v1270_v38 = vmul.f32 %v2015_v63, %v1177_v26  ;;  %vm1275_vm4 = vweird.f32 %v2015_v63  ;;  %v1104_v32 = vadd.f32 %v2814_v9, %v2807_v58  ;;  %v1624_v57 = vld [vmem:[%s3183_s6 + $0x18] sm:$0xff] }
 0x2b5   : > { %v1222_v54 = vsel %vm1219_vm5, %v1221_v43, %v1217_v25  ;;  %v1255_v21 = vmul.f32 %v2017_v31, %v1176_v3  ;;  %vm1260_vm10 = vweird.f32 %v2017_v31  ;;  %vm1276_vm3 = vmor %vm1274_vm13, %vm1275_vm4  ;;  %v1311_v58 = vadd.f32 %v1303_v13, %v2665_v4  ;;  %v1636_v4 = vld [vmem:[%s3183_s6 + $0x78] sm:$0xff]  ;;  %v1622_v25 = vld [vmem:[%s3183_s6 + $0x8] sm:$0xff] }
 0x2b6   : > { %v1301_v10 = vsel %vm1141_vm0, %v1222_v54, 0.0  ;;  %v2979_v11 = vadd.f32 %v1222_v54, %v1101_v50  ;;  %v1271_v47 = vsub.f32 1.0, %v1270_v38  ;;  %vm1261_vm6 = vmor %vm1259_vm14, %vm1260_vm10  ;;  %vm1145_vm9 = vcmp.eq.f32.partialorder %v2712_v8, %v2967_v7  ;;  %1641 = vmatpush.msrb.mxu0 %v1636_v4  ;;  %1891 = vmatpush.msra.mxu3 %v1636_v4  ;;  %v1634_v8 = vld [vmem:[%s3183_s6 + $0x68] sm:$0xff]  ;;  %v1629_v7 = vld [vmem:[%s3183_s6 + $0x40] sm:$0xff] }
 0x2b7   : > { %v1309_v23 = vadd.f32 %v1301_v10, %v2795_v49  ;;  %v1256_v33 = vsub.f32 1.0, %v1255_v21  ;;  %v1281_v49 = vor.u32 1.1754944e-38, %v1280_v6  ;;  %v2019_v43 = vpop.eup %2018  ;;  %vm1405_vm10 = vweird.f32 %v2920_v40 }
 0x2b8   : > { %v1272_v42 = vmul.f32 %v2015_v63, %v1271_v47  ;;  %1642 = vmatpush.msrb.mxu0 %v1635_v22  ;;  %1892 = vmatpush.msra.mxu3 %v1635_v22  ;;  %v1401_v38 = vmul.f32 %v2019_v43, %v2920_v40  ;;  %v2021_v21 = vpop.eup %2020  ;;  %vm1406_vm5 = vweird.f32 %v2019_v43  ;;  %v1427_v4 = vor.u32 1.1754944e-38, %v1426_v41 }
 0x2b9   : > { %v1257_v61 = vmul.f32 %v2017_v31, %v1256_v33  ;;  %1867 = vmatmul.msk.f32.gmra.mxu1 %vm682_vm2, %v1309_v23  ;;  %v1416_v6 = vmul.f32 %v2021_v21, %v2912_v44  ;;  %vm1407_vm1 = vmor %vm1405_vm10, %vm1406_vm5 }
 0x2ba   : > { %v1273_v60 = vadd.f32 %v2015_v63, %v1272_v42  ;;  %1643 = vmatpush.msrb.mxu0 %v1634_v8  ;;  %1893 = vmatpush.msra.mxu3 %v1634_v8  ;;  %v1402_v54 = vsub.f32 1.0, %v1401_v38 }
 0x2bb   : > { %v1258_v27 = vadd.f32 %v2017_v31, %v1257_v61  ;;  %1880 = vmatmul.msk.f32.gmra.mxu2 %vm1528_vm15, %v1332_v18  ;;  %v1417_v37 = vsub.f32 1.0, %v1416_v6 }
 0x2bc   : > { %v1277_v17 = vsel %vm1276_vm3, %v2015_v63, %v1273_v60  ;;  %v1403_v23 = vmul.f32 %v2019_v43, %v1402_v54  ;;  %v1411_v60 = vand.u32 2147483648, %v2920_v40 }
 0x2bd   : > { %v1282_v34 = vsel %vm1279_vm7, %v1281_v49, %v1277_v17  ;;  %v1262_v29 = vsel %vm1261_vm6, %v2017_v31, %v1258_v27  ;;  %v1623_v31 = vld [vmem:[%s3183_s6 + $0x10] sm:$0xff]  ;;  %v1409_v27 = vand.u32 2147483647, %v2920_v40  ;;  %vm1421_vm7 = vweird.f32 %v2021_v21 }
 0x2be   : > { %v2992_v26 = vadd.f32 %v1282_v34, %v1105_v28  ;;  %v1267_v35 = vsel %vm1264_vm8, %v1266_v62, %v1262_v29  ;;  %v1305_v3 = vsel %vm1145_vm9, %v1282_v34, 0.0  ;;  %v1404_v61 = vadd.f32 %v2019_v43, %v1403_v23 }
 0x2bf   : > { %v2995_v53 = vadd.f32 %v1267_v35, %v1104_v32  ;;  %v1304_v9 = vsel %vm1144_vm12, %v1267_v35, 0.0  ;;  %v1313_v36 = vadd.f32 %v1305_v3, %v2836_v15  ;;  %v1632_v15 = vld [vmem:[%s3183_s6 + $0x58] sm:$0xff]  ;;  %v1418_v32 = vmul.f32 %v2021_v21, %v1417_v37 }
 0x2c0   : > { %v1312_v19 = vadd.f32 %v1304_v9, %v2830_v12  ;;  %v1633_v12 = vld [vmem:[%s3183_s6 + $0x60] sm:$0xff]  ;;  %v1408_v59 = vsel %vm1407_vm1, %v2019_v43, %v1404_v61  ;;  %v1412_v35 = vor.u32 1.1754944e-38, %v1411_v60  ;;  %vm1410_vm14 = vcmp.eq.f32.partialorder %v1409_v27, 8.507059e+37 }
 0x2c1   : > { %1868 = vmatmul.msk.f32.gmra.mxu1 %vm682_vm2, %v1310_v14  ;;  %1644 = vmatpush.msrb.mxu0 %v1633_v12  ;;  %v1419_v56 = vadd.f32 %v2021_v21, %v1418_v32  ;;  %vm1420_vm6 = vweird.f32 %v2912_v44  ;;  %vm1435_vm12 = vweird.f32 %v2979_v11  ;;  %v1454_v61 = vand.u32 2147483647, %v2940_v2 }
 0x2c2   : > { %1894 = vmatpush.msra.mxu3 %v1633_v12  ;;  %vm1422_vm8 = vmor %vm1420_vm6, %vm1421_vm7  ;;  %vm1465_vm1 = vweird.f32 %v2964_v16  ;;  %vm1480_vm6 = vweird.f32 %v2995_v53 }
 0x2c3   : > { %1645 = vmatpush.msrb.mxu0 %v1632_v15  ;;  %vm1455_vm10 = vcmp.eq.f32.partialorder %v1454_v61, 8.507059e+37 }
 0x2c4   : > { %1895 = vmatpush.msra.mxu3 %v1632_v15 }
 0x2c5   : > { %1646 = vmatpush.msrb.mxu0 %v1631_v24 }
 0x2c6   : > { %1896 = vmatpush.msra.mxu3 %v1631_v24 }
 0x2c7   : > { %1647 = vmatpush.msrb.mxu0 %v1630_v55 }
 0x2c8   : > { %1897 = vmatpush.msra.mxu3 %v1630_v55 }
 0x2c9   : > { %1869 = vmatmul.msk.f32.gmra.mxu1 %vm682_vm2, %v1311_v58  ;;  %1648 = vmatpush.msrb.mxu0 %v1629_v7  ;;  %v1413_v58 = vsel %vm1410_vm14, %v1412_v35, %v1408_v59  ;;  %v1471_v35 = vand.u32 2147483648, %v2964_v16 }
 0x2ca   : > { %1898 = vmatpush.msra.mxu3 %v1629_v7 }
 0x2cb   : > { %1649 = vmatpush.msrb.mxu0 %v1628_v52  ;;  %v1570_v14 = vpop.f32.mrf.mxu2 }
 0x2cc   : > { %1899 = vmatpush.msra.mxu3 %v1628_v52 }
 0x2cd   : > { %1650 = vmatpush.msrb.mxu0 %v1627_v1 }
 0x2ce   : > { %1900 = vmatpush.msra.mxu3 %v1627_v1 }
 0x2cf   : > { %1651 = vmatpush.msrb.mxu0 %v1626_v46 }
 0x2d0   : > { %1901 = vmatpush.msra.mxu3 %v1626_v46 }
 0x2d1   : > { %1870 = vmatmul.msk.f32.gmra.mxu1 %vm682_vm2, %v1312_v19  ;;  %1652 = vmatpush.msrb.mxu0 %v1625_v48 }
 0x2d2   : > { %1902 = vmatpush.msra.mxu3 %v1625_v48 }
 0x2d3   : > { %1653 = vmatpush.msrb.mxu0 %v1624_v57  ;;  %v1573_v15 = vpop.f32.mrf.mxu2 }
 0x2d4   : > { %1903 = vmatpush.msra.mxu3 %v1624_v57 }
 0x2d5   : > { %1654 = vmatpush.msrb.mxu0 %v1623_v31 }
 0x2d6   : > { %1904 = vmatpush.msra.mxu3 %v1623_v31 }
 0x2d7   : > { %1655 = vmatpush.msrb.mxu0 %v1622_v25 }
 0x2d8   : > { %1905 = vmatpush.msra.mxu3 %v1622_v25  ;;  %v1439_v25 = vand.u32 2147483647, %v2979_v11 }
 0x2d9   : > { %1871 = vmatmul.msk.f32.gmra.mxu1 %vm682_vm2, %v1313_v36  ;;  %1656 = vmatpush.msrb.mxu0 %v1621_v45  ;;  %v1423_v36 = vsel %vm1422_vm8, %v2021_v21, %v1419_v56 }
 0x2da   : > { %1906 = vmatpush.msra.mxu3 %v1621_v45 }
 0x2f6   : > { %v1138_v0 = vpop.xlane.xlu2 %1137 }
 0x2f7   : > { %v1162_v63 = vand.u32 4294967280, %v1138_v0  ;;  %vm1146_vm3 = vcmp.eq.f32.partialorder %v2879_v20, %v1138_v0  ;;  %v3079_v20 = vld [vmem:[%s3182_s5] ss:$0 sm:$0xff] }
 0x2f9   : > { %v1178_v50 = vmax.f32 %v1162_v63, 1e-10 }
 0x2fb   : > { %2022 = vrcp.f32 %v1178_v50  ;;  %v1295_v42 = vand.u32 2147483648, %v1178_v50  ;;  %v1293_v5 = vand.u32 2147483647, %v1178_v50  ;;  %vm1289_vm0 = vweird.f32 %v1178_v50 }
 0x2fc   : > { %2024 = vrcp.f32 %v2979_v11 }
 0x2fd   : > { %v1296_v49 = vor.u32 1.1754944e-38, %v1295_v42  ;;  %vm1294_vm13 = vcmp.eq.f32.partialorder %v1293_v5, 8.507059e+37  ;;  %2026 = vrcp.f32 %v2940_v2 }
 0x2fe   : > { %2028 = vrcp.f32 %v2964_v16 }
 0x2ff   : > { %2030 = vrcp.f32 %v2995_v53 }
 0x300   : > { %2032 = vrcp.f32 %v2992_v26 }
 0x301   : > { %v2023_v10 = vpop.eup %2022 }
 0x302   : > { %v1285_v47 = vmul.f32 %v2023_v10, %v1178_v50  ;;  %vm1290_vm15 = vweird.f32 %v2023_v10  ;;  %v1441_v50 = vand.u32 2147483648, %v2979_v11 }
 0x303   : > { %vm1291_vm4 = vmor %vm1289_vm0, %vm1290_vm15  ;;  %vm1440_vm15 = vcmp.eq.f32.partialorder %v1439_v25, 8.507059e+37  ;;  %vm1450_vm0 = vweird.f32 %v2940_v2 }
 0x304   : > { %v1286_v33 = vsub.f32 1.0, %v1285_v47  ;;  %v1442_v21 = vor.u32 1.1754944e-38, %v1441_v50 }
 0x306   : > { %v1287_v30 = vmul.f32 %v2023_v10, %v1286_v33 }
 0x308   : > { %v1288_v28 = vadd.f32 %v2023_v10, %v1287_v30  ;;  %v1456_v30 = vand.u32 2147483648, %v2940_v2 }
 0x30a   : > { %v1292_v17 = vsel %vm1291_vm4, %v2023_v10, %v1288_v28  ;;  %v1457_v27 = vor.u32 1.1754944e-38, %v1456_v30 }
 0x30b   : > { %v1297_v62 = vsel %vm1294_vm13, %v1296_v49, %v1292_v17 }
 0x30c   : > { %v1306_v34 = vsel %vm1146_vm3, %v1297_v62, 0.0  ;;  %v3072_v29 = vadd.f32 %v1297_v62, %v1106_v39 }
 0x30d   : > { %v1314_v13 = vadd.f32 %v1306_v34, %v2953_v51  ;;  %v1424_v51 = vand.u32 2147483647, %v2912_v44  ;;  %v2025_v44 = vpop.eup %2024 }
 0x30e   : > { %v1376_v40 = vpop.f32.mrf.mxu1  ;;  %v1431_v18 = vmul.f32 %v2025_v44, %v2979_v11  ;;  %v2027_v46 = vpop.eup %2026  ;;  %vm1436_vm11 = vweird.f32 %v2025_v44  ;;  %2034 = vrcp.f32 %v3072_v29 }
 0x30f   : > { %v1520_v9 = vmul.f32 %v1413_v58, %v1376_v40  ;;  %1872 = vmatmul.msk.f32.gmra.mxu1 %vm682_vm2, %v1314_v13  ;;  %vm1425_vm2 = vcmp.eq.f32.partialorder %v1424_v51, 8.507059e+37  ;;  %v1446_v0 = vmul.f32 %v2027_v46, %v2940_v2  ;;  %v2029_v31 = vpop.eup %2028  ;;  %vm1437_vm9 = vmor %vm1435_vm12, %vm1436_vm11  ;;  %vm1451_vm5 = vweird.f32 %v2027_v46 }
 0x310   : > { %v1428_v12 = vsel %vm1425_vm2, %v1427_v4, %v1423_v36  ;;  %v1432_v1 = vsub.f32 1.0, %v1431_v18  ;;  %v1461_v54 = vmul.f32 %v2029_v31, %v2964_v16  ;;  %v2031_v42 = vpop.eup %2030  ;;  %vm1452_vm4 = vmor %vm1450_vm0, %vm1451_vm5  ;;  %vm1466_vm13 = vweird.f32 %v2029_v31 }
 0x311   : > { %v1594_v19 = vadd.f32 %v1570_v14, %v1520_v9  ;;  %v1447_v43 = vsub.f32 1.0, %v1446_v0  ;;  %v1476_v49 = vmul.f32 %v2031_v42, %v2995_v53  ;;  %v2033_v2 = vpop.eup %2032  ;;  %v1469_v13 = vand.u32 2147483647, %v2964_v16  ;;  %vm1467_vm3 = vmor %vm1465_vm1, %vm1466_vm13 }
 0x312   : > { %v1433_v48 = vmul.f32 %v2025_v44, %v1432_v1  ;;  %v1462_v33 = vsub.f32 1.0, %v1461_v54  ;;  %v1491_v41 = vmul.f32 %v2033_v2, %v2992_v26  ;;  %vm1481_vm7 = vweird.f32 %v2031_v42 }
 0x313   : > { %v1605_v3 = vadd.f32 %v3079_v20, %v1594_v19  ;;  %v1448_v45 = vmul.f32 %v2027_v46, %v1447_v43  ;;  %v1477_v34 = vsub.f32 1.0, %v1476_v49  ;;  %v1472_v19 = vor.u32 1.1754944e-38, %v1471_v35  ;;  %vm1482_vm8 = vmor %vm1480_vm6, %vm1481_vm7 }
 0x314   : > { %v1434_v63 = vadd.f32 %v2025_v44, %v1433_v48  ;;  %v1463_v60 = vmul.f32 %v2029_v31, %v1462_v33  ;;  %vm1470_vm14 = vcmp.eq.f32.partialorder %v1469_v13, 8.507059e+37  ;;  %v1486_v16 = vand.u32 2147483648, %v2995_v53 }
 0x315   : > { %v1613_v22 = vmax.f32 %v1605_v3, 0.0  ;;  %v1576_v57 = vpop.f32.mrf.mxu2  ;;  %v1449_v6 = vadd.f32 %v2027_v46, %v1448_v45  ;;  %v1478_v56 = vmul.f32 %v2031_v42, %v1477_v34  ;;  %vm1496_vm11 = vweird.f32 %v2033_v2 }
 0x316   : > { %v1379_v8 = vpop.f32.mrf.mxu1  ;;  %v1438_v38 = vsel %vm1437_vm9, %v2025_v44, %v1434_v63  ;;  %v1464_v32 = vadd.f32 %v2029_v31, %v1463_v60  ;;  %vm1495_vm12 = vweird.f32 %v2992_v26  ;;  %vm1510_vm0 = vweird.f32 %v3072_v29 }
 0x317   : > { %v1521_v24 = vmul.f32 %v1428_v12, %v1379_v8  ;;  %1657 = vmatmul.f32.vlgmr.msrb.gmra.mxu0 %v1613_v22  ;;  %v1443_v47 = vsel %vm1440_vm15, %v1442_v21, %v1438_v38  ;;  %v1453_v37 = vsel %vm1452_vm4, %v2027_v46, %v1449_v6  ;;  %v1479_v22 = vadd.f32 %v2031_v42, %v1478_v56  ;;  %vm1497_vm9 = vmor %vm1495_vm12, %vm1496_vm11 }
 0x318   : > { %v1458_v62 = vsel %vm1455_vm10, %v1457_v27, %v1453_v37  ;;  %v1468_v58 = vsel %vm1467_vm3, %v2029_v31, %v1464_v32  ;;  %v1492_v8 = vsub.f32 1.0, %v1491_v41 }
 0x319   : > { %v1595_v55 = vadd.f32 %v1573_v15, %v1521_v24  ;;  %v1473_v36 = vsel %vm1470_vm14, %v1472_v19, %v1468_v58  ;;  %v1484_v15 = vand.u32 2147483647, %v2995_v53  ;;  %v1483_v24 = vsel %vm1482_vm8, %v2031_v42, %v1479_v22 }
 0x31a   : > { %v1499_v53 = vand.u32 2147483647, %v2992_v26 }
 0x31b   : > { %v1606_v7 = vadd.f32 %v3079_v20, %v1595_v55  ;;  %vm1485_vm2 = vcmp.eq.f32.partialorder %v1484_v15, 8.507059e+37 }
 0x31c   : > { %vm1500_vm15 = vcmp.eq.f32.partialorder %v1499_v53, 8.507059e+37 }
 0x31d   : > { %v1614_v52 = vmax.f32 %v1606_v7, 0.0  ;;  %v1579_v5 = vpop.f32.mrf.mxu2  ;;  %v1493_v7 = vmul.f32 %v2033_v2, %v1492_v8 }
 0x31f   : > { %1660 = vmatmul.f32.gmra.mxu0 %v1614_v52  ;;  %v1487_v52 = vor.u32 1.1754944e-38, %v1486_v16  ;;  %v1494_v0 = vadd.f32 %v2033_v2, %v1493_v7 }
 0x321   : > { %v1488_v46 = vsel %vm1485_vm2, %v1487_v52, %v1483_v24  ;;  %v1498_v43 = vsel %vm1497_vm9, %v2033_v2, %v1494_v0 }
 0x325   : > { %v1582_v40 = vpop.f32.mrf.mxu2 }
 0x32d   : > { %v1585_v44 = vpop.f32.mrf.mxu2 }
 0x335   : > { %v1588_v54 = vpop.f32.mrf.mxu2 }
 0x336   : > { %v1382_v10 = vpop.f32.mrf.mxu1 }
 0x337   : > { %v1522_v23 = vmul.f32 %v1443_v47, %v1382_v10 }
 0x339   : > { %v1596_v11 = vadd.f32 %v1576_v57, %v1522_v23  ;;  %v1501_v57 = vand.u32 2147483648, %v2992_v26  ;;  %v2035_v26 = vpop.eup %2034 }
 0x33a   : > { %v1506_v6 = vmul.f32 %v2035_v26, %v3072_v29  ;;  %vm1511_vm5 = vweird.f32 %v2035_v26 }
 0x33b   : > { %v1607_v28 = vadd.f32 %v3079_v20, %v1596_v11  ;;  %v1502_v50 = vor.u32 1.1754944e-38, %v1501_v57  ;;  %v1514_v11 = vand.u32 2147483647, %v3072_v29  ;;  %vm1512_vm4 = vmor %vm1510_vm0, %vm1511_vm5 }
 0x33c   : > { %v1507_v33 = vsub.f32 1.0, %v1506_v6 }
 0x33d   : > { %v1615_v39 = vmax.f32 %v1607_v28, 0.0  ;;  %v1503_v45 = vsel %vm1500_vm15, %v1502_v50, %v1498_v43  ;;  %vm1515_vm10 = vcmp.eq.f32.partialorder %v1514_v11, 8.507059e+37 }
 0x33e   : > { %v1385_v17 = vpop.f32.mrf.mxu1  ;;  %v1508_v42 = vmul.f32 %v2035_v26, %v1507_v33  ;;  %v1591_v49 = vpop.f32.mrf.mxu2 }
 0x33f   : > { %v1523_v59 = vmul.f32 %v1458_v62, %v1385_v17  ;;  %1663 = vmatmul.f32.vlgmr.msra.gmra.mxu3 %v1615_v39  ;;  %v1971_v17 = vld [vmem:[%s3184_s7] ss:$0 sm:$0xff] }
 0x340   : > { %v1509_v30 = vadd.f32 %v2035_v26, %v1508_v42 }
 0x341   : > { %v1597_v14 = vadd.f32 %v1579_v5, %v1523_v59  ;;  %v1516_v5 = vand.u32 2147483648, %v3072_v29 }
 0x342   : > { %v1513_v61 = vsel %vm1512_vm4, %v2035_v26, %v1509_v30 }
 0x343   : > { %v1608_v9 = vadd.f32 %v3079_v20, %v1597_v14  ;;  %v1517_v37 = vor.u32 1.1754944e-38, %v1516_v5 }
 0x345   : > { %v1616_v51 = vmax.f32 %v1608_v9, 0.0  ;;  %v1518_v60 = vsel %vm1515_vm10, %v1517_v37, %v1513_v61 }
 0x346   : > { %v1388_v3 = vpop.f32.mrf.mxu1 }
 0x347   : > { %v1524_v4 = vmul.f32 %v1473_v36, %v1388_v3  ;;  %1666 = vmatmul.f32.gmra.mxu3 %v1616_v51 }
 0x349   : > { %v1598_v12 = vadd.f32 %v1582_v40, %v1524_v4 }
 0x34b   : > { %v1609_v55 = vadd.f32 %v3079_v20, %v1598_v12 }
 0x34d   : > { %v1617_v18 = vmax.f32 %v1609_v55, 0.0 }
 0x34e   : > { %v1391_v1 = vpop.f32.mrf.mxu1 }
 0x34f   : > { %v1525_v48 = vmul.f32 %v1488_v46, %v1391_v1  ;;  %1669 = vmatmul.f32.gmra.mxu3 %v1617_v18 }
 0x351   : > { %v1599_v63 = vadd.f32 %v1585_v44, %v1525_v48 }
 0x353   : > { %v1610_v31 = vadd.f32 %v3079_v20, %v1599_v63 }
 0x355   : > { %v1618_v25 = vmax.f32 %v1610_v31, 0.0 }
 0x356   : > { %v1394_v38 = vpop.f32.mrf.mxu1 }
 0x357   : > { %v1526_v21 = vmul.f32 %v1503_v45, %v1394_v38  ;;  %1672 = vmatmul.f32.gmra.mxu3 %v1618_v25 }
 0x359   : > { %v1600_v10 = vadd.f32 %v1588_v54, %v1526_v21 }
 0x35b   : > { %v1611_v47 = vadd.f32 %v3079_v20, %v1600_v10 }
 0x35d   : > { %v1619_v23 = vmax.f32 %v1611_v47, 0.0 }
 0x35f   : > { %1675 = vmatmul.f32.gmra.mxu3 %v1619_v23 }
 0x38c   : > { %v1397_v28 = vpop.f32.mrf.mxu1 }
 0x38d   : > { %v1527_v27 = vmul.f32 %v1518_v60, %v1397_v28 }
 0x38f   : > { %v1601_v39 = vadd.f32 %v1591_v49, %v1527_v27 }
 0x391   : > { %v1612_v62 = vadd.f32 %v3079_v20, %v1601_v39 }
 0x393   : > { %v1620_v59 = vmax.f32 %v1612_v62, 0.0 }
 0x394   : > { %v1658_v29 = vpop.f32.mrf.mxu0 }
 0x395   : > { %v1659_v32 = vadd.f32 %v1971_v17, %v1658_v29  ;;  %1678 = vmatmul.f32.gmra.mxu3 %v1620_v59 }
 0x397   : > { %v1682_v34 = vmax.f32 %v1659_v32, 0.0 }
 0x399   : > { %1690 = vst [vmem:[%s3128_s16] sm:$0xff] %v1682_v34 }
 0x39c   : > { %v1661_v2 = vpop.f32.mrf.mxu0 }
 0x39d   : > { %v1662_v35 = vadd.f32 %v1971_v17, %v1661_v2 }
 0x39f   : > { %v1683_v14 = vmax.f32 %v1662_v35, 0.0 }
 0x3a1   : > { %1691 = vst [vmem:[%s3128_s16 + $0x8] sm:$0xff] %v1683_v14 }
 0x3c2   : > { %v1664_v20 = vpop.f32.mrf.mxu3 }
 0x3c3   : > { %v1665_v13 = vadd.f32 %v1971_v17, %v1664_v20 }
 0x3c5   : > { %v1684_v40 = vmax.f32 %v1665_v13, 0.0 }
 0x3c7   : > { %1692 = vst [vmem:[%s3128_s16 + $0x10] sm:$0xff] %v1684_v40 }
 0x3ca   : > { %v1667_v58 = vpop.f32.mrf.mxu3 }
 0x3cb   : > { %v1668_v9 = vadd.f32 %v1971_v17, %v1667_v58 }
 0x3cd   : > { %v1685_v56 = vmax.f32 %v1668_v9, 0.0 }
 0x3cf   : > { %1693 = vst [vmem:[%s3128_s16 + $0x18] sm:$0xff] %v1685_v56 }
 0x3d2   : > { %v1670_v41 = vpop.f32.mrf.mxu3 }
 0x3d3   : > { %v1671_v19 = vadd.f32 %v1971_v17, %v1670_v41 }
 0x3d5   : > { %v1686_v51 = vmax.f32 %v1671_v19, 0.0 }
 0x3d7   : > { %1694 = vst [vmem:[%s3128_s16 + $0x20] sm:$0xff] %v1686_v51 }
 0x3da   : > { %v1673_v3 = vpop.f32.mrf.mxu3 }
 0x3db   : > { %v1674_v36 = vadd.f32 %v1971_v17, %v1673_v3 }
 0x3dd   : > { %v1687_v4 = vmax.f32 %v1674_v36, 0.0 }
 0x3df   : > { %1695 = vst [vmem:[%s3128_s16 + $0x28] sm:$0xff] %v1687_v4 }
 0x3e2   : > { %v1676_v22 = vpop.f32.mrf.mxu3 }
 0x3e3   : > { %v1677_v8 = vadd.f32 %v1971_v17, %v1676_v22 }
 0x3e5   : > { %v1688_v16 = vmax.f32 %v1677_v8, 0.0 }
 0x3e7   : > { %1696 = vst [vmem:[%s3128_s16 + $0x30] sm:$0xff] %v1688_v16 }
 0x418   : > { %v1679_v12 = vpop.f32.mrf.mxu3 }
 0x419   : > { %v1680_v15 = vadd.f32 %v1971_v17, %v1679_v12 }
 0x41b   : > { %v1689_v24 = vmax.f32 %v1680_v15, 0.0 }
 0x41d   : > { %1697 = vst [vmem:[%s3128_s16 + $0x38] sm:$0xff] %v1689_v24 }
 0x41e   : > { %2063 = shalt.err (!%p2060_p5)
}
 0x41f   : > { %s2119_s19 = smov 128   ;;  %s2120_s16 = smov 8  }
 0x420   : > { %1907 = dma.vmem_to_hbm [thread:$0]  (%p2206_p4), %s1714_s26, 1024, %s1716_s11, %s1699_s12, %s2119_s19, %s2119_s19, %s2120_s16  }
 0x421 PF: > { %p1913_p6 = scmp.ge.s32.totalorder %s2114_s10, 2  ;;  %s1730_s25 = sand.u32 1, %s2094_s27  }
 0x422   : > { %s1731_s30 = scalar_lea.sflag [#allocation3], %s1730_s25 }
 0x423   : > { %p1910_p7 = pnand %p1913_p6, %p2213_p8 }
 0x425   : > { %p1911_p9 = pneg %p1910_p7 }
 0x427   : > { %2089 = dma.done.wait (%p1911_p9), %s1731_s30, 1024  }
 0x428   : > { %2091 = vsyncadd (%p1911_p9), %s1731_s30, 4294966272  ;;  %s21_s10 = sadd.s32 1, %s2114_s10   ;;  %s3224_s27 = smov %s2098_s28 }
 0x429   : > { %p18_p10 = scmp.ge.s32.totalorder %s21_s10, 4   ;;  %s3225_s28 = smov %s2102_s29 }
 0x42a   : > { %s3226_s29 = smov %s2219_s18  ;;  %s3227_s30 = smov %s2110_s9 }
 0x42b   : > { %s3228_s9 = smov %s3230_s13  ;;  %20 = sbr.rel (!%p18_p10) target bundleno = 4 (0x4), region = 96 }
 0x430   :  { %1737 = vsyncpa [#allocation3], 1 }
 0x431   :  { %1739 = vsyncpa [#allocation3 + $0x1], 1 }

// kernel: tpu_custom_call.1
= control target key start
LH: loop header
LB: loop body
LE: loop exit
PB: predicated region body
PF: predicated region fallthrough
CT: control target
= control target key end

     0   :  { %13 = vsyncpa [#allocation3], 0  ;;  %s3171_s0 = inlined_call_operand.vmem [shape: f32[2,64,3], index: 0, kind: input, shape index: {}]   ;;  %s3172_s1 = inlined_call_operand.vmem [shape: f32[2,3,16], index: 1, kind: input, shape index: {}]   ;;  %s3173_s2 = inlined_call_operand.vmem [shape: f32[2,64,8], index: 2, kind: input, shape index: {}]   ;;  %s3174_s3 = inlined_call_operand.vmem [shape: f32[2,16,128], index: 3, kind: input, shape index: {}]   ;;  %s3175_s4 = inlined_call_operand.vmem [shape: f32[8,128], index: 4, kind: input, shape index: {}]   ;;  %s3176_s5 = inlined_call_operand.vmem [shape: f32[1,128], index: 5, kind: input, shape index: {}]   ;;  %s3177_s6 = inlined_call_operand.vmem [shape: f32[128,128], index: 6, kind: input, shape index: {}]   ;;  %s3178_s7 = inlined_call_operand.vmem [shape: f32[1,128], index: 7, kind: input, shape index: {}]   ;;  %s3179_s8 = inlined_call_operand.hbm [shape: f32[2,64,128], index: 8, kind: output, shape index: {}]  }
   0x1   :  { %15 = vsyncpa [#allocation3 + $0x1], 0  ;;  %s2160_s27 = smov 0   ;;  %s2162_s28 = smov 0  }
   0x2   :  { %s2164_s29 = smov 0   ;;  %s2166_s30 = smov 0  }
   0x3   :  { %s2168_s9 = smov 0   ;;  %s2170_s10 = smov 0  }
   0x4 LB: > { %s1837_s11 = sadd.s32 4294967295, %s2108_s10   ;;  %s1838_s12 = sadd.s32 4294967294, %s2108_s10   ;;  %s2108_s10 = sphi %s2170_s10, %s21_s10   ;;  %s2104_s9 = sphi %s2168_s9, %s3222_s9   ;;  %s2100_s30 = sphi %s2166_s30, %s3221_s30   ;;  %s2096_s29 = sphi %s2164_s29, %s3220_s29   ;;  %s2092_s28 = sphi %s2162_s28, %s3219_s28   ;;  %s2088_s27 = sphi %s2160_s27, %s3218_s27  }
   0x5   : > { %s33_s13 = sadd.s32 1, %s2104_s9  ;;  %s234_s14 = sadd.s32 1, %s2096_s29 }
   0x6   : > { %p35_p0 = scmp.ge.s32.totalorder %s33_s13, 2  ;;  %p244_p1 = scmp.ne.s32.totalorder %s2096_s29, %s2092_s28 }
   0x7   : > { %p245_p2 = scmp.eq.s32.totalorder %s1837_s11, 1  ;;  %p250_p3 = scmp.ne.s32.totalorder %s2092_s28, %s2088_s27 }
   0x8   : > { %s3224_s13 = smov (%p35_p0, %s33_s13), 0  ;;  %p251_p5 = scmp.eq.s32.totalorder %s1838_s12, 1 }
   0x9   : > { %p2200_p4 = por %p245_p2, %p244_p1  ;;  %s229_s16 = ssub.s32 %s2104_s9, %s3224_s13 }
   0xa   : > { %p1841_p6 = scmp.ge.s32.totalorder %s2108_s10, 1  ;;  %p232_p7 = scmp.eq.s32.totalorder %s229_s16, 0 }
   0xb   : > { %p2207_p8 = por %p251_p5, %p250_p3  ;;  %p322_p9 = scmp.lt.s32.totalorder %s2108_s10, 3 }
   0xc   : > { %s2213_s18 = scalar_select %p232_p7, %s2096_s29, %s234_s14  }
   0xd   : > { %p323_p10 = pnand %p1841_p6, %p322_p9 }
   0xe   : > { %p379_p11 = scmp.lt.s32.totalorder (!%p323_p10), %s2100_s30, 1  ;;  %s2110_s12 = smov (!%p323_p10), 127  }
   0xf   : > { %326 = sbr.rel (%p323_p10) target bundleno = 1057 (0x421), region = 52  ;;  %s2111_s14 = smov (!%p323_p10), 126  }
  0x14   : > { %s2217_s19 = scalar_select %p379_p11, %s2100_s30, 1  ;;  %vm530_vm0 = vcmask 1042432   ;;  %vm505_vm1 = vcmask 23552   ;;  %v2112_v15 = vmov 0   ;;  %vm682_vm2 = vcmask 130048  }
  0x15   : > { %1962 = vset.pattern.permute.xlu1 %v2112_v15  ;;  %1961 = vset.pattern.permute.xlu0 %v2112_v15 }
  0x16   : > { %s1880_s20 = sshll.u32 %s2217_s19, 6  ;;  %s1845_s21 = sshll.u32 %s2217_s19, 2  ;;  %1963 = vset.pattern.permute.xlu2 %v2112_v15 }
  0x17   : > { %s2226_s24 = scalar_lea.vmem %s3171_s0, %s1880_s20  ;;  %s391_s11 = scalar_lea.vmem %s3172_s1, %s1845_s21 }
  0x18   : > { %v409_v0 = vld [vmem:[%s2226_s24 + $0x8] sm:$0xff]  ;;  %v408_v1 = vld [vmem:[%s2226_s24] sm:$0xff]  ;;  %v410_v4 = vld [vmem:[%s2226_s24 + $0x10] sm:$0xff]  ;;  %s1882_s16 = sshll.u32 %s2217_s19, 4  ;;  %s2839_s23 = scalar_lea.vmem %s3173_s2, %s1880_s20 }
  0x19   : > { %v418_v2 = vmul.f32 %v409_v0, %v409_v0  ;;  %v417_v3 = vmul.f32 %v408_v1, %v408_v1  ;;  %v419_v5 = vmul.f32 %v410_v4, %v410_v4  ;;  %v2236_v6 = vld [vmem:[%s391_s11] sm:$0x7]  ;;  %v411_v7 = vld [vmem:[%s2226_s24 + $0x18] sm:$0xff]  ;;  %v413_v11 = vld [vmem:[%s2226_s24 + $0x28] sm:$0xff]  ;;  %s406_s26 = scalar_lea.vmem %s3174_s3, %s1882_s16  ;;  %s375_s19 = sand.u32 1, %s2092_s28  }
  0x1a   : > { %1850 = vmatpush.msk.msra.mxu0 %vm530_vm0, %v2236_v6  ;;  %1884 = vmatpush.msk.msra.mxu2 %vm530_vm0, %v2236_v6  ;;  %v420_v8 = vmul.f32 %v411_v7, %v411_v7  ;;  %v412_v9 = vld [vmem:[%s2226_s24 + $0x20] sm:$0xff]  ;;  %v422_v12 = vmul.f32 %v413_v11, %v413_v11  ;;  %v414_v13 = vld [vmem:[%s2226_s24 + $0x30] sm:$0xff]  ;;  %v415_v16 = vld [vmem:[%s2226_s24 + $0x38] sm:$0xff]  ;;  %v497_v48 = vmul.f32 %v2236_v6, %v2236_v6  ;;  %s1883_s21 = sshll.u32 %s2100_s30, 6 }
  0x1b   : > { %435 = vrot.lane.b32.xlu1 %v418_v2, %s2110_s12  ;;  %433 = vrot.lane.b32.xlu0 %v417_v3, %s2110_s12  ;;  %v421_v10 = vmul.f32 %v412_v9, %v412_v9  ;;  %v423_v14 = vmul.f32 %v414_v13, %v414_v13  ;;  %v2264_v17 = vmul.f32 %v415_v16, %v415_v16  ;;  %s1712_s25 = scalar_lea.hbm %s3179_s8, %s1883_s21  ;;  %s2050_s21 = scalar_lea.hbm %s3179_s8, 128 }
  0x1c   : > { %437 = vrot.lane.b32.xlu2 %v419_v5, %s2110_s12  ;;  %1851 = vmatmul.msk.f32.vlgmr.msra.gmra.mxu0 %vm505_vm1, %v408_v1  ;;  %v499_v49 = vrot.slane %v497_v48, 1  ;;  %v502_v53 = vrot.slane %v497_v48, 2  ;;  %s1715_s11 = sshll.u32 %s1712_s25, 4  ;;  %s1716_s11 = int_to_ptr.hbm [resolvable:$true] %s1715_s11 }
  0x1d   : > { %1858 = vmatmul.msk.f32.vlgmr.msra.gmra.mxu2 %vm505_vm1, %v415_v16  ;;  %s2044_s20 = sshra.s32 %s1716_s11, 4  ;;  %s2045_s20 = int_to_ptr.hbm [resolvable:$true] %s2044_s20 }
  0x1e   : > { %v501_v52 = vadd.f32 %v499_v49, %v497_v48  ;;  %p2051_p1 = scmp.lt.s32.totalorder %s2045_s20, %s3179_s8 }
  0x20   : > { %v504_v54 = vadd.f32 %v502_v53, %v501_v52 }
  0x22   : > { %v2273_v57 = vperm.slane %v504_v54, 0 }
  0x23   : > { %467 = vrot.lane.b32.xlu1 %v418_v2, %s2111_s14  ;;  %465 = vrot.lane.b32.xlu0 %v417_v3, %s2111_s14 }
  0x24   : > { %469 = vrot.lane.b32.xlu2 %v419_v5, %s2111_s14  ;;  %1852 = vmatmul.msk.f32.gmra.mxu0 %vm505_vm1, %v409_v0  ;;  %v648_v0 = vlaneseq }
  0x2b   : > { %471 = vrot.lane.b32.xlu1 %v420_v8, %s2111_s14  ;;  %439 = vrot.lane.b32.xlu0 %v420_v8, %s2110_s12 }
  0x2c   : > { %441 = vrot.lane.b32.xlu2 %v421_v10, %s2110_s12  ;;  %1853 = vmatmul.msk.f32.gmra.mxu0 %vm505_vm1, %v410_v4 }
  0x33   : > { %443 = vrot.lane.b32.xlu1 %v422_v12, %s2110_s12  ;;  %473 = vrot.lane.b32.xlu0 %v421_v10, %s2111_s14 }
  0x34   : > { %475 = vrot.lane.b32.xlu2 %v422_v12, %s2111_s14  ;;  %1854 = vmatmul.msk.f32.gmra.mxu0 %vm505_vm1, %v411_v7  ;;  %v2278_v7 = vand.u32 127, %v648_v0 }
  0x3b   : > { %445 = vrot.lane.b32.xlu1 %v423_v14, %s2110_s12 }
  0x3c   : > { %477 = vrot.lane.b32.xlu2 %v423_v14, %s2111_s14  ;;  %1855 = vmatmul.msk.f32.gmra.mxu0 %vm505_vm1, %v412_v9 }
  0x44   : > { %1856 = vmatmul.msk.f32.gmra.mxu0 %vm505_vm1, %v413_v11  ;;  %447 = vrot.lane.b32.xlu2 %v2264_v17, %s2110_s12  ;;  %s1699_s12 = scalar_lea.sflag [#allocation3], %s375_s19 }
  0x4c   : > { %1857 = vmatmul.msk.f32.gmra.mxu0 %vm505_vm1, %v414_v13 }
  0x76   : > { %v438_v18 = vpop.permute.xlu2 %437 }
  0x77   : > { %v459_v28 = vadd.f32 %v438_v18, %v419_v5 }
  0x7e   : > { %v470_v21 = vpop.permute.xlu2 %469 }
  0x7f   : > { %v491_v30 = vadd.f32 %v470_v21, %v459_v28 }
  0x86   : > { %v442_v29 = vpop.permute.xlu2 %441 }
  0x87   : > { %v461_v35 = vadd.f32 %v442_v29, %v421_v10 }
  0x8d   : > { %v436_v19 = vpop.permute.xlu1 %435  ;;  %v434_v20 = vpop.permute.xlu0 %433 }
  0x8e   : > { %v458_v22 = vadd.f32 %v436_v19, %v418_v2  ;;  %v457_v23 = vadd.f32 %v434_v20, %v417_v3  ;;  %v476_v36 = vpop.permute.xlu2 %475 }
  0x95   : > { %v468_v24 = vpop.permute.xlu1 %467  ;;  %v466_v25 = vpop.permute.xlu0 %465 }
  0x96   : > { %v490_v26 = vadd.f32 %v468_v24, %v458_v22  ;;  %v489_v27 = vadd.f32 %v466_v25, %v457_v23  ;;  %v478_v43 = vpop.permute.xlu2 %477 }
  0x98   : > { %582 = vperm.xlu1 %1962, %v490_v26   ;;  %577 = vperm.xlu0 %1961, %v489_v27  }
  0x99   : > { %v551_v46 = vpop.f32.mrf.mxu0 }
  0x9a   : > { %v624_v60 = vmul.f32 2.0, %v551_v46 }
  0x9d   : > { %v472_v31 = vpop.permute.xlu1 %471  ;;  %v440_v32 = vpop.permute.xlu0 %439 }
  0x9e   : > { %v460_v33 = vadd.f32 %v440_v32, %v420_v8  ;;  %v448_v51 = vpop.permute.xlu2 %447 }
  0x9f   : > { %v464_v8 = vadd.f32 %v448_v51, %v2264_v17 }
  0xa0   : > { %v492_v34 = vadd.f32 %v472_v31, %v460_v33  ;;  %479 = vrot.lane.b32.xlu0 %v2264_v17, %s2111_s14  ;;  %587 = vperm.xlu1 %1962, %v491_v30   ;;  %s1842_s14 = sshll.u32 %s375_s19, 6 }
  0xa1   : > { %v554_v47 = vpop.f32.mrf.mxu0  ;;  %s3122_s16 = scalar_lea.vmem [#allocation2], %s1842_s14 }
  0xa2   : > { %592 = vperm.xlu2 %1963, %v492_v34   ;;  %v625_v61 = vmul.f32 2.0, %v554_v47 }
  0xa5   : > { %v444_v37 = vpop.permute.xlu1 %443  ;;  %v474_v38 = vpop.permute.xlu0 %473 }
  0xa6   : > { %v462_v39 = vadd.f32 %v444_v37, %v422_v12  ;;  %v493_v40 = vadd.f32 %v474_v38, %v461_v35 }
  0xa8   : > { %v494_v41 = vadd.f32 %v476_v36, %v462_v39  ;;  %597 = vperm.xlu0 %1961, %v493_v40  }
  0xa9   : > { %v557_v50 = vpop.f32.mrf.mxu0 }
  0xaa   : > { %602 = vperm.xlu1 %1962, %v494_v41   ;;  %v626_v41 = vmul.f32 2.0, %v557_v50 }
  0xad   : > { %v446_v42 = vpop.permute.xlu1 %445 }
  0xae   : > { %v463_v44 = vadd.f32 %v446_v42, %v423_v14 }
  0xb0   : > { %v495_v45 = vadd.f32 %v478_v43, %v463_v44 }
  0xb1   : > { %v560_v55 = vpop.f32.mrf.mxu0 }
  0xb2   : > { %607 = vperm.xlu2 %1963, %v495_v45   ;;  %v627_v58 = vmul.f32 2.0, %v560_v55 }
  0xb9   : > { %v563_v6 = vpop.f32.mrf.mxu0 }
  0xba   : > { %v628_v24 = vmul.f32 2.0, %v563_v6 }
  0xc1   : > { %v566_v23 = vpop.f32.mrf.mxu0 }
  0xc2   : > { %v629_v27 = vmul.f32 2.0, %v566_v23 }
  0xc9   : > { %v569_v44 = vpop.f32.mrf.mxu0 }
  0xca   : > { %v630_v47 = vmul.f32 2.0, %v569_v44 }
  0xfc   : > { %v593_v56 = vpop.permute.xlu2 %592 }
  0xfd   : > { %v619_v59 = vadd.f32 %v2273_v57, %v593_v56 }
  0xff   : > { %v635_v3 = vsub.f32 %v619_v59, %v627_v58  ;;  %v572_v58 = vpop.f32.mrf.mxu2 }
 0x100   : > { %v631_v59 = vmul.f32 2.0, %v572_v58 }
 0x101   : > { %v643_v11 = vmax.f32 %v635_v3, 1e-30 }
 0x103   : > { %v661_v16 = vand.u32 4294967280, %v643_v11 }
 0x105   : > { %v2292_v22 = vor.u32 %v661_v16, %v2278_v7 }
 0x107   : > { %v692_v28 = vsel %vm682_vm2, %v2292_v22, inf }
 0x10a   : > { %v583_v62 = vpop.permute.xlu1 %582  ;;  %v578_v63 = vpop.permute.xlu0 %577 }
 0x10b   : > { %v617_v1 = vadd.f32 %v2273_v57, %v583_v62  ;;  %v616_v2 = vadd.f32 %v2273_v57, %v578_v63 }
 0x10c   : > { %v608_v45 = vpop.permute.xlu2 %607 }
 0x10d   : > { %v633_v4 = vsub.f32 %v617_v1, %v625_v61  ;;  %v632_v5 = vsub.f32 %v616_v2, %v624_v60  ;;  %v622_v48 = vadd.f32 %v2273_v57, %v608_v45 }
 0x10f   : > { %v641_v9 = vmax.f32 %v633_v4, 1e-30  ;;  %v640_v10 = vmax.f32 %v632_v5, 1e-30  ;;  %v638_v51 = vsub.f32 %v622_v48, %v630_v47 }
 0x111   : > { %v659_v12 = vand.u32 4294967280, %v641_v9  ;;  %v658_v13 = vand.u32 4294967280, %v640_v10  ;;  %v646_v52 = vmax.f32 %v638_v51, 1e-30 }
 0x112   : > { %v480_v14 = vpop.permute.xlu0 %479  ;;  %v588_v15 = vpop.permute.xlu1 %587 }
 0x113   : > { %v496_v18 = vadd.f32 %v480_v14, %v464_v8  ;;  %v2282_v19 = vor.u32 %v659_v12, %v2278_v7  ;;  %v2285_v20 = vor.u32 %v658_v13, %v2278_v7  ;;  %v618_v42 = vadd.f32 %v2273_v57, %v588_v15 }
 0x114   : > { %v664_v54 = vand.u32 4294967280, %v646_v52 }
 0x115   : > { %612 = vperm.xlu1 %1962, %v496_v18   ;;  %v686_v17 = vsel %vm682_vm2, %v2282_v19, inf  ;;  %v683_v21 = vsel %vm682_vm2, %v2285_v20, inf  ;;  %v634_v43 = vsub.f32 %v618_v42, %v626_v41 }
 0x116   : > { %687 = vmin.xlane.f32.xlu2 %v686_v17  ;;  %684 = vmin.xlane.f32.xlu0 %v683_v21  ;;  %v2316_v55 = vor.u32 %v664_v54, %v2278_v7 }
 0x117   : > { %v642_v46 = vmax.f32 %v634_v43, 1e-30 }
 0x118   : > { %v701_v56 = vsel %vm682_vm2, %v2316_v55, inf }
 0x119   : > { %v660_v49 = vand.u32 4294967280, %v642_v46 }
 0x11a   : > { %v598_v25 = vpop.permute.xlu0 %597 }
 0x11b   : > { %v620_v26 = vadd.f32 %v2273_v57, %v598_v25  ;;  %v2311_v53 = vor.u32 %v660_v49, %v2278_v7 }
 0x11c   : > { %v603_v29 = vpop.permute.xlu1 %602 }
 0x11d   : > { %v636_v30 = vsub.f32 %v620_v26, %v628_v24  ;;  %v621_v31 = vadd.f32 %v2273_v57, %v603_v29  ;;  %v689_v50 = vsel %vm682_vm2, %v2311_v53, inf }
 0x11e   : > { %693 = vmin.xlane.f32.xlu2 %v692_v28 }
 0x11f   : > { %v644_v32 = vmax.f32 %v636_v30, 1e-30  ;;  %v637_v33 = vsub.f32 %v621_v31, %v629_v27 }
 0x121   : > { %v662_v34 = vand.u32 4294967280, %v644_v32  ;;  %v645_v35 = vmax.f32 %v637_v33, 1e-30 }
 0x123   : > { %v663_v36 = vand.u32 4294967280, %v645_v35  ;;  %v2299_v37 = vor.u32 %v662_v34, %v2278_v7 }
 0x125   : > { %v695_v38 = vsel %vm682_vm2, %v2299_v37, inf  ;;  %v2304_v39 = vor.u32 %v663_v36, %v2278_v7 }
 0x126   : > { %696 = vmin.xlane.f32.xlu0 %v695_v38 }
 0x127   : > { %v698_v40 = vsel %vm682_vm2, %v2304_v39, inf }
 0x128   : > { %699 = vmin.xlane.f32.xlu2 %v698_v40 }
 0x13f   : > { %690 = vmin.xlane.f32.xlu1 %v689_v50 }
 0x147   : > { %702 = vmin.xlane.f32.xlu1 %v701_v56 }
 0x187   : > { %v613_v60 = vpop.permute.xlu1 %612 }
 0x188   : > { %v623_v61 = vadd.f32 %v2273_v57, %v613_v60 }
 0x189   : > { %v2321_v62 = vpop.xlane.xlu2 %687  ;;  %v2323_v63 = vpop.xlane.xlu0 %684 }
 0x18a   : > { %v639_v0 = vsub.f32 %v623_v61, %v631_v59  ;;  %vm708_vm3 = vcmp.eq.f32.partialorder %v2282_v19, %v2321_v62  ;;  %vm707_vm4 = vcmp.eq.f32.partialorder %v2285_v20, %v2323_v63  ;;  %v724_v26 = vand.u32 4294967280, %v2321_v62 }
 0x18b   : > { %v2333_v1 = vsel %vm708_vm3, inf, %v2282_v19  ;;  %v2339_v57 = vsel %vm707_vm4, inf, %v2285_v20  ;;  %v723_v27 = vand.u32 4294967280, %v2323_v63 }
 0x18c   : > { %v647_v2 = vmax.f32 %v639_v0, 1e-30  ;;  %v902_v3 = vsel %vm682_vm2, %v2333_v1, inf  ;;  %v899_v4 = vsel %vm682_vm2, %v2339_v57, inf  ;;  %v740_v28 = vmax.f32 %v724_v26, 1e-10 }
 0x18d   : > { %903 = vmin.xlane.f32.xlu2 %v902_v3  ;;  %900 = vmin.xlane.f32.xlu0 %v899_v4  ;;  %v739_v29 = vmax.f32 %v723_v27, 1e-10 }
 0x18e   : > { %v665_v5 = vand.u32 4294967280, %v647_v2  ;;  %1966 = vrcp.f32 %v740_v28  ;;  %vm767_vm10 = vweird.f32 %v740_v28  ;;  %v771_v42 = vand.u32 2147483647, %v740_v28 }
 0x18f   : > { %1968 = vrcp.f32 %v739_v29  ;;  %v773_v43 = vand.u32 2147483648, %v740_v28  ;;  %v756_v54 = vand.u32 2147483647, %v739_v29  ;;  %v758_v2 = vand.u32 2147483648, %v739_v29 }
 0x190   : > { %v2346_v6 = vor.u32 %v665_v5, %v2278_v7  ;;  %vm2473_vm0 = vcmp.eq.f32.partialorder %v771_v42, 8.507059e+37  ;;  %vm752_vm1 = vweird.f32 %v739_v29 }
 0x191   : > { %v2348_v8 = vpop.xlane.xlu2 %693 }
 0x192   : > { %vm710_vm5 = vcmp.eq.f32.partialorder %v2292_v22, %v2348_v8  ;;  %v704_v11 = vsel %vm682_vm2, %v2346_v6, inf  ;;  %v726_v30 = vand.u32 4294967280, %v2348_v8 }
 0x193   : > { %v2356_v9 = vsel %vm710_vm5, inf, %v2292_v22 }
 0x194   : > { %v908_v10 = vsel %vm682_vm2, %v2356_v9, inf  ;;  %v2413_v31 = vmax.f32 %v726_v30, 1e-10  ;;  %v2415_v32 = vpop.eup %1966 }
 0x195   : > { %909 = vmin.xlane.f32.xlu2 %v908_v10  ;;  %705 = vmin.xlane.f32.xlu0 %v704_v11  ;;  %v2417_v33 = vpop.eup %1968  ;;  %v763_v34 = vmul.f32 %v2415_v32, %v740_v28  ;;  %vm768_vm13 = vweird.f32 %v2415_v32  ;;  %v774_v11 = vor.u32 1.1754944e-38, %v773_v43 }
 0x196   : > { %1970 = vrcp.f32 %v2413_v31  ;;  %v748_v35 = vmul.f32 %v2417_v33, %v739_v29  ;;  %vm2465_vm14 = vmor %vm767_vm10, %vm768_vm13  ;;  %vm753_vm15 = vweird.f32 %v2417_v33  ;;  %vm797_vm13 = vweird.f32 %v2413_v31 }
 0x197   : > { %v764_v36 = vsub.f32 1.0, %v763_v34  ;;  %vm2484_vm10 = vmor %vm752_vm1, %vm753_vm15  ;;  %v803_v34 = vand.u32 2147483648, %v2413_v31 }
 0x198   : > { %v749_v38 = vsub.f32 1.0, %v748_v35 }
 0x199   : > { %v2362_v7 = vpop.xlane.xlu0 %696  ;;  %v765_v44 = vmul.f32 %v2415_v32, %v764_v36 }
 0x19a   : > { %vm711_vm6 = vcmp.eq.f32.partialorder %v2299_v37, %v2362_v7  ;;  %v727_v40 = vand.u32 4294967280, %v2362_v7  ;;  %v750_v45 = vmul.f32 %v2417_v33, %v749_v38 }
 0x19b   : > { %v2370_v12 = vsel %vm711_vm6, inf, %v2299_v37  ;;  %v2378_v15 = vpop.xlane.xlu2 %699  ;;  %v766_v0 = vadd.f32 %v2415_v32, %v765_v44 }
 0x19c   : > { %v911_v13 = vsel %vm682_vm2, %v2370_v12, inf  ;;  %vm3182_vm8 = vcmp.eq.f32.partialorder %v2304_v39, %v2378_v15  ;;  %v2423_v41 = vpop.eup %1970  ;;  %v2429_v47 = vmax.f32 %v727_v40, 1e-10  ;;  %v751_v5 = vadd.f32 %v2417_v33, %v750_v45 }
 0x19d   : > { %912 = vmin.xlane.f32.xlu0 %v911_v13  ;;  %v2396_v21 = vsel %vm3182_vm8, inf, %v2304_v39  ;;  %v793_v46 = vmul.f32 %v2423_v41, %v2413_v31  ;;  %vm798_vm1 = vweird.f32 %v2423_v41 }
 0x19e   : > { %v914_v24 = vsel %vm682_vm2, %v2396_v21, inf  ;;  %1972 = vrcp.f32 %v2429_v47  ;;  %v755_v29 = vsel %vm2484_vm10, %v2417_v33, %v751_v5  ;;  %v816_v8 = vand.u32 2147483647, %v2429_v47 }
 0x19f   : > { %v794_v3 = vsub.f32 1.0, %v793_v46 }
 0x1a1   : > { %v795_v26 = vmul.f32 %v2423_v41, %v794_v3 }
 0x1a3   : > { %v2533_v46 = vadd.f32 %v2423_v41, %v795_v26 }
 0x1b2   : > { %v2374_v14 = vpop.xlane.xlu1 %690 }
 0x1b3   : > { %vm3183_vm7 = vcmp.eq.f32.partialorder %v2311_v53, %v2374_v14 }
 0x1b4   : > { %v2384_v16 = vsel %vm3183_vm7, inf, %v2311_v53 }
 0x1b5   : > { %v905_v18 = vsel %vm682_vm2, %v2384_v16, inf }
 0x1b6   : > { %906 = vmin.xlane.f32.xlu1 %v905_v18  ;;  %v770_v18 = vsel %vm2465_vm14, %v2415_v32, %v766_v0  ;;  %v2502_v32 = vpop.eup %1972 }
 0x1b7   : > { %v2520_v38 = vsel %vm2473_vm0, %v774_v11, %v770_v18  ;;  %vm2541_vm0 = vmor %vm797_vm13, %vm798_vm1 }
 0x1b8   : > { %v868_v0 = vsel %vm708_vm3, %v2520_v38, 0.0  ;;  %v800_v11 = vsel %vm2541_vm0, %v2423_v41, %v2533_v46 }
 0x1ba   : > { %v2390_v17 = vpop.xlane.xlu1 %702 }
 0x1bb   : > { %vm3180_vm9 = vcmp.eq.f32.partialorder %v2316_v55, %v2390_v17  ;;  %v729_v22 = vand.u32 4294967280, %v2390_v17 }
 0x1bc   : > { %v2404_v23 = vsel %vm3180_vm9, inf, %v2316_v55  ;;  %vm2477_vm9 = vcmp.eq.f32.partialorder %v756_v54, 8.507059e+37 }
 0x1bd   : > { %v917_v25 = vsel %vm682_vm2, %v2404_v23, inf }
 0x1be   : > { %915 = vmin.xlane.f32.xlu1 %v914_v24  ;;  %918 = vmin.xlane.f32.xlu0 %v917_v25  ;;  %v759_v25 = vor.u32 1.1754944e-38, %v758_v2  ;;  %v804_v2 = vor.u32 1.1754944e-38, %v803_v34 }
 0x1c0   : > { %v2530_v45 = vsel %vm2477_vm9, %v759_v25, %v755_v29 }
 0x200   : > { %v2431_v48 = vpop.xlane.xlu2 %903  ;;  %v2433_v49 = vpop.xlane.xlu0 %900 }
 0x201   : > { %vm924_vm11 = vcmp.eq.f32.partialorder %v2333_v1, %v2431_v48  ;;  %v940_v51 = vand.u32 4294967280, %v2431_v48  ;;  %vm923_vm12 = vcmp.eq.f32.partialorder %v2339_v57, %v2433_v49  ;;  %v939_v52 = vand.u32 4294967280, %v2433_v49 }
 0x202   : > { %v2446_v50 = vsel %vm924_vm11, inf, %v2333_v1  ;;  %v2452_v56 = vsel %vm923_vm12, inf, %v2339_v57 }
 0x203   : > { %v2454_v58 = vmax.f32 %v940_v51, 1e-10  ;;  %v2456_v59 = vmax.f32 %v939_v52, 1e-10  ;;  %v1118_v60 = vsel %vm682_vm2, %v2446_v50, inf  ;;  %v1115_v61 = vsel %vm682_vm2, %v2452_v56, inf }
 0x204   : > { %1119 = vmin.xlane.f32.xlu1 %v1118_v60  ;;  %1116 = vmin.xlane.f32.xlu2 %v1115_v61  ;;  %v801_v51 = vand.u32 2147483647, %v2413_v31  ;;  %v808_v60 = vmul.f32 %v2502_v32, %v2429_v47  ;;  %v867_v31 = vsel %vm707_vm4, %v2530_v45, 0.0 }
 0x205   : > { %1974 = vrcp.f32 %v2454_v58  ;;  %v987_v4 = vand.u32 2147483647, %v2454_v58  ;;  %v989_v5 = vand.u32 2147483648, %v2454_v58  ;;  %v974_v13 = vand.u32 2147483648, %v2456_v59 }
 0x206   : > { %1976 = vrcp.f32 %v2456_v59  ;;  %vm2563_vm9 = vcmp.eq.f32.partialorder %v801_v51, 8.507059e+37  ;;  %v809_v20 = vsub.f32 1.0, %v808_v60  ;;  %v972_v18 = vand.u32 2147483647, %v2456_v59 }
 0x207   : > { %vm983_vm10 = vweird.f32 %v2454_v58  ;;  %vm968_vm13 = vweird.f32 %v2456_v59  ;;  %vm988_vm0 = vcmp.eq.f32.partialorder %v987_v4, 8.507059e+37  ;;  %v990_v29 = vor.u32 1.1754944e-38, %v989_v5 }
 0x208   : > { %v2490_v27 = vpop.xlane.xlu2 %909  ;;  %v2492_v28 = vpop.xlane.xlu0 %705  ;;  %vm973_vm7 = vcmp.eq.f32.partialorder %v972_v18, 8.507059e+37  ;;  %v2608_v57 = vsel %vm2563_vm9, %v804_v2, %v800_v11  ;;  %v810_v49 = vmul.f32 %v2502_v32, %v809_v20  ;;  %vm813_vm9 = vweird.f32 %v2502_v32 }
 0x209   : > { %vm926_vm14 = vcmp.eq.f32.partialorder %v2356_v9, %v2490_v27  ;;  %v942_v30 = vand.u32 4294967280, %v2490_v27  ;;  %vm3181_vm15 = vcmp.eq.f32.partialorder %v2346_v6, %v2492_v28 }
 0x20a   : > { %v2510_v35 = vsel %vm926_vm14, inf, %v2356_v9  ;;  %v2516_v33 = vsel %vm3181_vm15, inf, %v2346_v6  ;;  %v811_v11 = vadd.f32 %v2502_v32, %v810_v49 }
 0x20b   : > { %v1975_v36 = vpop.eup %1974  ;;  %v2522_v40 = vmax.f32 %v942_v30, 1e-10  ;;  %v1124_v42 = vsel %vm682_vm2, %v2510_v35, inf  ;;  %v920_v43 = vsel %vm682_vm2, %v2516_v33, inf }
 0x20c   : > { %v1977_v44 = vpop.eup %1976  ;;  %v979_v52 = vmul.f32 %v1975_v36, %v2454_v58  ;;  %1125 = vmin.xlane.f32.xlu1 %v1124_v42  ;;  %921 = vmin.xlane.f32.xlu2 %v920_v43  ;;  %vm984_vm3 = vweird.f32 %v1975_v36  ;;  %v975_v42 = vor.u32 1.1754944e-38, %v974_v13  ;;  %v725_v58 = vand.u32 4294967280, %v2374_v14 }
 0x20d   : > { %v964_v61 = vmul.f32 %v1977_v44, %v2456_v59  ;;  %1978 = vrcp.f32 %v2522_v40  ;;  %vm969_vm4 = vweird.f32 %v1977_v44  ;;  %vm985_vm1 = vmor %vm983_vm10, %vm984_vm3  ;;  %v1019_v1 = vand.u32 2147483648, %v2522_v40 }
 0x20e   : > { %v980_v3 = vsub.f32 1.0, %v979_v52  ;;  %vm970_vm8 = vmor %vm968_vm13, %vm969_vm4  ;;  %vm817_vm4 = vcmp.eq.f32.partialorder %v816_v8, 8.507059e+37 }
 0x20f   : > { %v965_v10 = vsub.f32 1.0, %v964_v61 }
 0x210   : > { %v981_v62 = vmul.f32 %v1975_v36, %v980_v3  ;;  %v2569_v24 = vpop.xlane.xlu0 %912  ;;  %v1017_v3 = vand.u32 2147483647, %v2522_v40 }
 0x211   : > { %v966_v63 = vmul.f32 %v1977_v44, %v965_v10  ;;  %v943_v41 = vand.u32 4294967280, %v2569_v24  ;;  %vm927_vm15 = vcmp.eq.f32.partialorder %v2370_v12, %v2569_v24 }
 0x212   : > { %v982_v25 = vadd.f32 %v1975_v36, %v981_v62  ;;  %v2611_v62 = vmax.f32 %v725_v58, 1e-10 }
 0x213   : > { %v1979_v26 = vpop.eup %1978  ;;  %v967_v30 = vadd.f32 %v1977_v44, %v966_v63  ;;  %v959_v46 = vmax.f32 %v943_v41, 1e-10  ;;  %v818_v41 = vand.u32 2147483648, %v2429_v47 }
 0x214   : > { %v986_v34 = vsel %vm985_vm1, %v1975_v36, %v982_v25  ;;  %v1009_v43 = vmul.f32 %v1979_v26, %v2522_v40  ;;  %v2590_v36 = vsel %vm927_vm15, inf, %v2370_v12 }
 0x215   : > { %v2578_v51 = vsel %vm988_vm0, %v990_v29, %v986_v34  ;;  %v971_v59 = vsel %vm970_vm8, %v1977_v44, %v967_v30  ;;  %1980 = vrcp.f32 %v959_v46  ;;  %v1127_v5 = vsel %vm682_vm2, %v2590_v36, inf }
 0x216   : > { %v1084_v52 = vsel %vm924_vm11, %v2578_v51, 0.0  ;;  %v2584_v54 = vsel %vm973_vm7, %v975_v42, %v971_v59  ;;  %v1010_v60 = vsub.f32 1.0, %v1009_v43  ;;  %vm1014_vm7 = vweird.f32 %v1979_v26  ;;  %1128 = vmin.xlane.f32.xlu2 %v1127_v5 }
 0x217   : > { %v2592_v61 = vadd.f32 %v1084_v52, %v868_v0  ;;  %v1083_v44 = vsel %vm923_vm12, %v2584_v54, 0.0  ;;  %v728_v0 = vand.u32 4294967280, %v2378_v15  ;;  %vm1013_vm8 = vweird.f32 %v2522_v40 }
 0x218   : > { %v2600_v48 = vadd.f32 %v1083_v44, %v867_v31  ;;  %v1011_v4 = vmul.f32 %v1979_v26, %v1010_v60  ;;  %vm1015_vm11 = vmor %vm1013_vm8, %vm1014_vm7  ;;  %v1020_v31 = vor.u32 1.1754944e-38, %v1019_v1  ;;  %vm1018_vm12 = vcmp.eq.f32.partialorder %v1017_v3, 8.507059e+37 }
 0x219   : > { %v870_v40 = vsel %vm710_vm5, %v2608_v57, 0.0  ;;  %v2619_v25 = vmax.f32 %v728_v0, 1e-10  ;;  %1982 = vrcp.f32 %v2611_v62  ;;  %vm812_vm5 = vweird.f32 %v2429_v47 }
 0x21a   : > { %v1012_v10 = vadd.f32 %v1979_v26, %v1011_v4  ;;  %vm814_vm3 = vmor %vm812_vm5, %vm813_vm9  ;;  %v1034_v9 = vand.u32 2147483648, %v959_v46  ;;  %v1032_v30 = vand.u32 2147483647, %v959_v46  ;;  %v819_v34 = vor.u32 1.1754944e-38, %v818_v41 }
 0x21b   : > { %v1981_v18 = vpop.eup %1980  ;;  %1984 = vrcp.f32 %v2619_v25  ;;  %v815_v27 = vsel %vm814_vm3, %v2502_v32, %v811_v11  ;;  %v2636_v42 = vmax.f32 %v729_v22, 1e-10  ;;  %vm1028_vm10 = vweird.f32 %v959_v46 }
 0x21c   : > { %v1016_v13 = vsel %vm1015_vm11, %v1979_v26, %v1012_v10  ;;  %v1024_v20 = vmul.f32 %v1981_v18, %v959_v46  ;;  %v2640_v59 = vsel %vm817_vm4, %v819_v34, %v815_v27  ;;  %v1035_v47 = vor.u32 1.1754944e-38, %v1034_v9 }
 0x21d   : > { %v2613_v63 = vsel %vm1018_vm12, %v1020_v31, %v1016_v13  ;;  %vm1033_vm1 = vcmp.eq.f32.partialorder %v1032_v30, 8.507059e+37  ;;  %1986 = vrcp.f32 %v2636_v42  ;;  %v871_v44 = vsel %vm711_vm6, %v2640_v59, 0.0 }
 0x21e   : > { %v1086_v2 = vsel %vm926_vm14, %v2613_v63, 0.0  ;;  %v1025_v26 = vsub.f32 1.0, %v1024_v20  ;;  %vm1029_vm14 = vweird.f32 %v1981_v18  ;;  %vm782_vm6 = vweird.f32 %v2611_v62 }
 0x21f   : > { %v2627_v19 = vadd.f32 %v1086_v2, %v870_v40  ;;  %v2638_v58 = vpop.eup %1982  ;;  %vm1030_vm13 = vmor %vm1028_vm10, %vm1029_vm14  ;;  %v786_v13 = vand.u32 2147483647, %v2611_v62  ;;  %v788_v41 = vand.u32 2147483648, %v2611_v62  ;;  %vm827_vm12 = vweird.f32 %v2619_v25 }
 0x220   : > { %v1026_v29 = vmul.f32 %v1981_v18, %v1025_v26  ;;  %v778_v46 = vmul.f32 %v2638_v58, %v2611_v62  ;;  %vm783_vm8 = vweird.f32 %v2638_v58  ;;  %vm842_vm10 = vweird.f32 %v2636_v42 }
 0x221   : > { %v2642_v60 = vpop.eup %1984  ;;  %vm2724_vm11 = vmor %vm782_vm6, %vm783_vm8  ;;  %vm2733_vm5 = vcmp.eq.f32.partialorder %v786_v13, 8.507059e+37  ;;  %v789_v62 = vor.u32 1.1754944e-38, %v788_v41 }
 0x222   : > { %v1027_v43 = vadd.f32 %v1981_v18, %v1026_v29  ;;  %v823_v7 = vmul.f32 %v2642_v60, %v2619_v25  ;;  %v779_v0 = vsub.f32 1.0, %v778_v46  ;;  %vm828_vm9 = vweird.f32 %v2642_v60 }
 0x223   : > { %v2676_v10 = vpop.eup %1986  ;;  %vm2750_vm4 = vmor %vm827_vm12, %vm828_vm9 }
 0x224   : > { %v1031_v52 = vsel %vm1030_vm13, %v1981_v18, %v1027_v43  ;;  %v824_v49 = vsub.f32 1.0, %v823_v7  ;;  %v780_v31 = vmul.f32 %v2638_v58, %v779_v0  ;;  %v838_v18 = vmul.f32 %v2676_v10, %v2636_v42 }
 0x225   : > { %v2645_v32 = vsel %vm1033_vm1, %v1035_v47, %v1031_v52  ;;  %v831_v52 = vand.u32 2147483647, %v2619_v25  ;;  %vm843_vm1 = vweird.f32 %v2676_v10 }
 0x226   : > { %v1087_v3 = vsel %vm927_vm15, %v2645_v32, 0.0  ;;  %v781_v34 = vadd.f32 %v2638_v58, %v780_v31  ;;  %v825_v47 = vmul.f32 %v2642_v60, %v824_v49  ;;  %v839_v46 = vsub.f32 1.0, %v838_v18  ;;  %vm2777_vm12 = vmor %vm842_vm10, %vm843_vm1 }
 0x227   : > { %v2659_v4 = vadd.f32 %v1087_v3, %v871_v44  ;;  %v833_v3 = vand.u32 2147483648, %v2619_v25  ;;  %vm2743_vm14 = vcmp.eq.f32.partialorder %v831_v52, 8.507059e+37  ;;  %v848_v25 = vand.u32 2147483648, %v2636_v42 }
 0x228   : > { %v785_v0 = vsel %vm2724_vm11, %v2638_v58, %v781_v34  ;;  %v826_v18 = vadd.f32 %v2642_v60, %v825_v47  ;;  %v840_v13 = vmul.f32 %v2676_v10, %v839_v46  ;;  %v846_v58 = vand.u32 2147483647, %v2636_v42 }
 0x229   : > { %v2657_v1 = vpop.xlane.xlu1 %906  ;;  %v834_v47 = vor.u32 1.1754944e-38, %v833_v3  ;;  %vm3206_vm11 = vcmp.eq.f32.partialorder %v2311_v53, %v2374_v14 }
 0x22a   : > { %vm925_vm0 = vcmp.eq.f32.partialorder %v2384_v16, %v2657_v1  ;;  %v941_v5 = vand.u32 4294967280, %v2657_v1  ;;  %v841_v46 = vadd.f32 %v2676_v10, %v840_v13  ;;  %vm2781_vm9 = vcmp.eq.f32.partialorder %v846_v58, 8.507059e+37 }
 0x22b   : > { %v2668_v37 = vsel %vm925_vm0, inf, %v2384_v16 }
 0x22c   : > { %v2672_v12 = vmax.f32 %v941_v5, 1e-10  ;;  %v1121_v24 = vsel %vm682_vm2, %v2668_v37, inf  ;;  %v845_v13 = vsel %vm2777_vm12, %v2676_v10, %v841_v46 }
 0x22d   : > { %1122 = vmin.xlane.f32.xlu0 %v1121_v24 }
 0x22e   : > { %1988 = vrcp.f32 %v2672_v12  ;;  %v1004_v24 = vand.u32 2147483648, %v2672_v12  ;;  %v1002_v31 = vand.u32 2147483647, %v2672_v12  ;;  %vm998_vm13 = vweird.f32 %v2672_v12 }
 0x230   : > { %v1005_v34 = vor.u32 1.1754944e-38, %v1004_v24  ;;  %vm1003_vm8 = vcmp.eq.f32.partialorder %v1002_v31, 8.507059e+37 }
 0x231   : > { %v2684_v40 = vpop.xlane.xlu1 %915  ;;  %v2686_v2 = vpop.xlane.xlu0 %918 }
 0x232   : > { %vm928_vm15 = vcmp.eq.f32.partialorder %v2396_v21, %v2684_v40  ;;  %v944_v11 = vand.u32 4294967280, %v2684_v40  ;;  %vm929_vm7 = vcmp.eq.f32.partialorder %v2404_v23, %v2686_v2  ;;  %v945_v20 = vand.u32 4294967280, %v2686_v2  ;;  %v1334_v40 = vld [vmem:[%s406_s26 + $0x8] sm:$0xff] }
 0x233   : > { %v2700_v22 = vsel %vm928_vm15, inf, %v2396_v21  ;;  %v2706_v8 = vsel %vm929_vm7, inf, %v2404_v23  ;;  %1373 = vmatpush.msra.mxu1 %v1334_v40 }
 0x234   : > { %v1989_v26 = vpop.eup %1988  ;;  %v2708_v9 = vmax.f32 %v944_v11, 1e-10  ;;  %v2710_v27 = vmax.f32 %v945_v20, 1e-10  ;;  %v1130_v29 = vsel %vm682_vm2, %v2700_v22, inf  ;;  %v1133_v30 = vsel %vm682_vm2, %v2706_v8, inf }
 0x235   : > { %v994_v43 = vmul.f32 %v1989_v26, %v2672_v12  ;;  %1131 = vmin.xlane.f32.xlu0 %v1130_v29  ;;  %1134 = vmin.xlane.f32.xlu1 %v1133_v30  ;;  %vm999_vm3 = vweird.f32 %v1989_v26  ;;  %v2759_v30 = vsel %vm2733_vm5, %v789_v62, %v785_v0  ;;  %v830_v12 = vsel %vm2750_vm4, %v2642_v60, %v826_v18 }
 0x236   : > { %1990 = vrcp.f32 %v2708_v9  ;;  %vm1000_vm6 = vmor %vm998_vm13, %vm999_vm3  ;;  %v869_v62 = vsel %vm3206_vm11, %v2759_v30, 0.0  ;;  %v849_v0 = vor.u32 1.1754944e-38, %v848_v25  ;;  %v1049_v53 = vand.u32 2147483648, %v2708_v9 }
 0x237   : > { %v995_v5 = vsub.f32 1.0, %v994_v43  ;;  %1992 = vrcp.f32 %v2710_v27  ;;  %v1047_v31 = vand.u32 2147483647, %v2708_v9  ;;  %v1064_v18 = vand.u32 2147483648, %v2710_v27 }
 0x238   : > { %v1062_v16 = vand.u32 2147483647, %v2710_v27  ;;  %v2801_v58 = vsel %vm2743_vm14, %v834_v47, %v830_v12  ;;  %vm1058_vm10 = vweird.f32 %v2710_v27 }
 0x239   : > { %v996_v49 = vmul.f32 %v1989_v26, %v995_v5  ;;  %vm1048_vm13 = vcmp.eq.f32.partialorder %v1047_v31, 8.507059e+37 }
 0x23a   : > { %vm1063_vm14 = vcmp.eq.f32.partialorder %v1062_v16, 8.507059e+37 }
 0x23b   : > { %v997_v41 = vadd.f32 %v1989_v26, %v996_v49 }
 0x23c   : > { %v1991_v29 = vpop.eup %1990 }
 0x23d   : > { %v1993_v43 = vpop.eup %1992  ;;  %v1001_v52 = vsel %vm1000_vm6, %v1989_v26, %v997_v41  ;;  %v1039_v44 = vmul.f32 %v1991_v29, %v2708_v9  ;;  %vm1044_vm5 = vweird.f32 %v1991_v29  ;;  %v1050_v41 = vor.u32 1.1754944e-38, %v1049_v53  ;;  %v1333_v26 = vld [vmem:[%s406_s26] sm:$0xff]  ;;  %v1326_v53 = vld [vmem:[%s2839_s23 + $0x8] sm:$0xff]  ;;  %s1713_s26 = sshll.u32 %s3122_s16, 4  ;;  %s1714_s26 = int_to_ptr.vmem [resolvable:$true] %s1713_s26 }
 0x23e   : > { %v2768_v5 = vsel %vm1003_vm8, %v1005_v34, %v1001_v52  ;;  %v1054_v7 = vmul.f32 %v1993_v43, %v2710_v27  ;;  %vm1059_vm3 = vweird.f32 %v1993_v43  ;;  %v2806_v34 = vsel %vm2781_vm9, %v849_v0, %v845_v13  ;;  %1374 = vmatpush.msra.mxu1 %v1333_v26 }
 0x23f   : > { %v1085_v60 = vsel %vm925_vm0, %v2768_v5, 0.0  ;;  %v1040_v24 = vsub.f32 1.0, %v1039_v44  ;;  %vm1043_vm0 = vweird.f32 %v2708_v9  ;;  %vm1060_vm1 = vmor %vm1058_vm10, %vm1059_vm3  ;;  %v1065_v52 = vor.u32 1.1754944e-38, %v1064_v18 }
 0x240   : > { %v2789_v49 = vadd.f32 %v1085_v60, %v869_v62  ;;  %v1055_v14 = vsub.f32 1.0, %v1054_v7  ;;  %vm1045_vm4 = vmor %vm1043_vm0, %vm1044_vm5  ;;  %vm3211_vm6 = vcmp.eq.f32.partialorder %v2304_v39, %v2378_v15  ;;  %vm3212_vm8 = vcmp.eq.f32.partialorder %v2316_v55, %v2390_v17  ;;  %v1323_v55 = vld [vmem:[%s3175_s4] sm:$0xff] }
 0x241   : > { %v1041_v42 = vmul.f32 %v1991_v29, %v1040_v24  ;;  %v872_v47 = vsel %vm3211_vm6, %v2801_v58, 0.0  ;;  %v873_v44 = vsel %vm3212_vm8, %v2806_v34, 0.0  ;;  %1568 = vmatpush.msrb.mxu2 %v1323_v55  ;;  %v1325_v17 = vld [vmem:[%s2839_s23] sm:$0xff] }
 0x242   : > { %v1056_v20 = vmul.f32 %v1993_v43, %v1055_v14 }
 0x243   : > { %v1042_v1 = vadd.f32 %v1991_v29, %v1041_v42 }
 0x244   : > { %v1057_v25 = vadd.f32 %v1993_v43, %v1056_v20 }
 0x245   : > { %v1046_v10 = vsel %vm1045_vm4, %v1991_v29, %v1042_v1 }
 0x246   : > { %v2808_v9 = vsel %vm1048_vm13, %v1050_v41, %v1046_v10  ;;  %v1061_v11 = vsel %vm1060_vm1, %v1993_v43, %v1057_v25  ;;  %v730_v43 = vand.u32 4294967280, %v2492_v28 }
 0x247   : > { %v1088_v27 = vsel %vm928_vm15, %v2808_v9, 0.0  ;;  %v2818_v29 = vsel %vm1063_vm14, %v1065_v52, %v1061_v11  ;;  %vm1528_vm15 = vcmask 64512  }
 0x248   : > { %v2824_v12 = vadd.f32 %v1088_v27, %v872_v47  ;;  %v1089_v39 = vsel %vm929_vm7, %v2818_v29, 0.0  ;;  %v746_v21 = vmax.f32 %v730_v43, 1e-10  ;;  %1867 = vmatmul.msk.f32.vlgmr.msrb.gmra.mxu2 %vm1528_vm15, %v1325_v17 }
 0x249   : > { %v2830_v15 = vadd.f32 %v1089_v39, %v873_v44 }
 0x24a   : > { %1994 = vrcp.f32 %v746_v21  ;;  %v863_v1 = vand.u32 2147483648, %v746_v21  ;;  %vm857_vm11 = vweird.f32 %v746_v21  ;;  %v861_v47 = vand.u32 2147483647, %v746_v21 }
 0x24c   : > { %v864_v43 = vor.u32 1.1754944e-38, %v863_v1  ;;  %vm2894_vm3 = vcmp.eq.f32.partialorder %v861_v47, 8.507059e+37 }
 0x250   : > { %v2848_v23 = vpop.eup %1994  ;;  %1868 = vmatmul.msk.f32.gmra.mxu2 %vm1528_vm15, %v1326_v53  ;;  %v1102_v53 = vadd.f32 %v2613_v63, %v2608_v57 }
 0x251   : > { %v853_v3 = vmul.f32 %v2848_v23, %v746_v21  ;;  %vm858_vm12 = vweird.f32 %v2848_v23 }
 0x252   : > { %vm2890_vm5 = vmor %vm857_vm11, %vm858_vm12 }
 0x253   : > { %v854_v0 = vsub.f32 1.0, %v853_v3  ;;  %v1100_v3 = vadd.f32 %v2578_v51, %v2520_v38 }
 0x255   : > { %v855_v13 = vmul.f32 %v2848_v23, %v854_v0  ;;  %v1099_v0 = vadd.f32 %v2584_v54, %v2530_v45 }
 0x257   : > { %v856_v44 = vadd.f32 %v2848_v23, %v855_v13 }
 0x259   : > { %v860_v13 = vsel %vm2890_vm5, %v2848_v23, %v856_v44 }
 0x277   : > { %v2851_v2 = vpop.xlane.xlu1 %1119  ;;  %v2853_v46 = vpop.xlane.xlu2 %1116 }
 0x278   : > { %v1156_v7 = vand.u32 4294967280, %v2851_v2  ;;  %v1155_v62 = vand.u32 4294967280, %v2853_v46  ;;  %vm1139_vm10 = vcmp.eq.f32.partialorder %v2452_v56, %v2853_v46  ;;  %v2924_v56 = vsel %vm2894_vm3, %v864_v43, %v860_v13 }
 0x279   : > { %vm3217_vm3 = vcmp.eq.f32.partialorder %v2346_v6, %v2492_v28 }
 0x27a   : > { %v1172_v60 = vmax.f32 %v1156_v7, 1e-10  ;;  %v1171_v24 = vmax.f32 %v1155_v62, 1e-10 }
 0x27c   : > { %1996 = vrcp.f32 %v1172_v60  ;;  %v1203_v55 = vand.u32 2147483647, %v1172_v60  ;;  %v1205_v17 = vand.u32 2147483648, %v1172_v60  ;;  %v1188_v62 = vand.u32 2147483647, %v1171_v24 }
 0x27d   : > { %1998 = vrcp.f32 %v1171_v24  ;;  %v1190_v26 = vand.u32 2147483648, %v1171_v24  ;;  %vm1199_vm4 = vweird.f32 %v1172_v60  ;;  %vm1184_vm14 = vweird.f32 %v1171_v24 }
 0x27e   : > { %vm1204_vm1 = vcmp.eq.f32.partialorder %v1203_v55, 8.507059e+37  ;;  %v1206_v45 = vor.u32 1.1754944e-38, %v1205_v17  ;;  %vm1189_vm8 = vcmp.eq.f32.partialorder %v1188_v62, 8.507059e+37 }
 0x27f   : > { %v2860_v14 = vpop.xlane.xlu1 %1125  ;;  %v2862_v42 = vpop.xlane.xlu2 %921 }
 0x280   : > { %v1158_v31 = vand.u32 4294967280, %v2860_v14  ;;  %vm930_vm7 = vcmp.eq.f32.partialorder %v2516_v33, %v2862_v42  ;;  %v946_v18 = vand.u32 4294967280, %v2862_v42 }
 0x281   : > { %v2873_v20 = vsel %vm930_vm7, inf, %v2516_v33 }
 0x282   : > { %v1997_v16 = vpop.eup %1996  ;;  %v2875_v41 = vmax.f32 %v1158_v31, 1e-10  ;;  %v2877_v25 = vmax.f32 %v946_v18, 1e-10  ;;  %v1136_v10 = vsel %vm682_vm2, %v2873_v20, inf }
 0x283   : > { %v1999_v52 = vpop.eup %1998  ;;  %v1195_v11 = vmul.f32 %v1997_v16, %v1172_v60  ;;  %1137 = vmin.xlane.f32.xlu2 %v1136_v10  ;;  %vm1200_vm9 = vweird.f32 %v1997_v16  ;;  %v1191_v10 = vor.u32 1.1754944e-38, %v1190_v26 }
 0x284   : > { %v1180_v27 = vmul.f32 %v1999_v52, %v1171_v24  ;;  %2000 = vrcp.f32 %v2875_v41  ;;  %vm1185_vm0 = vweird.f32 %v1999_v52  ;;  %vm1201_vm13 = vmor %vm1199_vm4, %vm1200_vm9  ;;  %v1233_v60 = vand.u32 2147483647, %v2875_v41 }
 0x285   : > { %v1196_v39 = vsub.f32 1.0, %v1195_v11  ;;  %2002 = vrcp.f32 %v2877_v25  ;;  %vm1186_vm6 = vmor %vm1184_vm14, %vm1185_vm0  ;;  %v1235_v17 = vand.u32 2147483648, %v2875_v41  ;;  %vm1140_vm9 = vcmp.eq.f32.partialorder %v2446_v50, %v2851_v2 }
 0x286   : > { %v1181_v40 = vsub.f32 1.0, %v1180_v27  ;;  %vm1229_vm5 = vweird.f32 %v2875_v41  ;;  %vm1073_vm4 = vweird.f32 %v2877_v25 }
 0x287   : > { %v1197_v7 = vmul.f32 %v1997_v16, %v1196_v39 }
 0x288   : > { %v1182_v18 = vmul.f32 %v1999_v52, %v1181_v40 }
 0x289   : > { %v1198_v1 = vadd.f32 %v1997_v16, %v1197_v7  ;;  %v2909_v24 = vpop.xlane.xlu2 %1128 }
 0x28a   : > { %v2001_v38 = vpop.eup %2000  ;;  %v1183_v51 = vadd.f32 %v1999_v52, %v1182_v18 }
 0x28b   : > { %v2003_v54 = vpop.eup %2002  ;;  %v1202_v21 = vsel %vm1201_vm13, %v1997_v16, %v1198_v1  ;;  %v1225_v11 = vmul.f32 %v2001_v38, %v2875_v41  ;;  %vm1230_vm11 = vweird.f32 %v2001_v38  ;;  %v1159_v1 = vand.u32 4294967280, %v2909_v24 }
 0x28c   : > { %v1207_v47 = vsel %vm1204_vm1, %v1206_v45, %v1202_v21  ;;  %v1187_v23 = vsel %vm1186_vm6, %v1999_v52, %v1183_v51  ;;  %v1069_v27 = vmul.f32 %v2003_v54, %v2877_v25  ;;  %v1077_v52 = vand.u32 2147483647, %v2877_v25  ;;  %vm1231_vm0 = vmor %vm1229_vm5, %vm1230_vm11 }
 0x28d   : > { %v2906_v44 = vadd.f32 %v1207_v47, %v1100_v3  ;;  %v1192_v39 = vsel %vm1189_vm8, %v1191_v10, %v1187_v23  ;;  %v1226_v55 = vsub.f32 1.0, %v1225_v11  ;;  %v1079_v3 = vand.u32 2147483648, %v2877_v25 }
 0x28e   : > { %v1299_v16 = vsel %vm1139_vm10, %v1192_v39, 0.0  ;;  %v2914_v40 = vadd.f32 %v1192_v39, %v1099_v0  ;;  %v1070_v7 = vsub.f32 1.0, %v1069_v27  ;;  %vm1074_vm12 = vweird.f32 %v2003_v54 }
 0x28f   : > { %v1307_v62 = vadd.f32 %v1299_v16, %v2600_v48  ;;  %v1227_v26 = vmul.f32 %v2001_v38, %v1226_v55  ;;  %v1236_v48 = vor.u32 1.1754944e-38, %v1235_v17  ;;  %v1175_v57 = vmax.f32 %v1159_v1, 1e-10  ;;  %vm1075_vm13 = vmor %vm1073_vm4, %vm1074_vm12  ;;  %v1328_v17 = vld [vmem:[%s2839_s23 + $0x18] sm:$0xff] }
 0x290   : > { %v1071_v18 = vmul.f32 %v2003_v54, %v1070_v7  ;;  %vm1234_vm10 = vcmp.eq.f32.partialorder %v1233_v60, 8.507059e+37  ;;  %vm1078_vm1 = vcmp.eq.f32.partialorder %v1077_v52, 8.507059e+37  ;;  %v1080_v43 = vor.u32 1.1754944e-38, %v1079_v3 }
 0x291   : > { %v1228_v46 = vadd.f32 %v2001_v38, %v1227_v26  ;;  %1859 = vmatmul.msk.f32.vlgmr.msra.gmra.mxu1 %vm682_vm2, %v1307_v62  ;;  %v1300_v31 = vsel %vm1140_vm9, %v1207_v47, 0.0  ;;  %2004 = vrcp.f32 %v1175_v57  ;;  %v874_v25 = vsel %vm3217_vm3, %v2924_v56, 0.0  ;;  %v1327_v47 = vld [vmem:[%s2839_s23 + $0x10] sm:$0xff] }
 0x292   : > { %v1072_v0 = vadd.f32 %v2003_v54, %v1071_v18  ;;  %v1308_v45 = vadd.f32 %v1300_v31, %v2592_v61  ;;  %v1250_v11 = vand.u32 2147483648, %v1175_v57  ;;  %v1248_v6 = vand.u32 2147483647, %v1175_v57  ;;  %1869 = vmatmul.msk.f32.gmra.mxu2 %vm1528_vm15, %v1327_v47  ;;  %v1329_v18 = vld [vmem:[%s2839_s23 + $0x20] sm:$0xff] }
 0x293   : > { %v1232_v63 = vsel %vm1231_vm0, %v2001_v38, %v1228_v46  ;;  %v1103_v60 = vadd.f32 %v2645_v32, %v2640_v59 }
 0x294   : > { %v2931_v13 = vsel %vm1234_vm10, %v1236_v48, %v1232_v63  ;;  %v1076_v50 = vsel %vm1075_vm13, %v2003_v54, %v1072_v0  ;;  %v1251_v61 = vor.u32 1.1754944e-38, %v1250_v11  ;;  %vm1249_vm8 = vcmp.eq.f32.partialorder %v1248_v6, 8.507059e+37 }
 0x295   : > { %v2934_v2 = vadd.f32 %v2931_v13, %v1102_v53  ;;  %v2936_v41 = vsel %vm1078_vm1, %v1080_v43, %v1076_v50  ;;  %v1101_v50 = vadd.f32 %v2768_v5, %v2759_v30  ;;  %vm1142_vm1 = vcmp.eq.f32.partialorder %v2510_v35, %v2860_v14 }
 0x296   : > { %v1090_v38 = vsel %vm930_vm7, %v2936_v41, 0.0  ;;  %vm1244_vm7 = vweird.f32 %v1175_v57 }
 0x297   : > { %v2947_v51 = vadd.f32 %v1090_v38, %v874_v25  ;;  %v2005_v54 = vpop.eup %2004 }
 0x298   : > { %v1240_v21 = vmul.f32 %v2005_v54, %v1175_v57  ;;  %vm1245_vm14 = vweird.f32 %v2005_v54 }
 0x299   : > { %1860 = vmatmul.msk.f32.gmra.mxu1 %vm682_vm2, %v1308_v45  ;;  %vm1246_vm6 = vmor %vm1244_vm7, %vm1245_vm14  ;;  %v1330_v45 = vld [vmem:[%s2839_s23 + $0x28] sm:$0xff] }
 0x29a   : > { %v1241_v10 = vsub.f32 1.0, %v1240_v21  ;;  %1870 = vmatmul.msk.f32.gmra.mxu2 %vm1528_vm15, %v1328_v17 }
 0x29c   : > { %v1242_v23 = vmul.f32 %v2005_v54, %v1241_v10 }
 0x29e   : > { %v1243_v33 = vadd.f32 %v2005_v54, %v1242_v23 }
 0x2a0   : > { %v1123_v28 = vpop.xlane.xlu0 %1122  ;;  %v1247_v27 = vsel %vm1246_vm6, %v2005_v54, %v1243_v33 }
 0x2a1   : > { %v1157_v42 = vand.u32 4294967280, %v1123_v28  ;;  %v2954_v55 = vsel %vm1249_vm8, %v1251_v61, %v1247_v27  ;;  %vm1141_vm0 = vcmp.eq.f32.partialorder %v2668_v37, %v1123_v28  ;;  %v1105_v28 = vadd.f32 %v2818_v29, %v2806_v34 }
 0x2a2   : > { %v2958_v16 = vadd.f32 %v2954_v55, %v1103_v60  ;;  %1871 = vmatmul.msk.f32.gmra.mxu2 %vm1528_vm15, %v1329_v18  ;;  %v1332_v18 = vld [vmem:[%s2839_s23 + $0x38] sm:$0xff] }
 0x2a3   : > { %v1173_v39 = vmax.f32 %v1157_v42, 1e-10 }
 0x2a5   : > { %2006 = vrcp.f32 %v1173_v39  ;;  %v1220_v46 = vand.u32 2147483648, %v1173_v39  ;;  %v1218_v0 = vand.u32 2147483647, %v1173_v39  ;;  %vm1214_vm12 = vweird.f32 %v1173_v39 }
 0x2a7   : > { %v1221_v43 = vor.u32 1.1754944e-38, %v1220_v46  ;;  %vm1219_vm5 = vcmp.eq.f32.partialorder %v1218_v0, 8.507059e+37  ;;  %v1626_v46 = vld [vmem:[%s3177_s6 + $0x28] sm:$0xff] }
 0x2a8   : > { %v2961_v7 = vpop.xlane.xlu1 %1134  ;;  %v2963_v52 = vpop.xlane.xlu0 %1131 }
 0x2a9   : > { %v1161_v62 = vand.u32 4294967280, %v2961_v7  ;;  %v1160_v59 = vand.u32 4294967280, %v2963_v52 }
 0x2aa   : > { %1872 = vmatmul.msk.f32.gmra.mxu2 %vm1528_vm15, %v1330_v45  ;;  %v1621_v45 = vld [vmem:[%s3177_s6] sm:$0xff] }
 0x2ab   : > { %v2007_v32 = vpop.eup %2006  ;;  %v1177_v26 = vmax.f32 %v1161_v62, 1e-10  ;;  %v1176_v3 = vmax.f32 %v1160_v59, 1e-10  ;;  %v1331_v59 = vld [vmem:[%s2839_s23 + $0x30] sm:$0xff]  ;;  %s2046_s23 = scalar_lea.hbm %s2045_s20, 64 }
 0x2ac   : > { %v1210_v53 = vmul.f32 %v2007_v32, %v1173_v39  ;;  %vm1215_vm11 = vweird.f32 %v2007_v32  ;;  %v1302_v39 = vsel %vm1142_vm1, %v2931_v13, 0.0  ;;  %p2047_p12 = scmp.ne.s32.totalorder %s2045_s20, %s2046_s23  ;;  %p2052_p2 = scmp.lt.s32.totalorder %s2050_s21, %s2046_s23 }
 0x2ad   : > { %2008 = vrcp.f32 %v1177_v26  ;;  %vm1216_vm9 = vmor %vm1214_vm12, %vm1215_vm11  ;;  %v1280_v6 = vand.u32 2147483648, %v1177_v26  ;;  %v1278_v30 = vand.u32 2147483647, %v1177_v26  ;;  %v1265_v5 = vand.u32 2147483648, %v1176_v3 }
 0x2ae   : > { %v1211_v1 = vsub.f32 1.0, %v1210_v53  ;;  %2010 = vrcp.f32 %v1176_v3  ;;  %v1263_v37 = vand.u32 2147483647, %v1176_v3  ;;  %vm1274_vm13 = vweird.f32 %v1177_v26  ;;  %p2048_p13 = pnand %p2047_p12, %p2200_p4  ;;  %p2053_p3 = por %p2052_p2, %p2051_p1 }
 0x2af   : > { %vm1259_vm14 = vweird.f32 %v1176_v3  ;;  %vm1279_vm7 = vcmp.eq.f32.partialorder %v1278_v30, 8.507059e+37  ;;  %v1266_v62 = vor.u32 1.1754944e-38, %v1265_v5  ;;  %v1310_v14 = vadd.f32 %v1302_v39, %v2627_v19 }
 0x2b0   : > { %v1212_v48 = vmul.f32 %v2007_v32, %v1211_v1  ;;  %vm1264_vm8 = vcmp.eq.f32.partialorder %v1263_v37, 8.507059e+37  ;;  %vm1143_vm11 = vcmp.eq.f32.partialorder %v2590_v36, %v2909_v24  ;;  %vm1144_vm12 = vcmp.eq.f32.partialorder %v2700_v22, %v2963_v52  ;;  %v1635_v22 = vld [vmem:[%s3177_s6 + $0x70] sm:$0xff]  ;;  %v1628_v52 = vld [vmem:[%s3177_s6 + $0x38] sm:$0xff]  ;;  %p2049_p0 = pneg %p2048_p13 }
 0x2b1   : > { %v1303_v13 = vsel %vm1143_vm11, %v2954_v55, 0.0  ;;  %v1631_v24 = vld [vmem:[%s3177_s6 + $0x50] sm:$0xff]  ;;  %v1630_v55 = vld [vmem:[%s3177_s6 + $0x48] sm:$0xff]  ;;  %2012 = vrcp.f32 %v2914_v40  ;;  %v1106_v39 = vadd.f32 %v2936_v41, %v2924_v56  ;;  %v1426_v41 = vand.u32 2147483648, %v2906_v44 }
 0x2b2   : > { %v1213_v57 = vadd.f32 %v2007_v32, %v1212_v48  ;;  %1873 = vmatmul.msk.f32.gmra.mxu2 %vm1528_vm15, %v1331_v59  ;;  %v1627_v1 = vld [vmem:[%s3177_s6 + $0x30] sm:$0xff]  ;;  %v1625_v48 = vld [vmem:[%s3177_s6 + $0x20] sm:$0xff]  ;;  %2014 = vrcp.f32 %v2906_v44  ;;  %p2054_p5 = pnand %p2053_p3, %p2049_p0 }
 0x2b3   : > { %v2009_v63 = vpop.eup %2008 }
 0x2b4   : > { %v2011_v31 = vpop.eup %2010  ;;  %v1217_v25 = vsel %vm1216_vm9, %v2007_v32, %v1213_v57  ;;  %v1270_v38 = vmul.f32 %v2009_v63, %v1177_v26  ;;  %vm1275_vm4 = vweird.f32 %v2009_v63  ;;  %v1104_v32 = vadd.f32 %v2808_v9, %v2801_v58  ;;  %v1624_v57 = vld [vmem:[%s3177_s6 + $0x18] sm:$0xff] }
 0x2b5   : > { %v1222_v54 = vsel %vm1219_vm5, %v1221_v43, %v1217_v25  ;;  %v1255_v21 = vmul.f32 %v2011_v31, %v1176_v3  ;;  %vm1260_vm10 = vweird.f32 %v2011_v31  ;;  %vm1276_vm3 = vmor %vm1274_vm13, %vm1275_vm4  ;;  %v1311_v58 = vadd.f32 %v1303_v13, %v2659_v4  ;;  %v1636_v4 = vld [vmem:[%s3177_s6 + $0x78] sm:$0xff]  ;;  %v1622_v25 = vld [vmem:[%s3177_s6 + $0x8] sm:$0xff] }
 0x2b6   : > { %v1301_v10 = vsel %vm1141_vm0, %v1222_v54, 0.0  ;;  %v2973_v11 = vadd.f32 %v1222_v54, %v1101_v50  ;;  %v1271_v47 = vsub.f32 1.0, %v1270_v38  ;;  %vm1261_vm6 = vmor %vm1259_vm14, %vm1260_vm10  ;;  %vm1145_vm9 = vcmp.eq.f32.partialorder %v2706_v8, %v2961_v7  ;;  %1641 = vmatpush.msrb.mxu0 %v1636_v4  ;;  %1885 = vmatpush.msra.mxu3 %v1636_v4  ;;  %v1634_v8 = vld [vmem:[%s3177_s6 + $0x68] sm:$0xff]  ;;  %v1629_v7 = vld [vmem:[%s3177_s6 + $0x40] sm:$0xff] }
 0x2b7   : > { %v1309_v23 = vadd.f32 %v1301_v10, %v2789_v49  ;;  %v1256_v33 = vsub.f32 1.0, %v1255_v21  ;;  %v1281_v49 = vor.u32 1.1754944e-38, %v1280_v6  ;;  %v2013_v43 = vpop.eup %2012  ;;  %vm1405_vm10 = vweird.f32 %v2914_v40 }
 0x2b8   : > { %v1272_v42 = vmul.f32 %v2009_v63, %v1271_v47  ;;  %1642 = vmatpush.msrb.mxu0 %v1635_v22  ;;  %1886 = vmatpush.msra.mxu3 %v1635_v22  ;;  %v1401_v38 = vmul.f32 %v2013_v43, %v2914_v40  ;;  %v2015_v21 = vpop.eup %2014  ;;  %vm1406_vm5 = vweird.f32 %v2013_v43  ;;  %v1427_v4 = vor.u32 1.1754944e-38, %v1426_v41 }
 0x2b9   : > { %v1257_v61 = vmul.f32 %v2011_v31, %v1256_v33  ;;  %1861 = vmatmul.msk.f32.gmra.mxu1 %vm682_vm2, %v1309_v23  ;;  %v1416_v6 = vmul.f32 %v2015_v21, %v2906_v44  ;;  %vm1407_vm1 = vmor %vm1405_vm10, %vm1406_vm5 }
 0x2ba   : > { %v1273_v60 = vadd.f32 %v2009_v63, %v1272_v42  ;;  %1643 = vmatpush.msrb.mxu0 %v1634_v8  ;;  %1887 = vmatpush.msra.mxu3 %v1634_v8  ;;  %v1402_v54 = vsub.f32 1.0, %v1401_v38 }
 0x2bb   : > { %v1258_v27 = vadd.f32 %v2011_v31, %v1257_v61  ;;  %1874 = vmatmul.msk.f32.gmra.mxu2 %vm1528_vm15, %v1332_v18  ;;  %v1417_v37 = vsub.f32 1.0, %v1416_v6 }
 0x2bc   : > { %v1277_v17 = vsel %vm1276_vm3, %v2009_v63, %v1273_v60  ;;  %v1403_v23 = vmul.f32 %v2013_v43, %v1402_v54  ;;  %v1411_v60 = vand.u32 2147483648, %v2914_v40 }
 0x2bd   : > { %v1282_v34 = vsel %vm1279_vm7, %v1281_v49, %v1277_v17  ;;  %v1262_v29 = vsel %vm1261_vm6, %v2011_v31, %v1258_v27  ;;  %v1623_v31 = vld [vmem:[%s3177_s6 + $0x10] sm:$0xff]  ;;  %v1409_v27 = vand.u32 2147483647, %v2914_v40  ;;  %vm1421_vm7 = vweird.f32 %v2015_v21 }
 0x2be   : > { %v2986_v26 = vadd.f32 %v1282_v34, %v1105_v28  ;;  %v1267_v35 = vsel %vm1264_vm8, %v1266_v62, %v1262_v29  ;;  %v1305_v3 = vsel %vm1145_vm9, %v1282_v34, 0.0  ;;  %v1404_v61 = vadd.f32 %v2013_v43, %v1403_v23 }
 0x2bf   : > { %v2989_v53 = vadd.f32 %v1267_v35, %v1104_v32  ;;  %v1304_v9 = vsel %vm1144_vm12, %v1267_v35, 0.0  ;;  %v1313_v36 = vadd.f32 %v1305_v3, %v2830_v15  ;;  %v1632_v15 = vld [vmem:[%s3177_s6 + $0x58] sm:$0xff]  ;;  %v1418_v32 = vmul.f32 %v2015_v21, %v1417_v37 }
 0x2c0   : > { %v1312_v19 = vadd.f32 %v1304_v9, %v2824_v12  ;;  %v1633_v12 = vld [vmem:[%s3177_s6 + $0x60] sm:$0xff]  ;;  %v1408_v59 = vsel %vm1407_vm1, %v2013_v43, %v1404_v61  ;;  %v1412_v35 = vor.u32 1.1754944e-38, %v1411_v60  ;;  %vm1410_vm14 = vcmp.eq.f32.partialorder %v1409_v27, 8.507059e+37 }
 0x2c1   : > { %1862 = vmatmul.msk.f32.gmra.mxu1 %vm682_vm2, %v1310_v14  ;;  %1644 = vmatpush.msrb.mxu0 %v1633_v12  ;;  %v1419_v56 = vadd.f32 %v2015_v21, %v1418_v32  ;;  %vm1420_vm6 = vweird.f32 %v2906_v44  ;;  %vm1435_vm12 = vweird.f32 %v2973_v11  ;;  %v1454_v61 = vand.u32 2147483647, %v2934_v2 }
 0x2c2   : > { %1888 = vmatpush.msra.mxu3 %v1633_v12  ;;  %vm1422_vm8 = vmor %vm1420_vm6, %vm1421_vm7  ;;  %vm1465_vm1 = vweird.f32 %v2958_v16  ;;  %vm1480_vm6 = vweird.f32 %v2989_v53 }
 0x2c3   : > { %1645 = vmatpush.msrb.mxu0 %v1632_v15  ;;  %vm1455_vm10 = vcmp.eq.f32.partialorder %v1454_v61, 8.507059e+37 }
 0x2c4   : > { %1889 = vmatpush.msra.mxu3 %v1632_v15 }
 0x2c5   : > { %1646 = vmatpush.msrb.mxu0 %v1631_v24 }
 0x2c6   : > { %1890 = vmatpush.msra.mxu3 %v1631_v24 }
 0x2c7   : > { %1647 = vmatpush.msrb.mxu0 %v1630_v55 }
 0x2c8   : > { %1891 = vmatpush.msra.mxu3 %v1630_v55 }
 0x2c9   : > { %1863 = vmatmul.msk.f32.gmra.mxu1 %vm682_vm2, %v1311_v58  ;;  %1648 = vmatpush.msrb.mxu0 %v1629_v7  ;;  %v1413_v58 = vsel %vm1410_vm14, %v1412_v35, %v1408_v59  ;;  %v1471_v35 = vand.u32 2147483648, %v2958_v16 }
 0x2ca   : > { %1892 = vmatpush.msra.mxu3 %v1629_v7 }
 0x2cb   : > { %1649 = vmatpush.msrb.mxu0 %v1628_v52  ;;  %v1570_v14 = vpop.f32.mrf.mxu2 }
 0x2cc   : > { %1893 = vmatpush.msra.mxu3 %v1628_v52 }
 0x2cd   : > { %1650 = vmatpush.msrb.mxu0 %v1627_v1 }
 0x2ce   : > { %1894 = vmatpush.msra.mxu3 %v1627_v1 }
 0x2cf   : > { %1651 = vmatpush.msrb.mxu0 %v1626_v46 }
 0x2d0   : > { %1895 = vmatpush.msra.mxu3 %v1626_v46 }
 0x2d1   : > { %1864 = vmatmul.msk.f32.gmra.mxu1 %vm682_vm2, %v1312_v19  ;;  %1652 = vmatpush.msrb.mxu0 %v1625_v48 }
 0x2d2   : > { %1896 = vmatpush.msra.mxu3 %v1625_v48 }
 0x2d3   : > { %1653 = vmatpush.msrb.mxu0 %v1624_v57  ;;  %v1573_v15 = vpop.f32.mrf.mxu2 }
 0x2d4   : > { %1897 = vmatpush.msra.mxu3 %v1624_v57 }
 0x2d5   : > { %1654 = vmatpush.msrb.mxu0 %v1623_v31 }
 0x2d6   : > { %1898 = vmatpush.msra.mxu3 %v1623_v31 }
 0x2d7   : > { %1655 = vmatpush.msrb.mxu0 %v1622_v25 }
 0x2d8   : > { %1899 = vmatpush.msra.mxu3 %v1622_v25  ;;  %v1439_v25 = vand.u32 2147483647, %v2973_v11 }
 0x2d9   : > { %1865 = vmatmul.msk.f32.gmra.mxu1 %vm682_vm2, %v1313_v36  ;;  %1656 = vmatpush.msrb.mxu0 %v1621_v45  ;;  %v1423_v36 = vsel %vm1422_vm8, %v2015_v21, %v1419_v56 }
 0x2da   : > { %1900 = vmatpush.msra.mxu3 %v1621_v45 }
 0x2f6   : > { %v1138_v0 = vpop.xlane.xlu2 %1137 }
 0x2f7   : > { %v1162_v63 = vand.u32 4294967280, %v1138_v0  ;;  %vm1146_vm3 = vcmp.eq.f32.partialorder %v2873_v20, %v1138_v0  ;;  %v3073_v20 = vld [vmem:[%s3176_s5] ss:$0 sm:$0xff] }
 0x2f9   : > { %v1178_v50 = vmax.f32 %v1162_v63, 1e-10 }
 0x2fb   : > { %2016 = vrcp.f32 %v1178_v50  ;;  %v1295_v42 = vand.u32 2147483648, %v1178_v50  ;;  %v1293_v5 = vand.u32 2147483647, %v1178_v50  ;;  %vm1289_vm0 = vweird.f32 %v1178_v50 }
 0x2fc   : > { %2018 = vrcp.f32 %v2973_v11 }
 0x2fd   : > { %v1296_v49 = vor.u32 1.1754944e-38, %v1295_v42  ;;  %vm1294_vm13 = vcmp.eq.f32.partialorder %v1293_v5, 8.507059e+37  ;;  %2020 = vrcp.f32 %v2934_v2 }
 0x2fe   : > { %2022 = vrcp.f32 %v2958_v16 }
 0x2ff   : > { %2024 = vrcp.f32 %v2989_v53 }
 0x300   : > { %2026 = vrcp.f32 %v2986_v26 }
 0x301   : > { %v2017_v10 = vpop.eup %2016 }
 0x302   : > { %v1285_v47 = vmul.f32 %v2017_v10, %v1178_v50  ;;  %vm1290_vm15 = vweird.f32 %v2017_v10  ;;  %v1441_v50 = vand.u32 2147483648, %v2973_v11 }
 0x303   : > { %vm1291_vm4 = vmor %vm1289_vm0, %vm1290_vm15  ;;  %vm1440_vm15 = vcmp.eq.f32.partialorder %v1439_v25, 8.507059e+37  ;;  %vm1450_vm0 = vweird.f32 %v2934_v2 }
 0x304   : > { %v1286_v33 = vsub.f32 1.0, %v1285_v47  ;;  %v1442_v21 = vor.u32 1.1754944e-38, %v1441_v50 }
 0x306   : > { %v1287_v30 = vmul.f32 %v2017_v10, %v1286_v33 }
 0x308   : > { %v1288_v28 = vadd.f32 %v2017_v10, %v1287_v30  ;;  %v1456_v30 = vand.u32 2147483648, %v2934_v2 }
 0x30a   : > { %v1292_v17 = vsel %vm1291_vm4, %v2017_v10, %v1288_v28  ;;  %v1457_v27 = vor.u32 1.1754944e-38, %v1456_v30 }
 0x30b   : > { %v1297_v62 = vsel %vm1294_vm13, %v1296_v49, %v1292_v17 }
 0x30c   : > { %v1306_v34 = vsel %vm1146_vm3, %v1297_v62, 0.0  ;;  %v3066_v29 = vadd.f32 %v1297_v62, %v1106_v39 }
 0x30d   : > { %v1314_v13 = vadd.f32 %v1306_v34, %v2947_v51  ;;  %v1424_v51 = vand.u32 2147483647, %v2906_v44  ;;  %v2019_v44 = vpop.eup %2018 }
 0x30e   : > { %v1376_v40 = vpop.f32.mrf.mxu1  ;;  %v1431_v18 = vmul.f32 %v2019_v44, %v2973_v11  ;;  %v2021_v46 = vpop.eup %2020  ;;  %vm1436_vm11 = vweird.f32 %v2019_v44  ;;  %2028 = vrcp.f32 %v3066_v29 }
 0x30f   : > { %v1520_v9 = vmul.f32 %v1413_v58, %v1376_v40  ;;  %1866 = vmatmul.msk.f32.gmra.mxu1 %vm682_vm2, %v1314_v13  ;;  %vm1425_vm2 = vcmp.eq.f32.partialorder %v1424_v51, 8.507059e+37  ;;  %v1446_v0 = vmul.f32 %v2021_v46, %v2934_v2  ;;  %v2023_v31 = vpop.eup %2022  ;;  %vm1437_vm9 = vmor %vm1435_vm12, %vm1436_vm11  ;;  %vm1451_vm5 = vweird.f32 %v2021_v46 }
 0x310   : > { %v1428_v12 = vsel %vm1425_vm2, %v1427_v4, %v1423_v36  ;;  %v1432_v1 = vsub.f32 1.0, %v1431_v18  ;;  %v1461_v54 = vmul.f32 %v2023_v31, %v2958_v16  ;;  %v2025_v42 = vpop.eup %2024  ;;  %vm1452_vm4 = vmor %vm1450_vm0, %vm1451_vm5  ;;  %vm1466_vm13 = vweird.f32 %v2023_v31 }
 0x311   : > { %v1594_v19 = vadd.f32 %v1570_v14, %v1520_v9  ;;  %v1447_v43 = vsub.f32 1.0, %v1446_v0  ;;  %v1476_v49 = vmul.f32 %v2025_v42, %v2989_v53  ;;  %v2027_v2 = vpop.eup %2026  ;;  %v1469_v13 = vand.u32 2147483647, %v2958_v16  ;;  %vm1467_vm3 = vmor %vm1465_vm1, %vm1466_vm13 }
 0x312   : > { %v1433_v48 = vmul.f32 %v2019_v44, %v1432_v1  ;;  %v1462_v33 = vsub.f32 1.0, %v1461_v54  ;;  %v1491_v41 = vmul.f32 %v2027_v2, %v2986_v26  ;;  %vm1481_vm7 = vweird.f32 %v2025_v42 }
 0x313   : > { %v1605_v3 = vadd.f32 %v3073_v20, %v1594_v19  ;;  %v1448_v45 = vmul.f32 %v2021_v46, %v1447_v43  ;;  %v1477_v34 = vsub.f32 1.0, %v1476_v49  ;;  %v1472_v19 = vor.u32 1.1754944e-38, %v1471_v35  ;;  %vm1482_vm8 = vmor %vm1480_vm6, %vm1481_vm7 }
 0x314   : > { %v1434_v63 = vadd.f32 %v2019_v44, %v1433_v48  ;;  %v1463_v60 = vmul.f32 %v2023_v31, %v1462_v33  ;;  %vm1470_vm14 = vcmp.eq.f32.partialorder %v1469_v13, 8.507059e+37  ;;  %v1486_v16 = vand.u32 2147483648, %v2989_v53 }
 0x315   : > { %v1613_v22 = vmax.f32 %v1605_v3, 0.0  ;;  %v1576_v57 = vpop.f32.mrf.mxu2  ;;  %v1449_v6 = vadd.f32 %v2021_v46, %v1448_v45  ;;  %v1478_v56 = vmul.f32 %v2025_v42, %v1477_v34  ;;  %vm1496_vm11 = vweird.f32 %v2027_v2 }
 0x316   : > { %v1379_v8 = vpop.f32.mrf.mxu1  ;;  %v1438_v38 = vsel %vm1437_vm9, %v2019_v44, %v1434_v63  ;;  %v1464_v32 = vadd.f32 %v2023_v31, %v1463_v60  ;;  %vm1495_vm12 = vweird.f32 %v2986_v26  ;;  %vm1510_vm0 = vweird.f32 %v3066_v29 }
 0x317   : > { %v1521_v24 = vmul.f32 %v1428_v12, %v1379_v8  ;;  %1657 = vmatmul.f32.vlgmr.msrb.gmra.mxu0 %v1613_v22  ;;  %v1443_v47 = vsel %vm1440_vm15, %v1442_v21, %v1438_v38  ;;  %v1453_v37 = vsel %vm1452_vm4, %v2021_v46, %v1449_v6  ;;  %v1479_v22 = vadd.f32 %v2025_v42, %v1478_v56  ;;  %vm1497_vm9 = vmor %vm1495_vm12, %vm1496_vm11 }
 0x318   : > { %v1458_v62 = vsel %vm1455_vm10, %v1457_v27, %v1453_v37  ;;  %v1468_v58 = vsel %vm1467_vm3, %v2023_v31, %v1464_v32  ;;  %v1492_v8 = vsub.f32 1.0, %v1491_v41 }
 0x319   : > { %v1595_v55 = vadd.f32 %v1573_v15, %v1521_v24  ;;  %v1473_v36 = vsel %vm1470_vm14, %v1472_v19, %v1468_v58  ;;  %v1484_v15 = vand.u32 2147483647, %v2989_v53  ;;  %v1483_v24 = vsel %vm1482_vm8, %v2025_v42, %v1479_v22 }
 0x31a   : > { %v1499_v53 = vand.u32 2147483647, %v2986_v26 }
 0x31b   : > { %v1606_v7 = vadd.f32 %v3073_v20, %v1595_v55  ;;  %vm1485_vm2 = vcmp.eq.f32.partialorder %v1484_v15, 8.507059e+37 }
 0x31c   : > { %vm1500_vm15 = vcmp.eq.f32.partialorder %v1499_v53, 8.507059e+37 }
 0x31d   : > { %v1614_v52 = vmax.f32 %v1606_v7, 0.0  ;;  %v1579_v5 = vpop.f32.mrf.mxu2  ;;  %v1493_v7 = vmul.f32 %v2027_v2, %v1492_v8 }
 0x31f   : > { %1660 = vmatmul.f32.gmra.mxu0 %v1614_v52  ;;  %v1487_v52 = vor.u32 1.1754944e-38, %v1486_v16  ;;  %v1494_v0 = vadd.f32 %v2027_v2, %v1493_v7 }
 0x321   : > { %v1488_v46 = vsel %vm1485_vm2, %v1487_v52, %v1483_v24  ;;  %v1498_v43 = vsel %vm1497_vm9, %v2027_v2, %v1494_v0 }
 0x325   : > { %v1582_v40 = vpop.f32.mrf.mxu2 }
 0x32d   : > { %v1585_v44 = vpop.f32.mrf.mxu2 }
 0x335   : > { %v1588_v54 = vpop.f32.mrf.mxu2 }
 0x336   : > { %v1382_v10 = vpop.f32.mrf.mxu1 }
 0x337   : > { %v1522_v23 = vmul.f32 %v1443_v47, %v1382_v10 }
 0x339   : > { %v1596_v11 = vadd.f32 %v1576_v57, %v1522_v23  ;;  %v1501_v57 = vand.u32 2147483648, %v2986_v26  ;;  %v2029_v26 = vpop.eup %2028 }
 0x33a   : > { %v1506_v6 = vmul.f32 %v2029_v26, %v3066_v29  ;;  %vm1511_vm5 = vweird.f32 %v2029_v26 }
 0x33b   : > { %v1607_v28 = vadd.f32 %v3073_v20, %v1596_v11  ;;  %v1502_v50 = vor.u32 1.1754944e-38, %v1501_v57  ;;  %v1514_v11 = vand.u32 2147483647, %v3066_v29  ;;  %vm1512_vm4 = vmor %vm1510_vm0, %vm1511_vm5 }
 0x33c   : > { %v1507_v33 = vsub.f32 1.0, %v1506_v6 }
 0x33d   : > { %v1615_v39 = vmax.f32 %v1607_v28, 0.0  ;;  %v1503_v45 = vsel %vm1500_vm15, %v1502_v50, %v1498_v43  ;;  %vm1515_vm10 = vcmp.eq.f32.partialorder %v1514_v11, 8.507059e+37 }
 0x33e   : > { %v1385_v17 = vpop.f32.mrf.mxu1  ;;  %v1508_v42 = vmul.f32 %v2029_v26, %v1507_v33  ;;  %v1591_v49 = vpop.f32.mrf.mxu2 }
 0x33f   : > { %v1523_v59 = vmul.f32 %v1458_v62, %v1385_v17  ;;  %1663 = vmatmul.f32.vlgmr.msra.gmra.mxu3 %v1615_v39  ;;  %v1965_v17 = vld [vmem:[%s3178_s7] ss:$0 sm:$0xff] }
 0x340   : > { %v1509_v30 = vadd.f32 %v2029_v26, %v1508_v42 }
 0x341   : > { %v1597_v14 = vadd.f32 %v1579_v5, %v1523_v59  ;;  %v1516_v5 = vand.u32 2147483648, %v3066_v29 }
 0x342   : > { %v1513_v61 = vsel %vm1512_vm4, %v2029_v26, %v1509_v30 }
 0x343   : > { %v1608_v9 = vadd.f32 %v3073_v20, %v1597_v14  ;;  %v1517_v37 = vor.u32 1.1754944e-38, %v1516_v5 }
 0x345   : > { %v1616_v51 = vmax.f32 %v1608_v9, 0.0  ;;  %v1518_v60 = vsel %vm1515_vm10, %v1517_v37, %v1513_v61 }
 0x346   : > { %v1388_v3 = vpop.f32.mrf.mxu1 }
 0x347   : > { %v1524_v4 = vmul.f32 %v1473_v36, %v1388_v3  ;;  %1666 = vmatmul.f32.gmra.mxu3 %v1616_v51 }
 0x349   : > { %v1598_v12 = vadd.f32 %v1582_v40, %v1524_v4 }
 0x34b   : > { %v1609_v55 = vadd.f32 %v3073_v20, %v1598_v12 }
 0x34d   : > { %v1617_v18 = vmax.f32 %v1609_v55, 0.0 }
 0x34e   : > { %v1391_v1 = vpop.f32.mrf.mxu1 }
 0x34f   : > { %v1525_v48 = vmul.f32 %v1488_v46, %v1391_v1  ;;  %1669 = vmatmul.f32.gmra.mxu3 %v1617_v18 }
 0x351   : > { %v1599_v63 = vadd.f32 %v1585_v44, %v1525_v48 }
 0x353   : > { %v1610_v31 = vadd.f32 %v3073_v20, %v1599_v63 }
 0x355   : > { %v1618_v25 = vmax.f32 %v1610_v31, 0.0 }
 0x356   : > { %v1394_v38 = vpop.f32.mrf.mxu1 }
 0x357   : > { %v1526_v21 = vmul.f32 %v1503_v45, %v1394_v38  ;;  %1672 = vmatmul.f32.gmra.mxu3 %v1618_v25 }
 0x359   : > { %v1600_v10 = vadd.f32 %v1588_v54, %v1526_v21 }
 0x35b   : > { %v1611_v47 = vadd.f32 %v3073_v20, %v1600_v10 }
 0x35d   : > { %v1619_v23 = vmax.f32 %v1611_v47, 0.0 }
 0x35f   : > { %1675 = vmatmul.f32.gmra.mxu3 %v1619_v23 }
 0x38c   : > { %v1397_v28 = vpop.f32.mrf.mxu1 }
 0x38d   : > { %v1527_v27 = vmul.f32 %v1518_v60, %v1397_v28 }
 0x38f   : > { %v1601_v39 = vadd.f32 %v1591_v49, %v1527_v27 }
 0x391   : > { %v1612_v62 = vadd.f32 %v3073_v20, %v1601_v39 }
 0x393   : > { %v1620_v59 = vmax.f32 %v1612_v62, 0.0 }
 0x394   : > { %v1658_v29 = vpop.f32.mrf.mxu0 }
 0x395   : > { %v1659_v32 = vadd.f32 %v1965_v17, %v1658_v29  ;;  %1678 = vmatmul.f32.gmra.mxu3 %v1620_v59 }
 0x397   : > { %v1682_v34 = vmax.f32 %v1659_v32, 0.0 }
 0x399   : > { %1690 = vst [vmem:[%s3122_s16] sm:$0xff] %v1682_v34 }
 0x39c   : > { %v1661_v2 = vpop.f32.mrf.mxu0 }
 0x39d   : > { %v1662_v35 = vadd.f32 %v1965_v17, %v1661_v2 }
 0x39f   : > { %v1683_v14 = vmax.f32 %v1662_v35, 0.0 }
 0x3a1   : > { %1691 = vst [vmem:[%s3122_s16 + $0x8] sm:$0xff] %v1683_v14 }
 0x3c2   : > { %v1664_v20 = vpop.f32.mrf.mxu3 }
 0x3c3   : > { %v1665_v13 = vadd.f32 %v1965_v17, %v1664_v20 }
 0x3c5   : > { %v1684_v40 = vmax.f32 %v1665_v13, 0.0 }
 0x3c7   : > { %1692 = vst [vmem:[%s3122_s16 + $0x10] sm:$0xff] %v1684_v40 }
 0x3ca   : > { %v1667_v58 = vpop.f32.mrf.mxu3 }
 0x3cb   : > { %v1668_v9 = vadd.f32 %v1965_v17, %v1667_v58 }
 0x3cd   : > { %v1685_v56 = vmax.f32 %v1668_v9, 0.0 }
 0x3cf   : > { %1693 = vst [vmem:[%s3122_s16 + $0x18] sm:$0xff] %v1685_v56 }
 0x3d2   : > { %v1670_v41 = vpop.f32.mrf.mxu3 }
 0x3d3   : > { %v1671_v19 = vadd.f32 %v1965_v17, %v1670_v41 }
 0x3d5   : > { %v1686_v51 = vmax.f32 %v1671_v19, 0.0 }
 0x3d7   : > { %1694 = vst [vmem:[%s3122_s16 + $0x20] sm:$0xff] %v1686_v51 }
 0x3da   : > { %v1673_v3 = vpop.f32.mrf.mxu3 }
 0x3db   : > { %v1674_v36 = vadd.f32 %v1965_v17, %v1673_v3 }
 0x3dd   : > { %v1687_v4 = vmax.f32 %v1674_v36, 0.0 }
 0x3df   : > { %1695 = vst [vmem:[%s3122_s16 + $0x28] sm:$0xff] %v1687_v4 }
 0x3e2   : > { %v1676_v22 = vpop.f32.mrf.mxu3 }
 0x3e3   : > { %v1677_v8 = vadd.f32 %v1965_v17, %v1676_v22 }
 0x3e5   : > { %v1688_v16 = vmax.f32 %v1677_v8, 0.0 }
 0x3e7   : > { %1696 = vst [vmem:[%s3122_s16 + $0x30] sm:$0xff] %v1688_v16 }
 0x418   : > { %v1679_v12 = vpop.f32.mrf.mxu3 }
 0x419   : > { %v1680_v15 = vadd.f32 %v1965_v17, %v1679_v12 }
 0x41b   : > { %v1689_v24 = vmax.f32 %v1680_v15, 0.0 }
 0x41d   : > { %1697 = vst [vmem:[%s3122_s16 + $0x38] sm:$0xff] %v1689_v24 }
 0x41e   : > { %2057 = shalt.err (!%p2054_p5)
}
 0x41f   : > { %s2113_s19 = smov 128   ;;  %s2114_s16 = smov 8  }
 0x420   : > { %1901 = dma.vmem_to_hbm [thread:$0]  (%p2200_p4), %s1714_s26, 1024, %s1716_s11, %s1699_s12, %s2113_s19, %s2113_s19, %s2114_s16  }
 0x421 PF: > { %p1907_p6 = scmp.ge.s32.totalorder %s2108_s10, 2  ;;  %s1730_s25 = sand.u32 1, %s2088_s27  }
 0x422   : > { %s1731_s30 = scalar_lea.sflag [#allocation3], %s1730_s25 }
 0x423   : > { %p1904_p7 = pnand %p1907_p6, %p2207_p8 }
 0x425   : > { %p1905_p9 = pneg %p1904_p7 }
 0x427   : > { %2083 = dma.done.wait (%p1905_p9), %s1731_s30, 1024  }
 0x428   : > { %2085 = vsyncadd (%p1905_p9), %s1731_s30, 4294966272  ;;  %s21_s10 = sadd.s32 1, %s2108_s10   ;;  %s3218_s27 = smov %s2092_s28 }
 0x429   : > { %p18_p10 = scmp.ge.s32.totalorder %s21_s10, 4   ;;  %s3219_s28 = smov %s2096_s29 }
 0x42a   : > { %s3220_s29 = smov %s2213_s18  ;;  %s3221_s30 = smov %s2104_s9 }
 0x42b   : > { %s3222_s9 = smov %s3224_s13  ;;  %20 = sbr.rel (!%p18_p10) target bundleno = 4 (0x4), region = 96 }
 0x430   :  { %1737 = vsyncpa [#allocation3], 1 }
 0x431   :  { %1739 = vsyncpa [#allocation3 + $0x1], 1 }

</bundles_post_ra>
